<compile_context>
chip_gen: v5e
topology: v5e:2x2
jax: 0.10.0
libtpu: 0.0.40
codegen_flags: <defaults>
</compile_context>

<pallas_src>
import functools
import math

import jax
import jax.numpy as jnp
from jax.experimental import pallas as pl
from jax.experimental.pallas import tpu as pltpu


_ACT_DTYPE = jnp.bfloat16     # inter-layer activation transit dtype (HBM)
_LANE = 128


# ----------------------------- Pallas kernels -------------------------------

def _lift_kernel(x_ref, w_ref, b_ref, o_ref, *, tile, h_size, w_size):
    """fc0 lifting with in-kernel grid synthesis.

    x_ref: (1, 1, T) f32 input tile (the single data channel)
    w_ref: (Cout, 3) fc0 weight (columns: [x, gridx, gridy])
    b_ref: (Cout, 1) fc0 bias
    o_ref: (1, Cout, T) bf16 output tile

    gridx/gridy are reconstructed from the flattened spatial index so only the
    data channel travels through HBM; the K=3 contraction is done as 3 VPU
    broadcast-FMAs (an MXU dot with K=3 would be pure push/pop latency).
    """
    ti = pl.program_id(1)
    col = (ti * tile + jax.lax.broadcasted_iota(jnp.int32, (1, tile), 1))
    colf = col.astype(jnp.float32)                       # exact for col < 2^24
    wf = float(w_size)
    row = jnp.floor(colf * (1.0 / wf))                   # approx row index
    j = colf - row * wf
    # one exact-correction step guards against f32 divide rounding
    row = row + jnp.where(j >= wf, 1.0, 0.0) - jnp.where(j < 0.0, 1.0, 0.0)
    j = colf - row * wf
    inv_x = 1.0 / (h_size - 1) if h_size > 1 else 0.0    # np.linspace(0,1,H)
    inv_y = 1.0 / (w_size - 1) if w_size > 1 else 0.0
    gx = row * inv_x                                     # varies along H
    gy = j * inv_y                                       # varies along W

    w = w_ref[...]                                       # (Cout, 3)
    out = (w[:, 0:1] * x_ref[0] + w[:, 1:2] * gx + w[:, 2:3] * gy
           + b_ref[...])                                 # (Cout, T) f32
    o_ref[0] = out.astype(o_ref.dtype)


def _fno_layer_kernel(x_ref, spec_ref, w_ref, b_ref, sp_ref, o_ref, *,
                      apply_swish):
    """One FNO block tail: o = maybe_swish(W @ x + b + spectral).

    Fuses the 1x1 ("Conv1d") channel mix, the residual add of the spectral
    branch, and the Swish activation in one VMEM-resident pass. x/spec/o are
    bf16 in HBM; all math runs on the f32 accumulator (v5e VPU has no bf16).
    sp_ref holds softplus(beta) in SMEM (unused when no Swish).
    """
    x = x_ref[0].astype(jnp.float32)                     # (C, T)
    acc = jnp.dot(w_ref[...], x, preferred_element_type=jnp.float32)
    acc = acc + b_ref[...] + spec_ref[0].astype(jnp.float32)
    if apply_swish:
        sp = sp_ref[0]
        acc = (acc * jax.nn.sigmoid(acc * sp)) / 1.1
    o_ref[0] = acc.astype(o_ref.dtype)


def _head_kernel(x_ref, w1_ref, b1_ref, sp_ref, w2_ref, b2_ref, o_ref):
    """Projection head fc1 -> Swish(a3) -> fc2, fused.

    x_ref : (1, C, T) bf16    w1_ref: (128, C) f32    b1_ref: (128, 1) f32
    w2_ref: (1, 128) f32      b2_ref: (1, 1)  f32     o_ref : (1, 1, T) f32
    The 128-wide hidden stays in VMEM/vregs; fc2 is an MXU dot (not a 128-deep
    cross-sublane reduction).
    """
    h = jnp.dot(w1_ref[...], x_ref[0].astype(jnp.float32),
                preferred_element_type=jnp.float32)      # (128, T)
    h = h + b1_ref[...]
    sp = sp_ref[0]
    h = (h * jax.nn.sigmoid(h * sp)) / 1.1
    o = jnp.dot(w2_ref[...], h, preferred_element_type=jnp.float32)  # (1, T)
    o_ref[0] = o + b2_ref[...]


# ----------------------------- tiling plan -----------------------------------

def _round_up(n, m):
    return ((n + m - 1) // m) * m


def _largest_dividing_tile(total, cap):
    """Largest multiple of 128 that is <= cap and divides total (total%128==0)."""
    t = max(_LANE, min(cap, total))
    t -= t % _LANE
    while total % t:
        t -= _LANE
    return t


def _plan_spatial(hw, batch, width):
    """Pick padded spatial extent + lane-dense tiles.

    Returns (hwp, t_layer, t_head). hwp is HW rounded up so every tile is an
    unmasked multiple of 128 (no masked vst, no full-extent VMEM blowups).
    The layer tile targets ~1 MiB bf16 blocks (x+spec+out double-buffered
    stays ~6 MiB at width=32 -> fits every generation's default scoped VMEM,
    no vmem_limit_bytes needed); the head tile is capped at 4096 to bound the
    (128, T) f32 hidden scratch (2 MiB).
    """
    hw128 = _round_up(hw, _LANE)
    # ~512 KiB of bf16 activation per block per stream at the chosen width.
    layer_cap = max(_LANE, min(16384, ((512 * 1024) // max(width, 1))
                               // _LANE * _LANE))
    hwp = _round_up(hw128, min(layer_cap, hw128))
    t_layer = _largest_dividing_tile(hwp, layer_cap)
    # v7x megacore: keep >= 2 grid steps so both TensorCores get work.
    if batch * (hwp // t_layer) < 2 and t_layer % (2 * _LANE) == 0:
        t_layer //= 2
    t_head = _largest_dividing_tile(hwp, min(4096, t_layer))
    return hwp, t_layer, t_head


def _pad_last(a, n):
    if a.shape[-1] == n:
        return a
    pad = [(0, 0)] * (a.ndim - 1) + [(0, n - a.shape[-1])]
    return jnp.pad(a, pad)


# ----------------------------- Pallas wrappers -------------------------------

def _pallas_lift(x, w, b, h_size, w_size, tile):
    """x: (B, 1, HWp) f32 -> (B, Cout, HWp) bf16."""
    B, _, HWp = x.shape
    Cout = w.shape[0]
    return pl.pallas_call(
        functools.partial(_lift_kernel, tile=tile, h_size=h_size, w_size=w_size),
        out_shape=jax.ShapeDtypeStruct((B, Cout, HWp), _ACT_DTYPE),
        grid_spec=pltpu.PrefetchScalarGridSpec(
            num_scalar_prefetch=0,
            grid=(B, HWp // tile),
            in_specs=[
                pl.BlockSpec((1, 1, tile), lambda bi, ti: (bi, 0, ti)),
                pl.BlockSpec((Cout, 3), lambda bi, ti: (0, 0)),
                pl.BlockSpec((Cout, 1), lambda bi, ti: (0, 0)),
            ],
            out_specs=pl.BlockSpec((1, Cout, tile), lambda bi, ti: (bi, 0, ti)),
        ),
        compiler_params=pltpu.CompilerParams(
            dimension_semantics=("parallel", "parallel")),
    )(x, w, b.reshape(Cout, 1))


def _pallas_fno_layer(x, spec, w, b, sp_beta, apply_swish, tile):
    """x, spec: (B, C, HWp) bf16; w: (C, C) f32; b: (C,) f32; sp_beta scalar."""
    B, C, HWp = x.shape
    sp = jnp.reshape(jnp.asarray(sp_beta, jnp.float32), (1,))
    return pl.pallas_call(
        functools.partial(_fno_layer_kernel, apply_swish=apply_swish),
        out_shape=jax.ShapeDtypeStruct((B, C, HWp), _ACT_DTYPE),
        grid_spec=pltpu.PrefetchScalarGridSpec(
            num_scalar_prefetch=0,
            grid=(B, HWp // tile),
            in_specs=[
                pl.BlockSpec((1, C, tile), lambda bi, ti: (bi, 0, ti)),
                pl.BlockSpec((1, C, tile), lambda bi, ti: (bi, 0, ti)),
                pl.BlockSpec((C, C), lambda bi, ti: (0, 0)),
                pl.BlockSpec((C, 1), lambda bi, ti: (0, 0)),
                pl.BlockSpec(memory_space=pltpu.MemorySpace.SMEM),
            ],
            out_specs=pl.BlockSpec((1, C, tile), lambda bi, ti: (bi, 0, ti)),
        ),
        # spec (input 1) has the same shape/dtype as the output: reuse its HBM
        # buffer instead of allocating a fresh (B,C,HWp) per layer.
        input_output_aliases={1: 0},
        compiler_params=pltpu.CompilerParams(
            dimension_semantics=("parallel", "parallel")),
    )(x, spec, w, b.reshape(C, 1), sp)


def _pallas_head(x, w1, b1, sp_beta, w2, b2, tile):
    """x: (B, C, HWp) bf16 -> (B, 1, HWp) f32. Fused fc1 + Swish + fc2."""
    B, C, HWp = x.shape
    H1 = w1.shape[0]
    sp = jnp.reshape(jnp.asarray(sp_beta, jnp.float32), (1,))
    return pl.pallas_call(
        _head_kernel,
        out_shape=jax.ShapeDtypeStruct((B, 1, HWp), jnp.float32),
        grid_spec=pltpu.PrefetchScalarGridSpec(
            num_scalar_prefetch=0,
            grid=(B, HWp // tile),
            in_specs=[
                pl.BlockSpec((1, C, tile), lambda bi, ti: (bi, 0, ti)),
                pl.BlockSpec((H1, C), lambda bi, ti: (0, 0)),
                pl.BlockSpec((H1, 1), lambda bi, ti: (0, 0)),
                pl.BlockSpec(memory_space=pltpu.MemorySpace.SMEM),
                pl.BlockSpec((1, H1), lambda bi, ti: (0, 0)),
                pl.BlockSpec((1, 1), lambda bi, ti: (0, 0)),
            ],
            out_specs=pl.BlockSpec((1, 1, tile), lambda bi, ti: (bi, 0, ti)),
        ),
        compiler_params=pltpu.CompilerParams(
            dimension_semantics=("parallel", "parallel")),
    )(x, w1, b1.reshape(H1, 1), sp, w2, b2.reshape(1, 1))


# ----------------------- spectral branch (plain JAX) -------------------------

def _spectral_conv2d(x, w1, w2, modes1, modes2):
    """SpectralConv2d_fast forward. Plain JAX: no Pallas TPU FFT primitive."""
    B, Cin, H, W = x.shape
    Cout = w1.shape[1]
    x_ft = jnp.fft.rfft2(x, axes=(-2, -1))                       # (B,Cin,H,W//2+1)
    low = jnp.einsum('bixy,ioxy->boxy', x_ft[:, :, :modes1, :modes2], w1)
    high = jnp.einsum('bixy,ioxy->boxy', x_ft[:, :, H - modes1:, :modes2], w2)
    out_ft = jnp.zeros((B, Cout, H, W // 2 + 1), dtype=jnp.complex64)
    out_ft = out_ft.at[:, :, :modes1, :modes2].set(low)
    out_ft = out_ft.at[:, :, H - modes1:, :modes2].set(high)
    return jnp.fft.irfft2(out_ft, s=(H, W), axes=(-2, -1))


# ------------------------------- forward -------------------------------------

def fno2d_forward(x, params, *, modes1, modes2):
    """FNO2d.forward. x: (B, 1, H, W) float32 -> (B, 1, H, W) float32."""
    B, C0, H, W = x.shape
    HW = H * W
    width = params['fc0_w'].shape[0]
    HWp, t_layer, t_head = _plan_spatial(HW, B, width)

    # Only the data channel goes through HBM; gridx/gridy are built in-kernel.
    xin = _pad_last(x.reshape(B, C0, HW).astype(jnp.float32), HWp)

    # fc0 lifting (Pallas) -> bf16 activations
    h = _pallas_lift(xin, params['fc0_w'], params['fc0_b'], H, W, t_layer)

    # 4 FNO blocks: spectral branch in XLA (FFT), everything else fused in Pallas.
    for li in range(4):
        h_f32 = h[..., :HW].astype(jnp.float32).reshape(B, width, H, W)
        spec = _spectral_conv2d(h_f32, params[f'sc{li}_w1'], params[f'sc{li}_w2'],
                                modes1, modes2)
        spec = _pad_last(spec.reshape(B, width, HW).astype(_ACT_DTYPE), HWp)
        apply_swish = li < 3                                      # a0..a2 only
        sp_beta = (jax.nn.softplus(params[f'beta{li}'][0]) if apply_swish
                   else jnp.float32(0.0))
        h = _pallas_fno_layer(h, spec, params[f'w{li}'], params[f'wb{li}'],
                              sp_beta, apply_swish, t_layer)

    # Projection head: fc1 -> Swish(a3) -> fc2 (one fused Pallas kernel)
    sp3 = jax.nn.softplus(params['beta3'][0])
    out = _pallas_head(h, params['fc1_w'], params['fc1_b'], sp3,
                       params['fc2_w'], params['fc2_b'], t_head)  # (B,1,HWp)
    return out[..., :HW].reshape(B, 1, H, W)


# ------------------------------- params ---------------------------------------

def init_params(key, width, modes1, modes2):
    """Deterministic init mirroring the PyTorch module's defaults."""
    params = {}
    keys = iter(jax.random.split(key, 40))

    def unif(shape, bound):
        return jax.random.uniform(next(keys), shape, jnp.float32, -bound, bound)

    # fc0 = nn.Linear(3, width)
    b0 = 1.0 / math.sqrt(3.0)
    params['fc0_w'] = unif((width, 3), b0)
    params['fc0_b'] = unif((width,), b0)

    sscale = 1.0 / math.sqrt(width)      # SpectralConv2d_fast: 1/sqrt(in_channels)
    bw = 1.0 / math.sqrt(width)          # Conv1d(width, width, 1) default bound
    for li in range(4):
        re1 = jax.random.uniform(next(keys), (width, width, modes1, modes2), jnp.float32)
        im1 = jax.random.uniform(next(keys), (width, width, modes1, modes2), jnp.float32)
        re2 = jax.random.uniform(next(keys), (width, width, modes1, modes2), jnp.float32)
        im2 = jax.random.uniform(next(keys), (width, width, modes1, modes2), jnp.float32)
        params[f'sc{li}_w1'] = (sscale * (re1 + 1j * im1)).astype(jnp.complex64)
        params[f'sc{li}_w2'] = (sscale * (re2 + 1j * im2)).astype(jnp.complex64)
        params[f'w{li}'] = unif((width, width), bw)     # Conv1d weight, squeezed
        params[f'wb{li}'] = unif((width,), bw)
        params[f'beta{li}'] = jnp.array([0.5], jnp.float32)   # Swish a0..a3

    b1 = 1.0 / math.sqrt(width)
    params['fc1_w'] = unif((128, width), b1)
    params['fc1_b'] = unif((128,), b1)
    b2 = 1.0 / math.sqrt(128.0)
    params['fc2_w'] = unif((1, 128), b2)
    params['fc2_b'] = unif((1,), b2)
    return params


# ------------------------------ reference -------------------------------------

def _ref_forward(x, params, *, modes1, modes2):
    """Pure-JAX f32 reference matching the PyTorch FNO2d forward (NCHW in/out)."""
    B, _, H, W = x.shape

    def swish(v, beta):
        return (v * jax.nn.sigmoid(v * jax.nn.softplus(beta))) / 1.1

    gx = jnp.linspace(0.0, 1.0, H, dtype=jnp.float32)
    gy = jnp.linspace(0.0, 1.0, W, dtype=jnp.float32)
    gridx = jnp.broadcast_to(gx[None, :, None, None], (B, H, W, 1))
    gridy = jnp.broadcast_to(gy[None, None, :, None], (B, H, W, 1))
    xin = jnp.concatenate([jnp.transpose(x, (0, 2, 3, 1)), gridx, gridy], axis=-1)

    h = xin @ params['fc0_w'].T + params['fc0_b']            # (B,H,W,width)
    h = jnp.transpose(h, (0, 3, 1, 2))                       # (B,width,H,W)
    for li in range(4):
        spec = _spectral_conv2d(h, params[f'sc{li}_w1'], params[f'sc{li}_w2'],
                                modes1, modes2)
        pw = (jnp.einsum('oc,bchw->bohw', params[f'w{li}'], h)
              + params[f'wb{li}'][None, :, None, None])
        h = spec + pw
        if li < 3:
            h = swish(h, params[f'beta{li}'][0])
    hp = jnp.transpose(h, (0, 2, 3, 1))
    z = hp @ params['fc1_w'].T + params['fc1_b']
    z = swish(z, params['beta3'][0])
    z = z @ params['fc2_w'].T + params['fc2_b']
    return jnp.transpose(z, (0, 3, 1, 2))


# -------------------------------- main -----------------------------------------

if __name__ == "__main__":
    jax.config.update("jax_default_matmul_precision", "highest")

    B, H, W = 2, 16, 16
    width, modes1, modes2 = 32, 8, 8

    key = jax.random.PRNGKey(0)
    kx, kp = jax.random.split(key)
    x = jax.random.normal(kx, (B, 1, H, W), jnp.float32)
    params = init_params(kp, width, modes1, modes2)

    fwd = jax.jit(functools.partial(fno2d_forward, modes1=modes1, modes2=modes2))
    y = jax.block_until_ready(fwd(x, params))

    y_ref = _ref_forward(x, params, modes1=modes1, modes2=modes2)
    assert y.shape == (B, 1, H, W), y.shape
    assert bool(jnp.all(jnp.isfinite(y)))
    # bf16 activation transit -> compare scale-relative with a widened tolerance
    scale = float(jnp.max(jnp.abs(y_ref))) + 1e-6
    max_err = float(jnp.max(jnp.abs(y.astype(jnp.float32) - y_ref)))
    assert max_err <= 5e-2 * scale, (max_err, scale)

    print("KERNEL_OK")
</pallas_src>

<mosaic_0001>
module attributes {stable_mosaic.version = 11 : i64} {
  func.func @_lift_kernel(%arg0: i32, %arg1: i32, %arg2: memref<1x1x256xf32, #tpu.memory_space<vmem>>, %arg3: memref<32x3xf32, #tpu.memory_space<vmem>>, %arg4: memref<32x1xf32, #tpu.memory_space<vmem>>, %arg5: memref<1x32x256xbf16, #tpu.memory_space<vmem>>) attributes {dimension_semantics = [#tpu.dimension_semantics<parallel>, #tpu.dimension_semantics<parallel>], iteration_bounds = array<i64: 2, 1>, scalar_prefetch = 0 : i64, scratch_operands = 0 : i64, tpu.core_type = #tpu.core_type<tc>, window_params = [{transform_indices = @transform_0, window_bounds = array<i64: 1, 1, 256>}, {pipeline_mode = #tpu.pipeline_mode<synchronous>, transform_indices = @transform_1, window_bounds = array<i64: 32, 3>}, {pipeline_mode = #tpu.pipeline_mode<synchronous>, transform_indices = @transform_2, window_bounds = array<i64: 32, 1>}, {transform_indices = @transform_3, window_bounds = array<i64: 1, 32, 256>}]} {
    %c256_i32 = arith.constant 256 : i32
    %0 = arith.muli %arg1, %c256_i32 : i32
    %1 = tpu.iota {dimensions = array<i32: 1>} : vector<1x256xi32>
    %2 = vector.broadcast %0 : i32 to vector<1x256xi32>
    %3 = arith.addi %2, %1 : vector<1x256xi32>
    %4 = arith.sitofp %3 : vector<1x256xi32> to vector<1x256xf32>
    %cst = arith.constant 6.250000e-02 : f32
    %5 = vector.broadcast %cst : f32 to vector<1x256xf32>
    %6 = arith.mulf %4, %5 : vector<1x256xf32>
    %7 = math.floor %6 : vector<1x256xf32>
    %cst_0 = arith.constant 1.600000e+01 : f32
    %8 = vector.broadcast %cst_0 : f32 to vector<1x256xf32>
    %9 = arith.mulf %7, %8 : vector<1x256xf32>
    %10 = arith.subf %4, %9 : vector<1x256xf32>
    %cst_1 = arith.constant 1.600000e+01 : f32
    %11 = vector.broadcast %cst_1 : f32 to vector<1x256xf32>
    %12 = arith.cmpf oge, %10, %11 : vector<1x256xf32>
    %cst_2 = arith.constant 1.000000e+00 : f32
    %cst_3 = arith.constant 0.000000e+00 : f32
    %13 = vector.broadcast %cst_2 : f32 to vector<1x256xf32>
    %14 = vector.broadcast %cst_3 : f32 to vector<1x256xf32>
    %15 = arith.select %12, %13, %14 : vector<1x256xi1>, vector<1x256xf32>
    %16 = arith.addf %7, %15 : vector<1x256xf32>
    %cst_4 = arith.constant 0.000000e+00 : f32
    %17 = vector.broadcast %cst_4 : f32 to vector<1x256xf32>
    %18 = arith.cmpf olt, %10, %17 : vector<1x256xf32>
    %cst_5 = arith.constant 1.000000e+00 : f32
    %cst_6 = arith.constant 0.000000e+00 : f32
    %19 = vector.broadcast %cst_5 : f32 to vector<1x256xf32>
    %20 = vector.broadcast %cst_6 : f32 to vector<1x256xf32>
    %21 = arith.select %18, %19, %20 : vector<1x256xi1>, vector<1x256xf32>
    %22 = arith.subf %16, %21 : vector<1x256xf32>
    %cst_7 = arith.constant 1.600000e+01 : f32
    %23 = vector.broadcast %cst_7 : f32 to vector<1x256xf32>
    %24 = arith.mulf %22, %23 : vector<1x256xf32>
    %25 = arith.subf %4, %24 : vector<1x256xf32>
    %cst_8 = arith.constant 0.0666666701 : f32
    %26 = vector.broadcast %cst_8 : f32 to vector<1x256xf32>
    %27 = arith.mulf %22, %26 : vector<1x256xf32>
    %cst_9 = arith.constant 0.0666666701 : f32
    %28 = vector.broadcast %cst_9 : f32 to vector<1x256xf32>
    %29 = arith.mulf %25, %28 : vector<1x256xf32>
    %c0 = arith.constant 0 : index
    %c0_10 = arith.constant 0 : index
    %30 = vector.load %arg3[%c0, %c0_10] : memref<32x3xf32, #tpu.memory_space<vmem>>, vector<32x3xf32>
    %31 = vector.extract_strided_slice %30 {offsets = [0, 0], sizes = [32, 1], strides = [1, 1]} : vector<32x3xf32> to vector<32x1xf32>
    %c0_11 = arith.constant 0 : index
    %c0_12 = arith.constant 0 : index
    %c0_13 = arith.constant 0 : index
    %32 = vector.load %arg2[%c0_11, %c0_12, %c0_13] : memref<1x1x256xf32, #tpu.memory_space<vmem>>, vector<1x1x256xf32>
    %33 = vector.shape_cast %32 : vector<1x1x256xf32> to vector<1x256xf32>
    %34 = vector.broadcast %31 : vector<32x1xf32> to vector<32x256xf32>
    %35 = vector.broadcast %33 : vector<1x256xf32> to vector<32x256xf32>
    %36 = arith.mulf %34, %35 : vector<32x256xf32>
    %37 = vector.extract_strided_slice %30 {offsets = [0, 1], sizes = [32, 1], strides = [1, 1]} : vector<32x3xf32> to vector<32x1xf32>
    %38 = vector.broadcast %37 : vector<32x1xf32> to vector<32x256xf32>
    %39 = vector.broadcast %27 : vector<1x256xf32> to vector<32x256xf32>
    %40 = arith.mulf %38, %39 : vector<32x256xf32>
    %41 = arith.addf %36, %40 : vector<32x256xf32>
    %42 = vector.extract_strided_slice %30 {offsets = [0, 2], sizes = [32, 1], strides = [1, 1]} : vector<32x3xf32> to vector<32x1xf32>
    %43 = vector.broadcast %42 : vector<32x1xf32> to vector<32x256xf32>
    %44 = vector.broadcast %29 : vector<1x256xf32> to vector<32x256xf32>
    %45 = arith.mulf %43, %44 : vector<32x256xf32>
    %46 = arith.addf %41, %45 : vector<32x256xf32>
    %c0_14 = arith.constant 0 : index
    %c0_15 = arith.constant 0 : index
    %47 = vector.load %arg4[%c0_14, %c0_15] : memref<32x1xf32, #tpu.memory_space<vmem>>, vector<32x1xf32>
    %48 = vector.broadcast %47 : vector<32x1xf32> to vector<32x256xf32>
    %49 = arith.addf %46, %48 : vector<32x256xf32>
    %50 = arith.truncf %49 : vector<32x256xf32> to vector<32x256xbf16>
    %c0_16 = arith.constant 0 : index
    %c0_17 = arith.constant 0 : index
    %c0_18 = arith.constant 0 : index
    %51 = vector.load %arg5[%c0_16, %c0_17, %c0_18] : memref<1x32x256xbf16, #tpu.memory_space<vmem>>, vector<1x32x256xbf16>
    %52 = vector.shape_cast %51 : vector<1x32x256xbf16> to vector<32x256xbf16>
    %53 = vector.shape_cast %50 : vector<32x256xbf16> to vector<1x32x256xbf16>
    tpu.vector_store %arg5[%c0_16, %c0_17, %c0_18], %53 {strides = array<i32>} : memref<1x32x256xbf16, #tpu.memory_space<vmem>>, vector<1x32x256xbf16>,
    return
  }
  func.func @transform_0(%arg0: i32, %arg1: i32) -> (i32, i32, i32) {
    %c0_i32 = arith.constant 0 : i32
    %c0_i32_0 = arith.constant 0 : i32
    return %arg0, %c0_i32, %arg1 : i32, i32, i32
  }
  func.func @transform_1(%arg0: i32, %arg1: i32) -> (i32, i32) {
    %c0_i32 = arith.constant 0 : i32
    %c0_i32_0 = arith.constant 0 : i32
    %c0_i32_1 = arith.constant 0 : i32
    return %c0_i32, %c0_i32_0 : i32, i32
  }
  func.func @transform_2(%arg0: i32, %arg1: i32) -> (i32, i32) {
    %c0_i32 = arith.constant 0 : i32
    %c0_i32_0 = arith.constant 0 : i32
    %c0_i32_1 = arith.constant 0 : i32
    return %c0_i32, %c0_i32_0 : i32, i32
  }
  func.func @transform_3(%arg0: i32, %arg1: i32) -> (i32, i32, i32) {
    %c0_i32 = arith.constant 0 : i32
    %c0_i32_0 = arith.constant 0 : i32
    return %arg0, %c0_i32, %arg1 : i32, i32, i32
  }
}

module attributes {stable_mosaic.version = 11 : i64} {
  func.func @_fno_layer_kernel(%arg0: i32, %arg1: i32, %arg2: memref<1x32x256xbf16, #tpu.memory_space<vmem>>, %arg3: memref<1x32x256xbf16, #tpu.memory_space<vmem>>, %arg4: memref<32x32xf32, #tpu.memory_space<vmem>>, %arg5: memref<32x1xf32, #tpu.memory_space<vmem>>, %arg6: memref<1xf32, #tpu.memory_space<smem>>, %arg7: memref<1x32x256xbf16, #tpu.memory_space<vmem>>) attributes {dimension_semantics = [#tpu.dimension_semantics<parallel>, #tpu.dimension_semantics<parallel>], iteration_bounds = array<i64: 2, 1>, scalar_prefetch = 0 : i64, scratch_operands = 0 : i64, tpu.core_type = #tpu.core_type<tc>, window_params = [{transform_indices = @transform_0, window_bounds = array<i64: 1, 32, 256>}, {transform_indices = @transform_1, window_bounds = array<i64: 1, 32, 256>}, {pipeline_mode = #tpu.pipeline_mode<synchronous>, transform_indices = @transform_2, window_bounds = array<i64: 32, 32>}, {pipeline_mode = #tpu.pipeline_mode<synchronous>, transform_indices = @transform_3, window_bounds = array<i64: 32, 1>}, {transform_indices = @transform_4, window_bounds = array<i64: 1>}, {transform_indices = @transform_5, window_bounds = array<i64: 1, 32, 256>}]} {
    %c0 = arith.constant 0 : index
    %c0_0 = arith.constant 0 : index
    %c0_1 = arith.constant 0 : index
    %0 = vector.load %arg2[%c0, %c0_0, %c0_1] : memref<1x32x256xbf16, #tpu.memory_space<vmem>>, vector<1x32x256xbf16>
    %1 = vector.shape_cast %0 : vector<1x32x256xbf16> to vector<32x256xbf16>
    %2 = arith.extf %1 : vector<32x256xbf16> to vector<32x256xf32>
    %c0_2 = arith.constant 0 : index
    %c0_3 = arith.constant 0 : index
    %3 = vector.load %arg4[%c0_2, %c0_3] : memref<32x32xf32, #tpu.memory_space<vmem>>, vector<32x32xf32>
    %cst = arith.constant dense<0.000000e+00> : vector<32x256xf32>
    %4 = tpu.matmul %3, %2, %cst {dimension_numbers = #tpu.dot_dimension_numbers<[1], [0], [0], [1], [0, 0, 1, 1], [], []>, precision = #tpu.contract_precision<fp32>} : vector<32x32xf32>, vector<32x256xf32>, vector<32x256xf32> -> vector<32x256xf32>
    %c0_4 = arith.constant 0 : index
    %c0_5 = arith.constant 0 : index
    %5 = vector.load %arg5[%c0_4, %c0_5] : memref<32x1xf32, #tpu.memory_space<vmem>>, vector<32x1xf32>
    %6 = vector.broadcast %5 : vector<32x1xf32> to vector<32x256xf32>
    %7 = arith.addf %4, %6 : vector<32x256xf32>
    %c0_6 = arith.constant 0 : index
    %c0_7 = arith.constant 0 : index
    %c0_8 = arith.constant 0 : index
    %8 = vector.load %arg3[%c0_6, %c0_7, %c0_8] : memref<1x32x256xbf16, #tpu.memory_space<vmem>>, vector<1x32x256xbf16>
    %9 = vector.shape_cast %8 : vector<1x32x256xbf16> to vector<32x256xbf16>
    %10 = arith.extf %9 : vector<32x256xbf16> to vector<32x256xf32>
    %11 = arith.addf %7, %10 : vector<32x256xf32>
    %c0_9 = arith.constant 0 : index
    %12 = memref.load %arg6[%c0_9] : memref<1xf32, #tpu.memory_space<smem>>
    %13 = vector.broadcast %12 : f32 to vector<32x256xf32>
    %14 = arith.mulf %11, %13 : vector<32x256xf32>
    %15 = arith.negf %14 : vector<32x256xf32>
    %16 = math.exp %15 : vector<32x256xf32>
    %cst_10 = arith.constant 1.000000e+00 : f32
    %17 = vector.broadcast %cst_10 : f32 to vector<32x256xf32>
    %18 = arith.addf %17, %16 : vector<32x256xf32>
    %19 = arith.divf %17, %18 : vector<32x256xf32>
    %20 = arith.mulf %11, %19 : vector<32x256xf32>
    %cst_11 = arith.constant 1.100000e+00 : f32
    %21 = vector.broadcast %cst_11 : f32 to vector<32x256xf32>
    %22 = arith.divf %20, %21 : vector<32x256xf32>
    %23 = arith.truncf %22 : vector<32x256xf32> to vector<32x256xbf16>
    %c0_12 = arith.constant 0 : index
    %c0_13 = arith.constant 0 : index
    %c0_14 = arith.constant 0 : index
    %24 = vector.load %arg7[%c0_12, %c0_13, %c0_14] : memref<1x32x256xbf16, #tpu.memory_space<vmem>>, vector<1x32x256xbf16>
    %25 = vector.shape_cast %24 : vector<1x32x256xbf16> to vector<32x256xbf16>
    %26 = vector.shape_cast %23 : vector<32x256xbf16> to vector<1x32x256xbf16>
    tpu.vector_store %arg7[%c0_12, %c0_13, %c0_14], %26 {strides = array<i32>} : memref<1x32x256xbf16, #tpu.memory_space<vmem>>, vector<1x32x256xbf16>,
    return
  }
  func.func @transform_0(%arg0: i32, %arg1: i32) -> (i32, i32, i32) {
    %c0_i32 = arith.constant 0 : i32
    %c0_i32_0 = arith.constant 0 : i32
    return %arg0, %c0_i32, %arg1 : i32, i32, i32
  }
  func.func @transform_1(%arg0: i32, %arg1: i32) -> (i32, i32, i32) {
    %c0_i32 = arith.constant 0 : i32
    %c0_i32_0 = arith.constant 0 : i32
    return %arg0, %c0_i32, %arg1 : i32, i32, i32
  }
  func.func @transform_2(%arg0: i32, %arg1: i32) -> (i32, i32) {
    %c0_i32 = arith.constant 0 : i32
    %c0_i32_0 = arith.constant 0 : i32
    %c0_i32_1 = arith.constant 0 : i32
    return %c0_i32, %c0_i32_0 : i32, i32
  }
  func.func @transform_3(%arg0: i32, %arg1: i32) -> (i32, i32) {
    %c0_i32 = arith.constant 0 : i32
    %c0_i32_0 = arith.constant 0 : i32
    %c0_i32_1 = arith.constant 0 : i32
    return %c0_i32, %c0_i32_0 : i32, i32
  }
  func.func @transform_4(%arg0: i32, %arg1: i32) -> i32 {
    %c0_i32 = arith.constant 0 : i32
    %c0_i32_0 = arith.constant 0 : i32
    return %c0_i32 : i32
  }
  func.func @transform_5(%arg0: i32, %arg1: i32) -> (i32, i32, i32) {
    %c0_i32 = arith.constant 0 : i32
    %c0_i32_0 = arith.constant 0 : i32
    return %arg0, %c0_i32, %arg1 : i32, i32, i32
  }
}

module attributes {stable_mosaic.version = 11 : i64} {
  func.func @_fno_layer_kernel(%arg0: i32, %arg1: i32, %arg2: memref<1x32x256xbf16, #tpu.memory_space<vmem>>, %arg3: memref<1x32x256xbf16, #tpu.memory_space<vmem>>, %arg4: memref<32x32xf32, #tpu.memory_space<vmem>>, %arg5: memref<32x1xf32, #tpu.memory_space<vmem>>, %arg6: memref<1xf32, #tpu.memory_space<smem>>, %arg7: memref<1x32x256xbf16, #tpu.memory_space<vmem>>) attributes {dimension_semantics = [#tpu.dimension_semantics<parallel>, #tpu.dimension_semantics<parallel>], iteration_bounds = array<i64: 2, 1>, scalar_prefetch = 0 : i64, scratch_operands = 0 : i64, tpu.core_type = #tpu.core_type<tc>, window_params = [{transform_indices = @transform_0, window_bounds = array<i64: 1, 32, 256>}, {transform_indices = @transform_1, window_bounds = array<i64: 1, 32, 256>}, {pipeline_mode = #tpu.pipeline_mode<synchronous>, transform_indices = @transform_2, window_bounds = array<i64: 32, 32>}, {pipeline_mode = #tpu.pipeline_mode<synchronous>, transform_indices = @transform_3, window_bounds = array<i64: 32, 1>}, {transform_indices = @transform_4, window_bounds = array<i64: 1>}, {transform_indices = @transform_5, window_bounds = array<i64: 1, 32, 256>}]} {
    %c0 = arith.constant 0 : index
    %c0_0 = arith.constant 0 : index
    %c0_1 = arith.constant 0 : index
    %0 = vector.load %arg2[%c0, %c0_0, %c0_1] : memref<1x32x256xbf16, #tpu.memory_space<vmem>>, vector<1x32x256xbf16>
    %1 = vector.shape_cast %0 : vector<1x32x256xbf16> to vector<32x256xbf16>
    %2 = arith.extf %1 : vector<32x256xbf16> to vector<32x256xf32>
    %c0_2 = arith.constant 0 : index
    %c0_3 = arith.constant 0 : index
    %3 = vector.load %arg4[%c0_2, %c0_3] : memref<32x32xf32, #tpu.memory_space<vmem>>, vector<32x32xf32>
    %cst = arith.constant dense<0.000000e+00> : vector<32x256xf32>
    %4 = tpu.matmul %3, %2, %cst {dimension_numbers = #tpu.dot_dimension_numbers<[1], [0], [0], [1], [0, 0, 1, 1], [], []>, precision = #tpu.contract_precision<fp32>} : vector<32x32xf32>, vector<32x256xf32>, vector<32x256xf32> -> vector<32x256xf32>
    %c0_4 = arith.constant 0 : index
    %c0_5 = arith.constant 0 : index
    %5 = vector.load %arg5[%c0_4, %c0_5] : memref<32x1xf32, #tpu.memory_space<vmem>>, vector<32x1xf32>
    %6 = vector.broadcast %5 : vector<32x1xf32> to vector<32x256xf32>
    %7 = arith.addf %4, %6 : vector<32x256xf32>
    %c0_6 = arith.constant 0 : index
    %c0_7 = arith.constant 0 : index
    %c0_8 = arith.constant 0 : index
    %8 = vector.load %arg3[%c0_6, %c0_7, %c0_8] : memref<1x32x256xbf16, #tpu.memory_space<vmem>>, vector<1x32x256xbf16>
    %9 = vector.shape_cast %8 : vector<1x32x256xbf16> to vector<32x256xbf16>
    %10 = arith.extf %9 : vector<32x256xbf16> to vector<32x256xf32>
    %11 = arith.addf %7, %10 : vector<32x256xf32>
    %12 = arith.truncf %11 : vector<32x256xf32> to vector<32x256xbf16>
    %c0_9 = arith.constant 0 : index
    %c0_10 = arith.constant 0 : index
    %c0_11 = arith.constant 0 : index
    %13 = vector.load %arg7[%c0_9, %c0_10, %c0_11] : memref<1x32x256xbf16, #tpu.memory_space<vmem>>, vector<1x32x256xbf16>
    %14 = vector.shape_cast %13 : vector<1x32x256xbf16> to vector<32x256xbf16>
    %15 = vector.shape_cast %12 : vector<32x256xbf16> to vector<1x32x256xbf16>
    tpu.vector_store %arg7[%c0_9, %c0_10, %c0_11], %15 {strides = array<i32>} : memref<1x32x256xbf16, #tpu.memory_space<vmem>>, vector<1x32x256xbf16>,
    return
  }
  func.func @transform_0(%arg0: i32, %arg1: i32) -> (i32, i32, i32) {
    %c0_i32 = arith.constant 0 : i32
    %c0_i32_0 = arith.constant 0 : i32
    return %arg0, %c0_i32, %arg1 : i32, i32, i32
  }
  func.func @transform_1(%arg0: i32, %arg1: i32) -> (i32, i32, i32) {
    %c0_i32 = arith.constant 0 : i32
    %c0_i32_0 = arith.constant 0 : i32
    return %arg0, %c0_i32, %arg1 : i32, i32, i32
  }
  func.func @transform_2(%arg0: i32, %arg1: i32) -> (i32, i32) {
    %c0_i32 = arith.constant 0 : i32
    %c0_i32_0 = arith.constant 0 : i32
    %c0_i32_1 = arith.constant 0 : i32
    return %c0_i32, %c0_i32_0 : i32, i32
  }
  func.func @transform_3(%arg0: i32, %arg1: i32) -> (i32, i32) {
    %c0_i32 = arith.constant 0 : i32
    %c0_i32_0 = arith.constant 0 : i32
    %c0_i32_1 = arith.constant 0 : i32
    return %c0_i32, %c0_i32_0 : i32, i32
  }
  func.func @transform_4(%arg0: i32, %arg1: i32) -> i32 {
    %c0_i32 = arith.constant 0 : i32
    %c0_i32_0 = arith.constant 0 : i32
    return %c0_i32 : i32
  }
  func.func @transform_5(%arg0: i32, %arg1: i32) -> (i32, i32, i32) {
    %c0_i32 = arith.constant 0 : i32
    %c0_i32_0 = arith.constant 0 : i32
    return %arg0, %c0_i32, %arg1 : i32, i32, i32
  }
}

module attributes {stable_mosaic.version = 11 : i64} {
  func.func @_head_kernel(%arg0: i32, %arg1: i32, %arg2: memref<1x32x256xbf16, #tpu.memory_space<vmem>>, %arg3: memref<128x32xf32, #tpu.memory_space<vmem>>, %arg4: memref<128x1xf32, #tpu.memory_space<vmem>>, %arg5: memref<1xf32, #tpu.memory_space<smem>>, %arg6: memref<1x128xf32, #tpu.memory_space<vmem>>, %arg7: memref<1x1xf32, #tpu.memory_space<vmem>>, %arg8: memref<1x1x256xf32, #tpu.memory_space<vmem>>) attributes {dimension_semantics = [#tpu.dimension_semantics<parallel>, #tpu.dimension_semantics<parallel>], iteration_bounds = array<i64: 2, 1>, scalar_prefetch = 0 : i64, scratch_operands = 0 : i64, tpu.core_type = #tpu.core_type<tc>, window_params = [{transform_indices = @transform_0, window_bounds = array<i64: 1, 32, 256>}, {pipeline_mode = #tpu.pipeline_mode<synchronous>, transform_indices = @transform_1, window_bounds = array<i64: 128, 32>}, {pipeline_mode = #tpu.pipeline_mode<synchronous>, transform_indices = @transform_2, window_bounds = array<i64: 128, 1>}, {transform_indices = @transform_3, window_bounds = array<i64: 1>}, {pipeline_mode = #tpu.pipeline_mode<synchronous>, transform_indices = @transform_4, window_bounds = array<i64: 1, 128>}, {pipeline_mode = #tpu.pipeline_mode<synchronous>, transform_indices = @transform_5, window_bounds = array<i64: 1, 1>}, {transform_indices = @transform_6, window_bounds = array<i64: 1, 1, 256>}]} {
    %c0 = arith.constant 0 : index
    %c0_0 = arith.constant 0 : index
    %0 = vector.load %arg3[%c0, %c0_0] : memref<128x32xf32, #tpu.memory_space<vmem>>, vector<128x32xf32>
    %c0_1 = arith.constant 0 : index
    %c0_2 = arith.constant 0 : index
    %c0_3 = arith.constant 0 : index
    %1 = vector.load %arg2[%c0_1, %c0_2, %c0_3] : memref<1x32x256xbf16, #tpu.memory_space<vmem>>, vector<1x32x256xbf16>
    %2 = vector.shape_cast %1 : vector<1x32x256xbf16> to vector<32x256xbf16>
    %3 = arith.extf %2 : vector<32x256xbf16> to vector<32x256xf32>
    %cst = arith.constant dense<0.000000e+00> : vector<128x256xf32>
    %4 = tpu.matmul %0, %3, %cst {dimension_numbers = #tpu.dot_dimension_numbers<[1], [0], [0], [1], [0, 0, 1, 1], [], []>, precision = #tpu.contract_precision<fp32>} : vector<128x32xf32>, vector<32x256xf32>, vector<128x256xf32> -> vector<128x256xf32>
    %c0_4 = arith.constant 0 : index
    %c0_5 = arith.constant 0 : index
    %5 = vector.load %arg4[%c0_4, %c0_5] : memref<128x1xf32, #tpu.memory_space<vmem>>, vector<128x1xf32>
    %6 = vector.broadcast %5 : vector<128x1xf32> to vector<128x256xf32>
    %7 = arith.addf %4, %6 : vector<128x256xf32>
    %c0_6 = arith.constant 0 : index
    %8 = memref.load %arg5[%c0_6] : memref<1xf32, #tpu.memory_space<smem>>
    %9 = vector.broadcast %8 : f32 to vector<128x256xf32>
    %10 = arith.mulf %7, %9 : vector<128x256xf32>
    %11 = arith.negf %10 : vector<128x256xf32>
    %12 = math.exp %11 : vector<128x256xf32>
    %cst_7 = arith.constant 1.000000e+00 : f32
    %13 = vector.broadcast %cst_7 : f32 to vector<128x256xf32>
    %14 = arith.addf %13, %12 : vector<128x256xf32>
    %15 = arith.divf %13, %14 : vector<128x256xf32>
    %16 = arith.mulf %7, %15 : vector<128x256xf32>
    %cst_8 = arith.constant 1.100000e+00 : f32
    %17 = vector.broadcast %cst_8 : f32 to vector<128x256xf32>
    %18 = arith.divf %16, %17 : vector<128x256xf32>
    %c0_9 = arith.constant 0 : index
    %c0_10 = arith.constant 0 : index
    %19 = vector.load %arg6[%c0_9, %c0_10] : memref<1x128xf32, #tpu.memory_space<vmem>>, vector<1x128xf32>
    %cst_11 = arith.constant dense<0.000000e+00> : vector<1x256xf32>
    %20 = tpu.matmul %19, %18, %cst_11 {dimension_numbers = #tpu.dot_dimension_numbers<[1], [0], [0], [1], [0, 0, 1, 1], [], []>, precision = #tpu.contract_precision<fp32>} : vector<1x128xf32>, vector<128x256xf32>, vector<1x256xf32> -> vector<1x256xf32>
    %c0_12 = arith.constant 0 : index
    %c0_13 = arith.constant 0 : index
    %21 = vector.load %arg7[%c0_12, %c0_13] : memref<1x1xf32, #tpu.memory_space<vmem>>, vector<1x1xf32>
    %22 = vector.broadcast %21 : vector<1x1xf32> to vector<1x256xf32>
    %23 = arith.addf %20, %22 : vector<1x256xf32>
    %c0_14 = arith.constant 0 : index
    %c0_15 = arith.constant 0 : index
    %c0_16 = arith.constant 0 : index
    %24 = vector.load %arg8[%c0_14, %c0_15, %c0_16] : memref<1x1x256xf32, #tpu.memory_space<vmem>>, vector<1x1x256xf32>
    %25 = vector.shape_cast %24 : vector<1x1x256xf32> to vector<1x256xf32>
    %26 = vector.shape_cast %23 : vector<1x256xf32> to vector<1x1x256xf32>
    tpu.vector_store %arg8[%c0_14, %c0_15, %c0_16], %26 {strides = array<i32>} : memref<1x1x256xf32, #tpu.memory_space<vmem>>, vector<1x1x256xf32>,
    return
  }
  func.func @transform_0(%arg0: i32, %arg1: i32) -> (i32, i32, i32) {
    %c0_i32 = arith.constant 0 : i32
    %c0_i32_0 = arith.constant 0 : i32
    return %arg0, %c0_i32, %arg1 : i32, i32, i32
  }
  func.func @transform_1(%arg0: i32, %arg1: i32) -> (i32, i32) {
    %c0_i32 = arith.constant 0 : i32
    %c0_i32_0 = arith.constant 0 : i32
    %c0_i32_1 = arith.constant 0 : i32
    return %c0_i32, %c0_i32_0 : i32, i32
  }
  func.func @transform_2(%arg0: i32, %arg1: i32) -> (i32, i32) {
    %c0_i32 = arith.constant 0 : i32
    %c0_i32_0 = arith.constant 0 : i32
    %c0_i32_1 = arith.constant 0 : i32
    return %c0_i32, %c0_i32_0 : i32, i32
  }
  func.func @transform_3(%arg0: i32, %arg1: i32) -> i32 {
    %c0_i32 = arith.constant 0 : i32
    %c0_i32_0 = arith.constant 0 : i32
    return %c0_i32 : i32
  }
  func.func @transform_4(%arg0: i32, %arg1: i32) -> (i32, i32) {
    %c0_i32 = arith.constant 0 : i32
    %c0_i32_0 = arith.constant 0 : i32
    %c0_i32_1 = arith.constant 0 : i32
    return %c0_i32, %c0_i32_0 : i32, i32
  }
  func.func @transform_5(%arg0: i32, %arg1: i32) -> (i32, i32) {
    %c0_i32 = arith.constant 0 : i32
    %c0_i32_0 = arith.constant 0 : i32
    %c0_i32_1 = arith.constant 0 : i32
    return %c0_i32, %c0_i32_0 : i32, i32
  }
  func.func @transform_6(%arg0: i32, %arg1: i32) -> (i32, i32, i32) {
    %c0_i32 = arith.constant 0 : i32
    %c0_i32_0 = arith.constant 0 : i32
    return %arg0, %c0_i32, %arg1 : i32, i32, i32
  }
}

</mosaic_0001>

<bundles_post_ra>
// kernel: fno2d_forward.6
= control target key start
LH: loop header
LB: loop body
LE: loop exit
PB: predicated region body
PF: predicated region fallthrough
CT: control target
= control target key end

     0   :  { %s568_s12 = smov 0   ;;  %s570_s13 = smov 0   ;;  %s645_s0 = inlined_call_operand.vmem [shape: f32[2,1,256], index: 0, kind: input, shape index: {}]   ;;  %s646_s1 = inlined_call_operand.vmem [shape: f32[32,3], index: 1, kind: input, shape index: {}]   ;;  %s647_s2 = inlined_call_operand.vmem [shape: f32[32,1], index: 2, kind: input, shape index: {}]   ;;  %s648_s3 = inlined_call_operand.vmem [shape: bf16[2,32,256], index: 3, kind: output, shape index: {}]  }
   0x1   :  { %s572_s14 = smov 0  }
   0x2 LB: > { %s25_s15 = sadd.s32 1, %s538_s13  ;;  %p474_p0 = scmp.ge.s32.totalorder %s542_s14, 1  ;;  %s542_s14 = sphi %s572_s14, %s13_s14   ;;  %s538_s13 = sphi %s570_s13, %s650_s13   ;;  %s534_s12 = sphi %s568_s12, %s649_s12  }
   0x3   : > { %p27_p1 = scmp.ge.s32.totalorder %s25_s15, 2  ;;  %p157_p2 = scmp.lt.s32.totalorder %s542_s14, 3 }
   0x5   : > { %s652_s15 = smov (%p27_p1, %s25_s15), 0  ;;  %p158_p3 = pnand %p474_p0, %p157_p2 }
   0x6   : > { %p189_p4 = scmp.lt.s32.totalorder (!%p158_p3), %s534_s12, 1 }
   0x7   : > { %161 = sbr.rel (%p158_p3) target bundleno = 177 (0xb1), region = 32 }
   0xc   : > { %v246_v0 = vld [vmem:[%s646_s1 + $0x10] sm:$0xff]  ;;  %v244_v1 = vld [vmem:[%s646_s1] sm:$0xff]  ;;  %v544_v2 = vmov 0   ;;  %v545_v3 = vmov 1   ;;  %v247_v4 = vld [vmem:[%s646_s1 + $0x18] sm:$0xff]  ;;  %v546_v6 = vmov 2   ;;  %v208_v11 = vlaneseq }
   0xd   : > { %510 = vset.pattern.permute.xlu1 %v544_v2  ;;  %509 = vset.pattern.permute.xlu0 %v544_v2  ;;  %v245_v5 = vld [vmem:[%s646_s1 + $0x8] sm:$0xff]  ;;  %v346_v7 = vld [vmem:[%s647_s2] sm:$0xff]  ;;  %v348_v9 = vld [vmem:[%s647_s2 + $0x10] sm:$0xff]  ;;  %v547_v29 = vmov 0.0   ;;  %s654_s12 = smov (!%p189_p4, %s534_s12), 1 }
   0xe   : > { %261 = vperm.xlu1 %510, %v246_v0   ;;  %251 = vperm.xlu0 %509, %v244_v1   ;;  %v347_v8 = vld [vmem:[%s647_s2 + $0x8] sm:$0xff]  ;;  %v349_v10 = vld [vmem:[%s647_s2 + $0x18] sm:$0xff]  ;;  %v209_v12 = vand.u32 127, %v208_v11  ;;  %s475_s5 = sshll.u32 %s654_s12, 1  ;;  %s480_s9 = sshll.u32 %s654_s12, 5 }
   0xf   : > { %511 = vset.pattern.permute.xlu2 %v545_v3  ;;  %s195_s8 = scalar_lea.vmem %s645_s0, %s475_s5  ;;  %s205_s16 = scalar_lea.vmem %s648_s3, %s480_s9 }
  0x10   : > { %283 = vperm.xlu2 %511, %v244_v1   ;;  %v210_v13 = vadd.s32 128, %v209_v12  ;;  %v214_v15 = vcvt.s32.f32 %v209_v12  ;;  %v248_v43 = vld [vmem:[%s195_s8] sm:$0x3] }
  0x11   : > { %v270_v51 = vperm.slane %v248_v43, 0  ;;  %v271_v52 = vperm.slane %v248_v43, 1 }
  0x12   : > { %v215_v16 = vcvt.s32.f32 %v210_v13  ;;  %v216_v17 = vmul.f32 0.0625, %v214_v15 }
  0x14   : > { %v217_v18 = vmul.f32 0.0625, %v215_v16  ;;  %v218_v19 = vfloor.f32 %v216_v17 }
  0x16   : > { %266 = vperm.xlu1 %510, %v247_v4   ;;  %256 = vperm.xlu0 %509, %v245_v5   ;;  %v219_v20 = vfloor.f32 %v217_v18  ;;  %v220_v22 = vmul.f32 16.0, %v218_v19 }
  0x18   : > { %287 = vperm.xlu2 %511, %v245_v5   ;;  %v221_v23 = vmul.f32 16.0, %v219_v20  ;;  %v222_v24 = vsub.f32 %v214_v15, %v220_v22 }
  0x1a   : > { %v223_v25 = vsub.f32 %v215_v16, %v221_v23  ;;  %vm224_vm0 = vcmp.ge.f32.partialorder %v222_v24, 16.0  ;;  %vm230_vm2 = vcmp.lt.f32.partialorder %v222_v24, 0.0 }
  0x1b   : > { %v226_v30 = vsel %vm224_vm0, 1.0, %v547_v29  ;;  %v232_v35 = vsel %vm230_vm2, 1.0, %v547_v29 }
  0x1c   : > { %vm225_vm1 = vcmp.ge.f32.partialorder %v223_v25, 16.0  ;;  %vm231_vm3 = vcmp.lt.f32.partialorder %v223_v25, 0.0  ;;  %v228_v32 = vadd.f32 %v226_v30, %v218_v19 }
  0x1d   : > { %v227_v31 = vsel %vm225_vm1, 1.0, %v547_v29  ;;  %v233_v36 = vsel %vm231_vm3, 1.0, %v547_v29 }
  0x1e   : > { %513 = vset.pattern.permute.xlu1 %v545_v3  ;;  %512 = vset.pattern.permute.xlu0 %v545_v3  ;;  %v229_v33 = vadd.f32 %v227_v31, %v219_v20  ;;  %v234_v39 = vsub.f32 %v228_v32, %v232_v35 }
  0x1f   : > { %295 = vperm.xlu1 %513, %v247_v4   ;;  %291 = vperm.xlu0 %512, %v246_v0  }
  0x20   : > { %514 = vset.pattern.permute.xlu2 %v546_v6  ;;  %v235_v40 = vsub.f32 %v229_v33, %v233_v36  ;;  %v236_v41 = vmul.f32 16.0, %v234_v39  ;;  %v240_v49 = vmul.f32 0.06666667, %v234_v39 }
  0x21   : > { %315 = vperm.xlu2 %514, %v244_v1  }
  0x22   : > { %v237_v42 = vmul.f32 16.0, %v235_v40  ;;  %v238_v47 = vsub.f32 %v214_v15, %v236_v41  ;;  %v241_v50 = vmul.f32 0.06666667, %v235_v40 }
  0x24   : > { %v239_v48 = vsub.f32 %v215_v16, %v237_v42  ;;  %v242_v57 = vmul.f32 0.06666667, %v238_v47 }
  0x26   : > { %v243_v58 = vmul.f32 0.06666667, %v239_v48 }
  0x27   : > { %515 = vset.pattern.permute.xlu1 %v546_v6  ;;  %516 = vset.pattern.permute.xlu0 %v546_v6 }
  0x28   : > { %319 = vperm.xlu1 %515, %v245_v5   ;;  %327 = vperm.xlu0 %516, %v247_v4  }
  0x29   : > { %323 = vperm.xlu2 %514, %v246_v0  }
  0x30   : > { %517 = vset.pattern.permute.xlu1 %v544_v2  ;;  %519 = vset.pattern.permute.xlu0 %v544_v2 }
  0x31   : > { %352 = vperm.xlu1 %517, %v346_v7   ;;  %518 = vset.pattern.permute.xlu2 %v544_v2 }
  0x32   : > { %357 = vperm.xlu2 %518, %v347_v8  }
  0x39   : > { %362 = vperm.xlu1 %517, %v348_v9  }
  0x3a   : > { %367 = vperm.xlu2 %518, %v349_v10  }
  0x6a   : > { %v284_v14 = vpop.permute.xlu2 %283 }
  0x6b   : > { %v298_v63 = vmul.f32 %v284_v14, %v240_v49  ;;  %v299_v0 = vmul.f32 %v284_v14, %v241_v50 }
  0x72   : > { %v288_v21 = vpop.permute.xlu2 %287 }
  0x73   : > { %v300_v59 = vmul.f32 %v288_v21, %v240_v49  ;;  %v301_v60 = vmul.f32 %v288_v21, %v241_v50 }
  0x7b   : > { %v612_v26 = vpop.permute.xlu2 %315 }
  0x7c   : > { %v330_v20 = vmul.f32 %v612_v26, %v242_v57  ;;  %v331_v21 = vmul.f32 %v612_v26, %v243_v58 }
  0x80   : > { %v614_v27 = vpop.permute.xlu1 %261  ;;  %v252_v28 = vpop.permute.xlu0 %251 }
  0x81   : > { %v274_v1 = vmul.f32 %v270_v51, %v252_v28  ;;  %v275_v2 = vmul.f32 %v271_v52, %v252_v28  ;;  %v278_v36 = vmul.f32 %v270_v51, %v614_v27  ;;  %v279_v26 = vmul.f32 %v271_v52, %v614_v27 }
  0x83   : > { %v620_v34 = vpop.permute.xlu2 %323  ;;  %v306_v14 = vadd.f32 %v298_v63, %v274_v1  ;;  %v307_v19 = vadd.f32 %v299_v0, %v275_v2 }
  0x84   : > { %v334_v39 = vmul.f32 %v620_v34, %v242_v57  ;;  %v335_v40 = vmul.f32 %v620_v34, %v243_v58 }
  0x85   : > { %v338_v32 = vadd.f32 %v330_v20, %v306_v14  ;;  %v339_v33 = vadd.f32 %v331_v21, %v307_v19 }
  0x88   : > { %v267_v37 = vpop.permute.xlu1 %266  ;;  %v257_v38 = vpop.permute.xlu0 %256 }
  0x89   : > { %v276_v53 = vmul.f32 %v270_v51, %v257_v38  ;;  %v277_v54 = vmul.f32 %v271_v52, %v257_v38  ;;  %v280_v61 = vmul.f32 %v270_v51, %v267_v37  ;;  %v281_v62 = vmul.f32 %v271_v52, %v267_v37 }
  0x8b   : > { %v308_v3 = vadd.f32 %v300_v59, %v276_v53  ;;  %v309_v4 = vadd.f32 %v301_v60, %v277_v54 }
  0x8c   : > { %v358_v46 = vpop.permute.xlu2 %357 }
  0x91   : > { %v296_v44 = vpop.permute.xlu1 %295  ;;  %v292_v45 = vpop.permute.xlu0 %291 }
  0x92   : > { %v304_v55 = vmul.f32 %v296_v44, %v240_v49  ;;  %v305_v56 = vmul.f32 %v296_v44, %v241_v50  ;;  %v302_v30 = vmul.f32 %v292_v45, %v240_v49  ;;  %v303_v31 = vmul.f32 %v292_v45, %v241_v50 }
  0x94   : > { %v312_v5 = vadd.f32 %v304_v55, %v280_v61  ;;  %v313_v6 = vadd.f32 %v305_v56, %v281_v62  ;;  %v368_v13 = vpop.permute.xlu2 %367  ;;  %v310_v41 = vadd.f32 %v302_v30, %v278_v36  ;;  %v311_v42 = vadd.f32 %v303_v31, %v279_v26 }
  0x96   : > { %v342_v44 = vadd.f32 %v334_v39, %v310_v41  ;;  %v343_v45 = vadd.f32 %v335_v40, %v311_v42 }
  0x9a   : > { %v320_v7 = vpop.permute.xlu1 %319  ;;  %v328_v8 = vpop.permute.xlu0 %327 }
  0x9b   : > { %v332_v9 = vmul.f32 %v320_v7, %v242_v57  ;;  %v333_v10 = vmul.f32 %v320_v7, %v243_v58  ;;  %v336_v11 = vmul.f32 %v328_v8, %v242_v57  ;;  %v337_v12 = vmul.f32 %v328_v8, %v243_v58 }
  0x9d   : > { %v340_v15 = vadd.f32 %v332_v9, %v308_v3  ;;  %v341_v16 = vadd.f32 %v333_v10, %v309_v4  ;;  %v344_v17 = vadd.f32 %v336_v11, %v312_v5  ;;  %v345_v18 = vadd.f32 %v337_v12, %v313_v6 }
  0x9f   : > { %v372_v22 = vadd.f32 %v358_v46, %v340_v15  ;;  %v373_v23 = vadd.f32 %v358_v46, %v341_v16  ;;  %v376_v24 = vadd.f32 %v368_v13, %v344_v17  ;;  %v377_v25 = vadd.f32 %v368_v13, %v345_v18 }
  0xa1   : > { %v379_v28 = vpack.c.bf16 %v373_v23, %v372_v22  ;;  %v381_v29 = vpack.c.bf16 %v377_v25, %v376_v24 }
  0xa3   : > { %383 = vst [vmem:[%s205_s16 + $0x8] sm:$0xff] %v379_v28  ;;  %v353_v35 = vpop.permute.xlu1 %352 }
  0xa4   : > { %385 = vst [vmem:[%s205_s16 + $0x18] sm:$0xff] %v381_v29  ;;  %v370_v37 = vadd.f32 %v353_v35, %v338_v32  ;;  %v371_v38 = vadd.f32 %v353_v35, %v339_v33 }
  0xa6   : > { %v378_v43 = vpack.c.bf16 %v371_v38, %v370_v37 }
  0xa8   : > { %382 = vst [vmem:[%s205_s16] sm:$0xff] %v378_v43 }
  0xab   : > { %v363_v46 = vpop.permute.xlu1 %362 }
  0xac   : > { %v374_v47 = vadd.f32 %v363_v46, %v342_v44  ;;  %v375_v48 = vadd.f32 %v363_v46, %v343_v45 }
  0xae   : > { %v380_v49 = vpack.c.bf16 %v375_v48, %v374_v47 }
  0xb0   : > { %384 = vst [vmem:[%s205_s16 + $0x10] sm:$0xff] %v380_v49 }
  0xb1 PF: > { %s13_s14 = sadd.s32 1, %s542_s14   ;;  %s649_s12 = smov %s538_s13 }
  0xb2   : > { %p10_p5 = scmp.ge.s32.totalorder %s13_s14, 4   ;;  %s650_s13 = smov %s652_s15 }
  0xb4   :  { %12 = sbr.rel (!%p10_p5) target bundleno = 2 (0x2), region = 62 }

// kernel: custom-call
= control target key start
LH: loop header
LB: loop body
LE: loop exit
PB: predicated region body
PF: predicated region fallthrough
CT: control target
= control target key end

     0   :  { %2 = vsyncpa [#allocation0], 0  ;;  %s55_s0 = inlined_call_operand.hbm [shape: c64[32,32,8,8], index: 0, kind: input, shape index: {}]   ;;  %s56_s1 = inlined_call_operand.vmem [shape: f32[32,32,8,8], index: 1, kind: output, shape index: {}]  }
   0x1   :  { %s4_s8 = sshll.u32 %s55_s0, 4  ;;  %s6_s11 = sshll.u32 %s56_s1, 4  ;;  %s5_s8 = int_to_ptr.hbm [resolvable:$true] %s4_s8  ;;  %s7_s11 = int_to_ptr.vmem [resolvable:$true] %s6_s11 }
   0x2   :  { %9 = dma.hbm_to_vmem [thread:$0]  %s5_s8, 32768, %s7_s11, [#allocation0] }
   0x3   :  { %37 = dma.done.wait [#allocation0], 32768  }
   0x4   :  { %38 = vsyncadd [#allocation0], 4294934528 }
   0x5   :  { %12 = vsyncpa [#allocation0], 1 }

// kernel: custom-call.1
= control target key start
LH: loop header
LB: loop body
LE: loop exit
PB: predicated region body
PF: predicated region fallthrough
CT: control target
= control target key end

     0   :  { %s56_s0 = inlined_call_operand.hbm [shape: c64[32,32,8,8], index: 0, kind: input, shape index: {}]   ;;  %s57_s1 = inlined_call_operand.vmem [shape: f32[32,32,8,8], index: 1, kind: output, shape index: {}]  }
   0x1   :  { %s2_s8 = scalar_lea.hbm %s56_s0, 2048 }
   0x2   :  { %3 = vsyncpa [#allocation0], 0  ;;  %s5_s9 = sshll.u32 %s2_s8, 4  ;;  %s7_s12 = sshll.u32 %s57_s1, 4  ;;  %s6_s9 = int_to_ptr.hbm [resolvable:$true] %s5_s9  ;;  %s8_s12 = int_to_ptr.vmem [resolvable:$true] %s7_s12 }
   0x3   :  { %10 = dma.hbm_to_vmem [thread:$0]  %s6_s9, 32768, %s8_s12, [#allocation0] }
   0x4   :  { %38 = dma.done.wait [#allocation0], 32768  }
   0x5   :  { %39 = vsyncadd [#allocation0], 4294934528 }
   0x6   :  { %13 = vsyncpa [#allocation0], 1 }

// kernel: reverse.8
= control target key start
LH: loop header
LB: loop body
LE: loop exit
PB: predicated region body
PF: predicated region fallthrough
CT: control target
= control target key end

     0   :  { %s344_s0 = inlined_call_operand.vmem [shape: f32[2,32,16,7], index: 0, kind: input, shape index: {}]   ;;  %s345_s1 = inlined_call_operand.vmem [shape: f32[2,32,16,7], index: 1, kind: output, shape index: {}]  }
   0x1   :  { %v112_v0 = vld [vmem:[%s344_s0 + $0x60] sm:$0xff]  ;;  %v113_v1 = vld [vmem:[%s344_s0 + $0xd0] sm:$0xff]  ;;  %v138_v14 = vld [vmem:[%s344_s0 + $0x68] sm:$0xff] }
   0x2   :  { %v115_v2 = vld [vmem:[%s344_s0 + $0x50] sm:$0xff]  ;;  %4 = vst [vmem:[%s345_s1] sm:$0xff] %v112_v0  ;;  %v117_v3 = vld [vmem:[%s344_s0 + $0xc0] sm:$0xff]  ;;  %v140_v15 = vld [vmem:[%s344_s0 + $0xd8] sm:$0xff] }
   0x3   :  { %114 = vst [vmem:[%s345_s1 + $0x70] sm:$0xff] %v113_v1  ;;  %v119_v4 = vld [vmem:[%s344_s0 + $0x40] sm:$0xff]  ;;  %v121_v5 = vld [vmem:[%s344_s0 + $0xb0] sm:$0xff]  ;;  %v142_v16 = vld [vmem:[%s344_s0 + $0x58] sm:$0xff] }
   0x4   :  { %116 = vst [vmem:[%s345_s1 + $0x10] sm:$0xff] %v115_v2  ;;  %v123_v6 = vld [vmem:[%s344_s0 + $0x30] sm:$0xff]  ;;  %v125_v7 = vld [vmem:[%s344_s0 + $0xa0] sm:$0xff]  ;;  %v144_v17 = vld [vmem:[%s344_s0 + $0xc8] sm:$0xff] }
   0x5   :  { %118 = vst [vmem:[%s345_s1 + $0x80] sm:$0xff] %v117_v3  ;;  %v127_v8 = vld [vmem:[%s344_s0 + $0x20] sm:$0xff]  ;;  %v129_v9 = vld [vmem:[%s344_s0 + $0x90] sm:$0xff]  ;;  %v146_v18 = vld [vmem:[%s344_s0 + $0x48] sm:$0xff] }
   0x6   :  { %120 = vst [vmem:[%s345_s1 + $0x20] sm:$0xff] %v119_v4  ;;  %v131_v10 = vld [vmem:[%s344_s0 + $0x10] sm:$0xff]  ;;  %v133_v11 = vld [vmem:[%s344_s0 + $0x80] sm:$0xff]  ;;  %v148_v19 = vld [vmem:[%s344_s0 + $0xb8] sm:$0xff] }
   0x7   :  { %122 = vst [vmem:[%s345_s1 + $0x90] sm:$0xff] %v121_v5  ;;  %v49_v12 = vld [vmem:[%s344_s0] sm:$0xff]  ;;  %v136_v13 = vld [vmem:[%s344_s0 + $0x70] sm:$0xff]  ;;  %v150_v20 = vld [vmem:[%s344_s0 + $0x38] sm:$0xff] }
   0x8   :  { %124 = vst [vmem:[%s345_s1 + $0x30] sm:$0xff] %v123_v6  ;;  %v152_v21 = vld [vmem:[%s344_s0 + $0xa8] sm:$0xff]  ;;  %v156_v23 = vld [vmem:[%s344_s0 + $0x98] sm:$0xff] }
   0x9   :  { %126 = vst [vmem:[%s345_s1 + $0xa0] sm:$0xff] %v125_v7  ;;  %v154_v22 = vld [vmem:[%s344_s0 + $0x28] sm:$0xff]  ;;  %v158_v24 = vld [vmem:[%s344_s0 + $0x18] sm:$0xff] }
   0xa   :  { %128 = vst [vmem:[%s345_s1 + $0x40] sm:$0xff] %v127_v8  ;;  %v160_v25 = vld [vmem:[%s344_s0 + $0x88] sm:$0xff]  ;;  %v164_v27 = vld [vmem:[%s344_s0 + $0x78] sm:$0xff] }
   0xb   :  { %130 = vst [vmem:[%s345_s1 + $0xb0] sm:$0xff] %v129_v9  ;;  %v162_v26 = vld [vmem:[%s344_s0 + $0x8] sm:$0xff] }
   0xc   :  { %132 = vst [vmem:[%s345_s1 + $0x50] sm:$0xff] %v131_v10 }
   0xd   :  { %134 = vst [vmem:[%s345_s1 + $0xc0] sm:$0xff] %v133_v11 }
   0xe   :  { %135 = vst [vmem:[%s345_s1 + $0x60] sm:$0xff] %v49_v12 }
   0xf   :  { %137 = vst [vmem:[%s345_s1 + $0xd0] sm:$0xff] %v136_v13 }
  0x10   :  { %139 = vst [vmem:[%s345_s1 + $0x8] sm:$0xff] %v138_v14 }
  0x11   :  { %141 = vst [vmem:[%s345_s1 + $0x78] sm:$0xff] %v140_v15 }
  0x12   :  { %143 = vst [vmem:[%s345_s1 + $0x18] sm:$0xff] %v142_v16 }
  0x13   :  { %145 = vst [vmem:[%s345_s1 + $0x88] sm:$0xff] %v144_v17 }
  0x14   :  { %147 = vst [vmem:[%s345_s1 + $0x28] sm:$0xff] %v146_v18 }
  0x15   :  { %149 = vst [vmem:[%s345_s1 + $0x98] sm:$0xff] %v148_v19 }
  0x16   :  { %151 = vst [vmem:[%s345_s1 + $0x38] sm:$0xff] %v150_v20 }
  0x17   :  { %153 = vst [vmem:[%s345_s1 + $0xa8] sm:$0xff] %v152_v21 }
  0x18   :  { %155 = vst [vmem:[%s345_s1 + $0x48] sm:$0xff] %v154_v22 }
  0x19   :  { %157 = vst [vmem:[%s345_s1 + $0xb8] sm:$0xff] %v156_v23 }
  0x1a   :  { %159 = vst [vmem:[%s345_s1 + $0x58] sm:$0xff] %v158_v24 }
  0x1b   :  { %161 = vst [vmem:[%s345_s1 + $0xc8] sm:$0xff] %v160_v25 }
  0x1c   :  { %163 = vst [vmem:[%s345_s1 + $0x68] sm:$0xff] %v162_v26 }
  0x1d   :  { %165 = vst [vmem:[%s345_s1 + $0xd8] sm:$0xff] %v164_v27 }

// kernel: fno2d_forward.7
= control target key start
LH: loop header
LB: loop body
LE: loop exit
PB: predicated region body
PF: predicated region fallthrough
CT: control target
= control target key end

     0   :  { %s1325_s20 = smov 0   ;;  %s1327_s21 = smov 0   ;;  %s1802_s0 = inlined_call_operand.vmem [shape: bf16[2,32,256], index: 0, kind: input, shape index: {}]   ;;  %s1803_s1 = inlined_call_operand.vmem [shape: bf16[2,32,256], index: 1, kind: input, shape index: {}, may-alias: {1,5}]   ;;  %s1804_s2 = inlined_call_operand.vmem [shape: f32[32,32], index: 2, kind: input, shape index: {}]   ;;  %s1805_s3 = inlined_call_operand.vmem [shape: f32[32,1], index: 3, kind: input, shape index: {}]   ;;  %s1806_s4 = inlined_call_operand.<no memory space> [shape: f32[1], index: 4, kind: input, shape index: {}]   ;;  %s1807_s5 = inlined_call_operand.vmem [shape: bf16[2,32,256], index: 5, kind: output, shape index: {}, may-alias: {1,5}]  }
   0x1   :  { %10 = sst [smem:[#allocation2]] %s1806_s4  ;;  %s1329_s22 = smov 0  }
   0x2 LB: > { %s28_s4 = sadd.s32 1, %s1284_s21  ;;  %p1184_p0 = scmp.ge.s32.totalorder %s1288_s22, 1  ;;  %s1288_s22 = sphi %s1329_s22, %s16_s22   ;;  %s1284_s21 = sphi %s1327_s21, %s1819_s21   ;;  %s1280_s20 = sphi %s1325_s20, %s1818_s20  }
   0x3   : > { %p30_p1 = scmp.ge.s32.totalorder %s28_s4, 2  ;;  %p226_p2 = scmp.lt.s32.totalorder %s1288_s22, 3 }
   0x5   : > { %s1821_s4 = smov (%p30_p1, %s28_s4), 0  ;;  %p227_p3 = pnand %p1184_p0, %p226_p2 }
   0x6   : > { %p272_p4 = scmp.lt.s32.totalorder (!%p227_p3), %s1280_s20, 1  ;;  %s882_s23 = sld [smem:[#allocation2]] (!%p227_p3) }
   0x7   : > { %230 = sbr.rel (%p227_p3) target bundleno = 293 (0x125), region = 40 }
   0xc   : > { %v313_v0 = vld [vmem:[%s1804_s2] sm:$0xff]  ;;  %vm341_vm0 = vcmask 261120   ;;  %v314_v1 = vld [vmem:[%s1804_s2 + $0x8] sm:$0xff]  ;;  %v1290_v4 = vmov 0   ;;  %s1823_s20 = smov (!%p272_p4, %s1280_s20), 1  ;;  %v315_v8 = vld [vmem:[%s1804_s2 + $0x10] sm:$0xff] }
   0xd   : > { %v343_v2 = vsel %vm341_vm0, %v313_v0, 0  ;;  %v346_v3 = vsel %vm341_vm0, %v314_v1, 0  ;;  %1230 = vset.pattern.permute.xlu0 %v1290_v4  ;;  %v317_v5 = vld [vmem:[%s1805_s3] sm:$0xff]  ;;  %1231 = vset.pattern.permute.xlu1 %v1290_v4  ;;  %s1361_s6 = sshll.u32 %s1823_s20, 5  ;;  %v349_v15 = vsel %vm341_vm0, %v315_v8, 0  ;;  %v318_v24 = vld [vmem:[%s1805_s3 + $0x8] sm:$0xff] }
   0xe   : > { %v1354_v6 = vand.u32 4294901760, %v343_v2  ;;  %v1356_v7 = vand.u32 4294901760, %v346_v3  ;;  %323 = vperm.xlu0 %1230, %v317_v5   ;;  %s279_s9 = scalar_lea.vmem %s1802_s0, %s1361_s6  ;;  %v1417_v32 = vand.u32 4294901760, %v349_v15  ;;  %v316_v47 = vld [vmem:[%s1804_s2 + $0x18] sm:$0xff]  ;;  %s1571_s20 = scalar_lea.vmem %s1803_s1, %s1361_s6 }
   0xf   : > { %v304_v10 = vld [vmem:[%s279_s9 + $0x18] sm:$0xff]  ;;  %v303_v11 = vld [vmem:[%s279_s9 + $0x10] sm:$0xff]  ;;  %v302_v12 = vld [vmem:[%s279_s9 + $0x8] sm:$0xff]  ;;  %v352_v56 = vsel %vm341_vm0, %v316_v47, 0  ;;  %s1742_s26 = scalar_lea.vmem %s1807_s5, %s1361_s6 }
  0x10   : > { %v1364_v9 = vsub.f32 %v343_v2, %v1354_v6  ;;  %v1374_v14 = vsub.f32 %v346_v3, %v1356_v7  ;;  %v1377_v16 = vunpack.c.l.bf16 %v304_v10  ;;  %v1379_v17 = vunpack.c.l.bf16 %v303_v11  ;;  %v301_v19 = vld [vmem:[%s279_s9] sm:$0xff] }
  0x11   : > { %v1381_v18 = vunpack.c.l.bf16 %v302_v12  ;;  %v1383_v20 = vunpack.c.h.bf16 %v304_v10  ;;  %v1385_v21 = vunpack.c.l.bf16 %v301_v19  ;;  %v1389_v23 = vunpack.c.h.bf16 %v303_v11  ;;  %v319_v10 = vld [vmem:[%s1805_s3 + $0x10] sm:$0xff] }
  0x12   : > { %v1371_v13 = vand.u32 4294901760, %v1364_v9  ;;  %366 = vmatpush.msra.mxu0 %v1377_v16  ;;  %v415_v25 = vsub.f32 %v1377_v16, %v1377_v16  ;;  %v420_v26 = vsub.f32 %v1379_v17, %v1379_v17  ;;  %505 = vmatpush.msra.mxu3 %v1377_v16  ;;  %v1404_v28 = vunpack.c.h.bf16 %v302_v12 }
  0x13   : > { %v1402_v27 = vsub.f32 %v1381_v18, %v1381_v18  ;;  %v1408_v29 = vsub.f32 %v1385_v21, %v1385_v21  ;;  %v1412_v30 = vsub.f32 %v1383_v20, %v1383_v20  ;;  %v1415_v31 = vand.u32 4294901760, %v1374_v14  ;;  %333 = vperm.xlu1 %1231, %v319_v10  }
  0x14   : > { %v373_v22 = vsub.f32 %v1364_v9, %v1371_v13  ;;  %367 = vmatpush.msra.mxu0 %v1379_v17  ;;  %465 = vmatpush.msra.mxu2 %v415_v25  ;;  %v416_v33 = vand.u32 4294901760, %v415_v25  ;;  %v421_v34 = vand.u32 4294901760, %v420_v26  ;;  %v1423_v36 = vsub.f32 %v1389_v23, %v1389_v23 }
  0x15   : > { %v426_v35 = vand.u32 4294901760, %v1402_v27  ;;  %506 = vmatpush.msra.mxu3 %v1379_v17  ;;  %v670_v38 = vand.u32 4294901760, %v1412_v30  ;;  %v431_v39 = vand.u32 4294901760, %v1408_v29  ;;  %v1432_v40 = vsub.f32 %v1404_v28, %v1404_v28 }
  0x16   : > { %328 = vperm.xlu0 %1230, %v318_v24   ;;  %v1425_v37 = vand.u32 4294901760, %v373_v22  ;;  %368 = vmatpush.msra.mxu0 %v1381_v18  ;;  %v417_v41 = vsub.f32 %v415_v25, %v416_v33  ;;  %v422_v42 = vsub.f32 %v420_v26, %v421_v34  ;;  %v675_v44 = vand.u32 4294901760, %v1423_v36 }
  0x17   : > { %467 = vmatpush.msra.mxu2 %v420_v26  ;;  %v427_v43 = vsub.f32 %v1402_v27, %v426_v35  ;;  %507 = vmatpush.msra.mxu3 %v1381_v18  ;;  %v671_v45 = vsub.f32 %v1412_v30, %v670_v38  ;;  %v432_v46 = vsub.f32 %v1408_v29, %v431_v39  ;;  %v680_v51 = vand.u32 4294901760, %v1432_v40 }
  0x18   : > { %369 = vmatpush.msra.mxu0 %v1385_v21  ;;  %v418_v48 = vand.u32 4294901760, %v417_v41  ;;  %v423_v49 = vand.u32 4294901760, %v422_v42  ;;  %v676_v50 = vsub.f32 %v1423_v36, %v675_v44  ;;  %v381_v53 = vsub.f32 %v1374_v14, %v1415_v31 }
  0x19   : > { %469 = vmatpush.msra.mxu2 %v1402_v27  ;;  %375 = vmatmul.f32.vlgmr.msra.gmra.mxu0 %v1425_v37  ;;  %v672_v52 = vand.u32 4294901760, %v671_v45  ;;  %v1458_v54 = vsub.f32 %v349_v15, %v1417_v32  ;;  %v428_v55 = vand.u32 4294901760, %v427_v43  ;;  %v1462_v57 = vunpack.c.h.bf16 %v301_v19  ;;  %v1574_v43 = vld [vmem:[%s1571_s20] sm:$0xff] }
  0x1a   : > { %508 = vmatpush.msra.mxu3 %v1385_v21  ;;  %419 = vmatpush.msra.mxu1 %v418_v48  ;;  %v677_v58 = vand.u32 4294901760, %v676_v50  ;;  %v433_v59 = vand.u32 4294901760, %v432_v46  ;;  %v681_v60 = vsub.f32 %v1432_v40, %v680_v51  ;;  %v1472_v62 = vand.u32 4294901760, %v381_v53 }
  0x1b   : > { %471 = vmatpush.msra.mxu2 %v1408_v29  ;;  %512 = vmatmul.f32.vlgmr.msra.gmra.mxu3 %v1371_v13  ;;  %v684_v61 = vsub.f32 %v1462_v57, %v1462_v57  ;;  %v1475_v63 = vand.u32 4294901760, %v1458_v54  ;;  %v1477_v0 = vand.u32 4294901760, %v352_v56 }
  0x1c   : > { %474 = vmatmul.f32.vlgmr.msra.gmra.mxu2 %v1364_v9  ;;  %424 = vmatpush.msra.mxu1 %v423_v49  ;;  %v682_v2 = vand.u32 4294901760, %v681_v60  ;;  %v1586_v60 = vstv %s882_s23 }
  0x1d   : > { %620 = vmatpush.msrb.mxu2 %v1383_v20  ;;  %548 = vmatpush.msrb.mxu0 %v416_v33  ;;  %v685_v1 = vand.u32 4294901760, %v684_v61  ;;  %v389_v4 = vsub.f32 %v1458_v54, %v1475_v63  ;;  %v1486_v5 = vsub.f32 %v352_v56, %v1477_v0  ;;  %v1581_v56 = vld [vmem:[%s1571_s20 + $0x8] sm:$0xff] }
  0x1e   : > { %673 = vmatpush.msrb.mxu3 %v672_v52  ;;  %429 = vmatpush.msra.mxu1 %v428_v55  ;;  %v866_v52 = vunpack.c.l.bf16 %v1574_v43 }
  0x1f   : > { %621 = vmatpush.msrb.mxu2 %v1389_v23  ;;  %551 = vmatpush.msrb.mxu0 %v421_v34  ;;  %v686_v3 = vsub.f32 %v684_v61, %v685_v1  ;;  %v390_v11 = vand.u32 4294901760, %v389_v4  ;;  %v1496_v12 = vand.u32 4294901760, %v1486_v5 }
  0x20   : > { %678 = vmatpush.msrb.mxu3 %v677_v58  ;;  %434 = vmatpush.msra.mxu1 %v433_v59 }
  0x21   : > { %622 = vmatpush.msrb.mxu2 %v1404_v28  ;;  %383 = vmatmul.f32.gmra.mxu0 %v1472_v62  ;;  %v687_v8 = vand.u32 4294901760, %v686_v3  ;;  %v397_v15 = vsub.f32 %v1486_v5, %v1496_v12 }
  0x22   : > { %436 = vmatmul.f32.vlgmr.msra.gmra.mxu1 %v1354_v6  ;;  %554 = vmatpush.msrb.mxu0 %v426_v35 }
  0x23   : > { %587 = vmatpush.msrb.mxu1 %v1377_v16  ;;  %518 = vmatmul.f32.gmra.mxu3 %v1415_v31  ;;  %v320_v16 = vld [vmem:[%s1805_s3 + $0x18] sm:$0xff] }
  0x24   : > { %479 = vmatmul.f32.gmra.mxu2 %v1374_v14  ;;  %683 = vmatpush.msrb.mxu3 %v682_v2 }
  0x25   : > { %588 = vmatpush.msrb.mxu1 %v1379_v17  ;;  %623 = vmatpush.msrb.mxu2 %v1462_v57  ;;  %v398_v17 = vand.u32 4294901760, %v397_v15 }
  0x26   : > { %557 = vmatpush.msrb.mxu0 %v431_v39  ;;  %688 = vmatpush.msrb.mxu3 %v687_v8 }
  0x27   : > { %589 = vmatpush.msrb.mxu1 %v1381_v18  ;;  %802 = vmatpush.msra.mxu2 %v670_v38 }
  0x28   : > { %719 = vmatpush.msra.mxu0 %v1412_v30  ;;  %841 = vmatpush.msra.mxu3 %v1383_v20 }
  0x29   : > { %590 = vmatpush.msrb.mxu1 %v1385_v21  ;;  %391 = vmatmul.f32.gmra.mxu0 %v390_v11 }
  0x2a   : > { %440 = vmatmul.f32.gmra.mxu1 %v1356_v7  ;;  %805 = vmatpush.msra.mxu2 %v675_v44 }
  0x2b   : > { %759 = vmatpush.msra.mxu1 %v1383_v20  ;;  %524 = vmatmul.f32.gmra.mxu3 %v1475_v63 }
  0x2c   : > { %484 = vmatmul.f32.gmra.mxu2 %v1458_v54  ;;  %721 = vmatpush.msra.mxu0 %v1423_v36 }
  0x2d   : > { %842 = vmatpush.msra.mxu3 %v1389_v23  ;;  %760 = vmatpush.msra.mxu1 %v1389_v23 }
  0x2e   : > { %808 = vmatpush.msra.mxu2 %v680_v51  ;;  %723 = vmatpush.msra.mxu0 %v1432_v40 }
  0x2f   : > { %338 = vperm.xlu1 %1231, %v320_v16   ;;  %843 = vmatpush.msra.mxu3 %v1404_v28 }
  0x30   : > { %761 = vmatpush.msra.mxu1 %v1404_v28  ;;  %811 = vmatpush.msra.mxu2 %v685_v1 }
  0x31   : > { %399 = vmatmul.f32.gmra.mxu0 %v398_v17  ;;  %844 = vmatpush.msra.mxu3 %v1462_v57 }
  0x32   : > { %444 = vmatmul.f32.gmra.mxu1 %v1417_v32  ;;  %725 = vmatpush.msra.mxu0 %v684_v61 }
  0x33   : > { %530 = vmatmul.f32.gmra.mxu3 %v1496_v12  ;;  %762 = vmatpush.msra.mxu1 %v1462_v57 }
  0x34   : > { %489 = vmatmul.f32.gmra.mxu2 %v1486_v5 }
  0x39   : > { %559 = vmatmul.f32.vlgmr.msrb.gmra.mxu0 %v1354_v6 }
  0x3a   : > { %448 = vmatmul.f32.gmra.mxu1 %v1477_v0 }
  0x3b   : > { %690 = vmatmul.f32.vlgmr.msrb.gmra.mxu3 %v1354_v6 }
  0x3c   : > { %629 = vmatmul.f32.vlgmr.msrb.gmra.mxu2 %v1425_v37 }
  0x41   : > { %563 = vmatmul.f32.gmra.mxu0 %v1356_v7 }
  0x42   : > { %592 = vmatmul.f32.vlgmr.msrb.gmra.mxu1 %v1354_v6 }
  0x43   : > { %694 = vmatmul.f32.gmra.mxu3 %v1356_v7 }
  0x44   : > { %637 = vmatmul.f32.gmra.mxu2 %v1472_v62 }
  0x49   : > { %567 = vmatmul.f32.gmra.mxu0 %v1417_v32 }
  0x4a   : > { %596 = vmatmul.f32.gmra.mxu1 %v1356_v7 }
  0x4b   : > { %698 = vmatmul.f32.gmra.mxu3 %v1417_v32 }
  0x4c   : > { %645 = vmatmul.f32.gmra.mxu2 %v390_v11 }
  0x51   : > { %571 = vmatmul.f32.gmra.mxu0 %v1477_v0 }
  0x52   : > { %600 = vmatmul.f32.gmra.mxu1 %v1417_v32 }
  0x53   : > { %702 = vmatmul.f32.gmra.mxu3 %v1477_v0 }
  0x54   : > { %653 = vmatmul.f32.gmra.mxu2 %v398_v17 }
  0x59   : > { %728 = vmatmul.f32.vlgmr.msra.gmra.mxu0 %v1364_v9 }
  0x5a   : > { %604 = vmatmul.f32.gmra.mxu1 %v1477_v0 }
  0x5b   : > { %846 = vmatmul.f32.vlgmr.msra.gmra.mxu3 %v1354_v6 }
  0x5c   : > { %813 = vmatmul.f32.vlgmr.msra.gmra.mxu2 %v1354_v6 }
  0x61   : > { %733 = vmatmul.f32.gmra.mxu0 %v1374_v14 }
  0x62   : > { %766 = vmatmul.f32.vlgmr.msra.gmra.mxu1 %v1371_v13 }
  0x63   : > { %850 = vmatmul.f32.gmra.mxu3 %v1356_v7 }
  0x64   : > { %817 = vmatmul.f32.gmra.mxu2 %v1356_v7 }
  0x69   : > { %738 = vmatmul.f32.gmra.mxu0 %v1458_v54 }
  0x6a   : > { %772 = vmatmul.f32.gmra.mxu1 %v1415_v31 }
  0x6b   : > { %854 = vmatmul.f32.gmra.mxu3 %v1417_v32 }
  0x6c   : > { %821 = vmatmul.f32.gmra.mxu2 %v1417_v32 }
  0x71   : > { %743 = vmatmul.f32.gmra.mxu0 %v1486_v5 }
  0x72   : > { %778 = vmatmul.f32.gmra.mxu1 %v1475_v63 }
  0x73   : > { %858 = vmatmul.f32.gmra.mxu3 %v1477_v0 }
  0x74   : > { %825 = vmatmul.f32.gmra.mxu2 %v1477_v0  ;;  %v868_v0 = vunpack.c.l.bf16 %v1581_v56 }
  0x7a   : > { %784 = vmatmul.f32.gmra.mxu1 %v1496_v12  ;;  %v1596_v12 = vld [vmem:[%s1571_s20 + $0x10] sm:$0xff] }
  0x80   : > { %v324_v26 = vpop.permute.xlu0 %323 }
  0x85   : > { %v1565_v40 = vpop.permute.xlu1 %333 }
  0x88   : > { %v1562_v32 = vpop.permute.xlu0 %328 }
  0x96   : > { %v376_v6 = vpop.f32.mrf.mxu0 }
  0x97   : > { %v377_v31 = vadd.f32 %v376_v6, %v324_v26 }
  0x9e   : > { %v384_v7 = vpop.f32.mrf.mxu0  ;;  %v513_v14 = vpop.f32.mrf.mxu3 }
  0x9f   : > { %v437_v9 = vpop.f32.mrf.mxu1  ;;  %v475_v13 = vpop.f32.mrf.mxu2  ;;  %v385_v36 = vadd.f32 %v384_v7, %v1562_v32 }
  0xa0   : > { %v438_v33 = vadd.f32 %v437_v9, %v377_v31 }
  0xa1   : > { %v1578_v54 = vpop.permute.xlu1 %338 }
  0xa2   : > { %v476_v39 = vadd.f32 %v475_v13, %v438_v33 }
  0xa4   : > { %v514_v42 = vadd.f32 %v513_v14, %v476_v39 }
  0xa6   : > { %v392_v18 = vpop.f32.mrf.mxu0  ;;  %v519_v21 = vpop.f32.mrf.mxu3 }
  0xa7   : > { %v441_v19 = vpop.f32.mrf.mxu1  ;;  %v480_v20 = vpop.f32.mrf.mxu2  ;;  %v393_v50 = vadd.f32 %v392_v18, %v1565_v40  ;;  %v870_v18 = vunpack.c.l.bf16 %v1596_v12 }
  0xa8   : > { %v442_v41 = vadd.f32 %v441_v19, %v385_v36 }
  0xaa   : > { %v481_v46 = vadd.f32 %v480_v20, %v442_v41 }
  0xac   : > { %v520_v53 = vadd.f32 %v519_v21, %v481_v46 }
  0xae   : > { %v400_v22 = vpop.f32.mrf.mxu0  ;;  %v525_v25 = vpop.f32.mrf.mxu3 }
  0xaf   : > { %v445_v23 = vpop.f32.mrf.mxu1  ;;  %v485_v24 = vpop.f32.mrf.mxu2  ;;  %v401_v59 = vadd.f32 %v400_v22, %v1578_v54  ;;  %v1604_v22 = vld [vmem:[%s1571_s20 + $0x18] sm:$0xff] }
  0xb0   : > { %v446_v55 = vadd.f32 %v445_v23, %v393_v50 }
  0xb2   : > { %v486_v3 = vadd.f32 %v485_v24, %v446_v55 }
  0xb4   : > { %v526_v10 = vadd.f32 %v525_v25, %v486_v3 }
  0xb6   : > { %v560_v28 = vpop.f32.mrf.mxu0  ;;  %v531_v30 = vpop.f32.mrf.mxu3 }
  0xb7   : > { %v449_v27 = vpop.f32.mrf.mxu1  ;;  %v490_v29 = vpop.f32.mrf.mxu2  ;;  %v561_v47 = vadd.f32 %v560_v28, %v514_v42  ;;  %v872_v28 = vunpack.c.l.bf16 %v1604_v22 }
  0xb8   : > { %v450_v5 = vadd.f32 %v449_v27, %v401_v59  ;;  %v1291_v59 = vmov 1.1  }
  0xba   : > { %v491_v15 = vadd.f32 %v490_v29, %v450_v5 }
  0xbc   : > { %v532_v19 = vadd.f32 %v531_v30, %v491_v15 }
  0xbe   : > { %v564_v34 = vpop.f32.mrf.mxu0  ;;  %v691_v38 = vpop.f32.mrf.mxu3 }
  0xbf   : > { %v593_v35 = vpop.f32.mrf.mxu1  ;;  %v630_v37 = vpop.f32.mrf.mxu2  ;;  %v565_v57 = vadd.f32 %v564_v34, %v520_v53 }
  0xc0   : > { %v594_v51 = vadd.f32 %v593_v35, %v561_v47  ;;  %v631_v20 = vadd.f32 %v630_v37, %v324_v26 }
  0xc2   : > { %v1583_v58 = vadd.f32 %v866_v52, %v594_v51  ;;  %v692_v25 = vadd.f32 %v691_v38, %v631_v20 }
  0xc4   : > { %v884_v4 = vmul.f32 %v1586_v60, %v1583_v58 }
  0xc6   : > { %v568_v44 = vpop.f32.mrf.mxu0  ;;  %v695_v49 = vpop.f32.mrf.mxu3  ;;  %v1191_v11 = vmul.f32 -1.442695, %v884_v4 }
  0xc7   : > { %v597_v45 = vpop.f32.mrf.mxu1  ;;  %v638_v48 = vpop.f32.mrf.mxu2  ;;  %v569_v16 = vadd.f32 %v568_v44, %v526_v10 }
  0xc8   : > { %v598_v63 = vadd.f32 %v597_v45, %v565_v57  ;;  %1232 = vpow2.f32 %v1191_v11  ;;  %v639_v37 = vadd.f32 %v638_v48, %v1562_v32  ;;  %v867_v45 = vunpack.c.h.bf16 %v1574_v43 }
  0xca   : > { %v1593_v8 = vadd.f32 %v868_v0, %v598_v63  ;;  %v696_v46 = vadd.f32 %v695_v49, %v639_v37 }
  0xcc   : > { %v886_v7 = vmul.f32 %v1586_v60, %v1593_v8 }
  0xce   : > { %v572_v61 = vpop.f32.mrf.mxu0  ;;  %v1589_v2 = vpop.f32.mrf.mxu3  ;;  %v1193_v21 = vmul.f32 -1.442695, %v886_v7 }
  0xcf   : > { %v601_v62 = vpop.f32.mrf.mxu1  ;;  %v646_v1 = vpop.f32.mrf.mxu2  ;;  %v573_v23 = vadd.f32 %v572_v61, %v532_v19 }
  0xd0   : > { %v602_v14 = vadd.f32 %v601_v62, %v569_v16  ;;  %v1233_v33 = vpop.eup %1232  ;;  %1234 = vpow2.f32 %v1193_v21  ;;  %v647_v32 = vadd.f32 %v646_v1, %v1565_v40  ;;  %v869_v40 = vunpack.c.h.bf16 %v1581_v56 }
  0xd1   : > { %v1611_v36 = vadd.f32 1.0, %v1233_v33 }
  0xd2   : > { %v1606_v24 = vadd.f32 %v870_v18, %v602_v14  ;;  %v700_v0 = vadd.f32 %v1589_v2, %v647_v32 }
  0xd3   : > { %1236 = vrcp.f32 %v1611_v36  ;;  %vm929_vm2 = vweird.f32 %v1611_v36 }
  0xd4   : > { %v888_v30 = vmul.f32 %v1586_v60, %v1606_v24 }
  0xd6   : > { %v729_v6 = vpop.f32.mrf.mxu0  ;;  %v1600_v13 = vpop.f32.mrf.mxu3  ;;  %v1195_v41 = vmul.f32 -1.442695, %v888_v30 }
  0xd7   : > { %v605_v17 = vpop.f32.mrf.mxu1  ;;  %v654_v9 = vpop.f32.mrf.mxu2  ;;  %v730_v26 = vadd.f32 %v729_v6, %v692_v25  ;;  %v871_v25 = vunpack.c.h.bf16 %v1596_v12 }
  0xd8   : > { %v606_v27 = vadd.f32 %v605_v17, %v573_v23  ;;  %v1235_v44 = vpop.eup %1234  ;;  %1238 = vpow2.f32 %v1195_v41  ;;  %v655_v17 = vadd.f32 %v654_v9, %v1578_v54 }
  0xd9   : > { %v1620_v55 = vadd.f32 1.0, %v1235_v44  ;;  %1240 = vrcp.f32 %v1291_v59  ;;  %v1627_v63 = vpop.eup %1236  ;;  %v935_v59 = vand.u32 2147483648, %v1611_v36 }
  0xda   : > { %v1614_v39 = vadd.f32 %v872_v28, %v606_v27  ;;  %v925_v16 = vmul.f32 %v1627_v63, %v1611_v36  ;;  %v704_v9 = vadd.f32 %v1600_v13, %v655_v17  ;;  %vm930_vm1 = vweird.f32 %v1627_v63 }
  0xdb   : > { %1242 = vrcp.f32 %v1620_v55  ;;  %vm1676_vm3 = vmor %vm929_vm2, %vm930_vm1  ;;  %vm959_vm6 = vweird.f32 %v1620_v55 }
  0xdc   : > { %v890_v47 = vmul.f32 %v1586_v60, %v1614_v39  ;;  %v926_v54 = vsub.f32 1.0, %v925_v16 }
  0xde   : > { %v734_v29 = vpop.f32.mrf.mxu0  ;;  %v847_v35 = vpop.f32.mrf.mxu3  ;;  %v1197_v61 = vmul.f32 -1.442695, %v890_v47  ;;  %v927_v37 = vmul.f32 %v1627_v63, %v926_v54  ;;  %v873_v47 = vunpack.c.h.bf16 %v1604_v22 }
  0xdf   : > { %v767_v31 = vpop.f32.mrf.mxu1  ;;  %v814_v34 = vpop.f32.mrf.mxu2  ;;  %v735_v48 = vadd.f32 %v734_v29, %v696_v46 }
  0xe0   : > { %v768_v38 = vadd.f32 %v767_v31, %v730_v26  ;;  %v1239_v4 = vpop.eup %1238  ;;  %1244 = vpow2.f32 %v1197_v61 }
  0xe1   : > { %v1632_v15 = vpop.eup %1240  ;;  %v1639_v56 = vadd.f32 1.0, %v1239_v4  ;;  %v936_v4 = vor.u32 1.1754944e-38, %v935_v59 }
  0xe2   : > { %v815_v42 = vadd.f32 %v814_v34, %v768_v38  ;;  %v1641_v18 = vpop.eup %1242  ;;  %v1053_v19 = vmul.f32 1.1, %v1632_v15  ;;  %vm1057_vm4 = vweird.f32 %v1632_v15 }
  0xe3   : > { %v955_v33 = vmul.f32 %v1641_v18, %v1620_v55  ;;  %vm960_vm7 = vweird.f32 %v1641_v18  ;;  %vm989_vm14 = vweird.f32 %v1639_v56 }
  0xe4   : > { %v848_v50 = vadd.f32 %v847_v35, %v815_v42  ;;  %v1054_v35 = vsub.f32 1.0, %v1053_v19  ;;  %vm1705_vm9 = vmor %vm959_vm6, %vm960_vm7 }
  0xe5   : > { %v956_v44 = vsub.f32 1.0, %v955_v33 }
  0xe6   : > { %v851_v53 = vpop.f32.mrf.mxu3  ;;  %v739_v57 = vpop.f32.mrf.mxu0  ;;  %v1623_v43 = vadd.f32 %v867_v45, %v848_v50  ;;  %v1055_v50 = vmul.f32 %v1632_v15, %v1054_v35 }
  0xe7   : > { %v773_v51 = vpop.f32.mrf.mxu1  ;;  %v818_v52 = vpop.f32.mrf.mxu2  ;;  %v740_v5 = vadd.f32 %v739_v57, %v700_v0  ;;  %v933_v57 = vand.u32 2147483647, %v1611_v36  ;;  %v957_v22 = vmul.f32 %v1641_v18, %v956_v44 }
  0xe8   : > { %v774_v49 = vadd.f32 %v773_v51, %v735_v48  ;;  %v885_v62 = vmul.f32 %v1586_v60, %v1623_v43  ;;  %v1245_v27 = vpop.eup %1244 }
  0xe9   : > { %v1656_v41 = vadd.f32 1.0, %v1245_v27  ;;  %vm934_vm5 = vcmp.eq.f32.partialorder %v933_v57, 8.507059e+37 }
  0xea   : > { %v819_v3 = vadd.f32 %v818_v52, %v774_v49  ;;  %v1192_v1 = vmul.f32 -1.442695, %v885_v62  ;;  %v928_v52 = vadd.f32 %v1627_v63, %v927_v37 }
  0xec   : > { %v852_v10 = vadd.f32 %v851_v53, %v819_v3  ;;  %1246 = vpow2.f32 %v1192_v1  ;;  %v1056_v3 = vadd.f32 %v1632_v15, %v1055_v50  ;;  %v932_v36 = vsel %vm1676_vm3, %v1627_v63, %v928_v52 }
  0xed   : > { %1248 = vrcp.f32 %v1639_v56  ;;  %v937_v17 = vsel %vm934_vm5, %v936_v4, %v932_v36 }
  0xee   : > { %v855_v7 = vpop.f32.mrf.mxu3  ;;  %v1637_v2 = vadd.f32 %v869_v40, %v852_v10  ;;  %v744_v21 = vpop.f32.mrf.mxu0  ;;  %v1044_v27 = vmul.f32 %v937_v17, %v1583_v58 }
  0xef   : > { %v779_v11 = vpop.f32.mrf.mxu1  ;;  %v822_v6 = vpop.f32.mrf.mxu2  ;;  %v745_v34 = vadd.f32 %v744_v21, %v704_v9 }
  0xf0   : > { %v780_v14 = vadd.f32 %v779_v11, %v740_v5  ;;  %v887_v20 = vmul.f32 %v1586_v60, %v1637_v2  ;;  %v963_v5 = vand.u32 2147483647, %v1620_v55  ;;  %v958_v11 = vadd.f32 %v1641_v18, %v957_v22 }
  0xf2   : > { %v823_v23 = vadd.f32 %v822_v6, %v780_v14  ;;  %v1194_v28 = vmul.f32 -1.442695, %v887_v20  ;;  %v1247_v31 = vpop.eup %1246  ;;  %v965_v6 = vand.u32 2147483648, %v1620_v55  ;;  %vm1709_vm10 = vcmp.eq.f32.partialorder %v963_v5, 8.507059e+37 }
  0xf3   : > { %v1651_v30 = vadd.f32 1.0, %v1247_v31  ;;  %v1663_v51 = vpop.eup %1248 }
  0xf4   : > { %v856_v29 = vadd.f32 %v855_v7, %v823_v23  ;;  %1250 = vpow2.f32 %v1194_v28  ;;  %v985_v40 = vmul.f32 %v1663_v51, %v1639_v56  ;;  %v1703_v23 = vsel %vm1057_vm4, %v1632_v15, %v1056_v3 }
  0xf5   : > { %1252 = vrcp.f32 %v1651_v30  ;;  %v950_v7 = vand.u32 2147483648, %v1651_v30  ;;  %v962_v28 = vsel %vm1705_vm9, %v1641_v18, %v958_v11  ;;  %vm944_vm11 = vweird.f32 %v1651_v30 }
  0xf6   : > { %v1653_v26 = vadd.f32 %v871_v25, %v856_v29  ;;  %v859_v42 = vpop.f32.mrf.mxu3  ;;  %1254 = vrcp.f32 %v1656_v41  ;;  %v986_v20 = vsub.f32 1.0, %v985_v40  ;;  %v993_v18 = vand.u32 2147483647, %v1639_v56 }
  0xf7   : > { %v785_v12 = vpop.f32.mrf.mxu1  ;;  %v826_v38 = vpop.f32.mrf.mxu2  ;;  %v951_v31 = vor.u32 1.1754944e-38, %v950_v7  ;;  %v1059_v37 = vmul.f32 %v1703_v23, %v1044_v27  ;;  %vm990_vm0 = vweird.f32 %v1663_v51 }
  0xf8   : > { %v786_v13 = vadd.f32 %v785_v12, %v745_v34  ;;  %v889_v45 = vmul.f32 %v1586_v60, %v1653_v26  ;;  %v966_v34 = vor.u32 1.1754944e-38, %v965_v6  ;;  %v987_v35 = vmul.f32 %v1663_v51, %v986_v20  ;;  %vm1751_vm3 = vmor %vm989_vm14, %vm990_vm0 }
  0xf9   : > { %vm994_vm5 = vcmp.eq.f32.partialorder %v993_v18, 8.507059e+37 }
  0xfa   : > { %v827_v46 = vadd.f32 %v826_v38, %v786_v13  ;;  %v1196_v53 = vmul.f32 -1.442695, %v889_v45  ;;  %v1251_v48 = vpop.eup %1250  ;;  %v967_v13 = vsel %vm1709_vm10, %v966_v34, %v962_v28  ;;  %v988_v50 = vadd.f32 %v1663_v51, %v987_v35 }
  0xfb   : > { %v1672_v61 = vadd.f32 1.0, %v1251_v48  ;;  %v1253_v62 = vpop.eup %1252  ;;  %v995_v48 = vand.u32 2147483648, %v1639_v56 }
  0xfc   : > { %v860_v32 = vadd.f32 %v859_v42, %v827_v46  ;;  %1256 = vpow2.f32 %v1196_v53  ;;  %v940_v1 = vmul.f32 %v1253_v62, %v1651_v30  ;;  %v1695_v16 = vpop.eup %1254  ;;  %vm945_vm8 = vweird.f32 %v1253_v62 }
  0xfd   : > { %1258 = vrcp.f32 %v1672_v61  ;;  %v1015_v29 = vmul.f32 %v1695_v16, %v1656_v41  ;;  %vm946_vm12 = vmor %vm944_vm11, %vm945_vm8  ;;  %v980_v42 = vand.u32 2147483648, %v1672_v61  ;;  %vm974_vm1 = vweird.f32 %v1672_v61 }
  0xfe   : > { %v1674_v49 = vadd.f32 %v873_v47, %v860_v32  ;;  %v941_v63 = vsub.f32 1.0, %v940_v1  ;;  %v978_v47 = vand.u32 2147483647, %v1672_v61  ;;  %v996_v1 = vor.u32 1.1754944e-38, %v995_v48 }
  0xff   : > { %v1016_v45 = vsub.f32 1.0, %v1015_v29  ;;  %v981_v22 = vor.u32 1.1754944e-38, %v980_v42  ;;  %vm1020_vm7 = vweird.f32 %v1695_v16  ;;  %vm1019_vm8 = vweird.f32 %v1656_v41 }
 0x100   : > { %v891_v10 = vmul.f32 %v1586_v60, %v1674_v49  ;;  %v942_v21 = vmul.f32 %v1253_v62, %v941_v63  ;;  %v948_v60 = vand.u32 2147483647, %v1651_v30  ;;  %vm979_vm4 = vcmp.eq.f32.partialorder %v978_v47, 8.507059e+37  ;;  %vm1773_vm11 = vmor %vm1019_vm8, %vm1020_vm7 }
 0x102   : > { %v1198_v14 = vmul.f32 -1.442695, %v891_v10  ;;  %v1257_v19 = vpop.eup %1256  ;;  %v943_v15 = vadd.f32 %v1253_v62, %v942_v21  ;;  %vm949_vm13 = vcmp.eq.f32.partialorder %v948_v60, 8.507059e+37 }
 0x103   : > { %v1713_v54 = vadd.f32 1.0, %v1257_v19  ;;  %v1259_v9 = vpop.eup %1258 }
 0x104   : > { %1260 = vpow2.f32 %v1198_v14  ;;  %v970_v33 = vmul.f32 %v1259_v9, %v1672_v61  ;;  %v947_v58 = vsel %vm946_vm12, %v1253_v62, %v943_v15  ;;  %vm975_vm15 = vweird.f32 %v1259_v9 }
 0x105   : > { %1262 = vrcp.f32 %v1713_v54  ;;  %v952_v12 = vsel %vm949_vm13, %v951_v31, %v947_v58  ;;  %vm976_vm2 = vmor %vm974_vm1, %vm975_vm15  ;;  %v992_v61 = vsel %vm1751_vm3, %v1663_v51, %v988_v50  ;;  %v1010_v56 = vand.u32 2147483648, %v1713_v54 }
 0x106   : > { %v971_v30 = vsub.f32 1.0, %v970_v33  ;;  %v1045_v38 = vmul.f32 %v952_v12, %v1623_v43  ;;  %v1046_v43 = vmul.f32 %v967_v13, %v1593_v8  ;;  %v1017_v8 = vmul.f32 %v1695_v16, %v1016_v45 }
 0x107   : > { %v1008_v11 = vand.u32 2147483647, %v1713_v54  ;;  %v997_v63 = vsel %vm994_vm5, %v996_v1, %v992_v61  ;;  %vm1004_vm9 = vweird.f32 %v1713_v54  ;;  %v1023_v14 = vand.u32 2147483647, %v1656_v41 }
 0x108   : > { %v972_v46 = vmul.f32 %v1259_v9, %v971_v30  ;;  %v1060_v52 = vmul.f32 %v1703_v23, %v1045_v38  ;;  %v1061_v5 = vmul.f32 %v1703_v23, %v1046_v43  ;;  %v1018_v17 = vadd.f32 %v1695_v16, %v1017_v8 }
 0x109   : > { %v1011_v20 = vor.u32 1.1754944e-38, %v1010_v56  ;;  %v1048_v60 = vmul.f32 %v997_v63, %v1606_v24  ;;  %vm1009_vm12 = vcmp.eq.f32.partialorder %v1008_v11, 8.507059e+37  ;;  %vm1024_vm13 = vcmp.eq.f32.partialorder %v1023_v14, 8.507059e+37 }
 0x10a   : > { %v1261_v44 = vpop.eup %1260  ;;  %v973_v57 = vadd.f32 %v1259_v9, %v972_v46  ;;  %v1067_v59 = vpack.c.bf16 %v1060_v52, %v1059_v37 }
 0x10b   : > { %v1736_v53 = vadd.f32 1.0, %v1261_v44  ;;  %v1263_v32 = vpop.eup %1262  ;;  %v1063_v31 = vmul.f32 %v1703_v23, %v1048_v60 }
 0x10c   : > { %v1000_v62 = vmul.f32 %v1263_v32, %v1713_v54  ;;  %v977_v3 = vsel %vm976_vm2, %v1259_v9, %v973_v57  ;;  %1071 = vst [vmem:[%s1742_s26] sm:$0xff] %v1067_v59  ;;  %vm1005_vm6 = vweird.f32 %v1263_v32  ;;  %v1022_v9 = vsel %vm1773_vm11, %v1695_v16, %v1018_v17 }
 0x10d   : > { %1264 = vrcp.f32 %v1736_v53  ;;  %v982_v36 = vsel %vm979_vm4, %v981_v22, %v977_v3  ;;  %vm1006_vm10 = vmor %vm1004_vm9, %vm1005_vm6  ;;  %v1040_v15 = vand.u32 2147483648, %v1736_v53  ;;  %v1038_v29 = vand.u32 2147483647, %v1736_v53 }
 0x10e   : > { %v1001_v40 = vsub.f32 1.0, %v1000_v62  ;;  %v1047_v4 = vmul.f32 %v982_v36, %v1637_v2  ;;  %v1025_v2 = vand.u32 2147483648, %v1656_v41  ;;  %vm1034_vm15 = vweird.f32 %v1736_v53 }
 0x10f   : > { %vm1039_vm1 = vcmp.eq.f32.partialorder %v1038_v29, 8.507059e+37 }
 0x110   : > { %v1002_v10 = vmul.f32 %v1263_v32, %v1001_v40  ;;  %v1062_v51 = vmul.f32 %v1703_v23, %v1047_v4  ;;  %v1026_v27 = vor.u32 1.1754944e-38, %v1025_v2 }
 0x112   : > { %v1003_v7 = vadd.f32 %v1263_v32, %v1002_v10  ;;  %v1068_v19 = vpack.c.bf16 %v1062_v51, %v1061_v5  ;;  %v1027_v33 = vsel %vm1024_vm13, %v1026_v27, %v1022_v9 }
 0x113   : > { %v1265_v6 = vpop.eup %1264  ;;  %v1050_v58 = vmul.f32 %v1027_v33, %v1614_v39 }
 0x114   : > { %v1030_v21 = vmul.f32 %v1265_v6, %v1736_v53  ;;  %v1007_v55 = vsel %vm1006_vm10, %v1263_v32, %v1003_v7  ;;  %1072 = vst [vmem:[%s1742_s26 + $0x8] sm:$0xff] %v1068_v19  ;;  %vm1035_vm14 = vweird.f32 %v1265_v6 }
 0x115   : > { %v1012_v54 = vsel %vm1009_vm12, %v1011_v20, %v1007_v55  ;;  %vm1036_vm0 = vmor %vm1034_vm15, %vm1035_vm14  ;;  %v1065_v37 = vmul.f32 %v1703_v23, %v1050_v58 }
 0x116   : > { %v1031_v41 = vsub.f32 1.0, %v1030_v21  ;;  %v1049_v28 = vmul.f32 %v1012_v54, %v1653_v26  ;;  %v1041_v26 = vor.u32 1.1754944e-38, %v1040_v15 }
 0x118   : > { %v1032_v24 = vmul.f32 %v1265_v6, %v1031_v41  ;;  %v1064_v16 = vmul.f32 %v1703_v23, %v1049_v28 }
 0x11a   : > { %v1033_v34 = vadd.f32 %v1265_v6, %v1032_v24  ;;  %v1069_v35 = vpack.c.bf16 %v1064_v16, %v1063_v31 }
 0x11c   : > { %v1037_v18 = vsel %vm1036_vm0, %v1265_v6, %v1033_v34  ;;  %1073 = vst [vmem:[%s1742_s26 + $0x10] sm:$0xff] %v1069_v35 }
 0x11d   : > { %v1042_v12 = vsel %vm1039_vm1, %v1041_v26, %v1037_v18 }
 0x11e   : > { %v1051_v30 = vmul.f32 %v1042_v12, %v1674_v49 }
 0x120   : > { %v1066_v13 = vmul.f32 %v1703_v23, %v1051_v30 }
 0x122   : > { %v1070_v38 = vpack.c.bf16 %v1066_v13, %v1065_v37 }
 0x124   : > { %1074 = vst [vmem:[%s1742_s26 + $0x18] sm:$0xff] %v1070_v38 }
 0x125 PF: > { %s16_s22 = sadd.s32 1, %s1288_s22   ;;  %s1818_s20 = smov %s1284_s21 }
 0x126   : > { %p13_p5 = scmp.ge.s32.totalorder %s16_s22, 4   ;;  %s1819_s21 = smov %s1821_s4 }
 0x128   :  { %15 = sbr.rel (!%p13_p5) target bundleno = 2 (0x2), region = 73 }

// kernel: fno2d_forward.10
= control target key start
LH: loop header
LB: loop body
LE: loop exit
PB: predicated region body
PF: predicated region fallthrough
CT: control target
= control target key end

     0   :  { %s1093_s18 = smov 0   ;;  %s1095_s19 = smov 0   ;;  %s1392_s0 = inlined_call_operand.vmem [shape: bf16[2,32,256], index: 0, kind: input, shape index: {}]   ;;  %s1393_s1 = inlined_call_operand.vmem [shape: bf16[2,32,256], index: 1, kind: input, shape index: {}, may-alias: {1,5}]   ;;  %s1394_s2 = inlined_call_operand.vmem [shape: f32[32,32], index: 2, kind: input, shape index: {}]   ;;  %s1395_s3 = inlined_call_operand.vmem [shape: f32[32,1], index: 3, kind: input, shape index: {}]   ;;  %s1396_s4 = inlined_call_operand.<no memory space> [shape: f32[1], index: 4, kind: input, shape index: {}]   ;;  %s1397_s5 = inlined_call_operand.vmem [shape: bf16[2,32,256], index: 5, kind: output, shape index: {}, may-alias: {1,5}]  }
   0x1   :  { %s1097_s20 = smov 0  }
   0x2 LB: > { %s28_s4 = sadd.s32 1, %s1056_s19  ;;  %p999_p0 = scmp.ge.s32.totalorder %s1060_s20, 1  ;;  %s1060_s20 = sphi %s1097_s20, %s16_s20   ;;  %s1056_s19 = sphi %s1095_s19, %s1399_s19   ;;  %s1052_s18 = sphi %s1093_s18, %s1398_s18  }
   0x3   : > { %p30_p1 = scmp.ge.s32.totalorder %s28_s4, 2  ;;  %p226_p2 = scmp.lt.s32.totalorder %s1060_s20, 3 }
   0x5   : > { %s1401_s4 = smov (%p30_p1, %s28_s4), 0  ;;  %p227_p3 = pnand %p999_p0, %p226_p2 }
   0x6   : > { %p272_p4 = scmp.lt.s32.totalorder (!%p227_p3), %s1052_s18, 1 }
   0x7   : > { %230 = sbr.rel (%p227_p3) target bundleno = 259 (0x103), region = 40 }
   0xc   : > { %v313_v0 = vld [vmem:[%s1394_s2] sm:$0xff]  ;;  %vm341_vm0 = vcmask 261120   ;;  %v314_v1 = vld [vmem:[%s1394_s2 + $0x8] sm:$0xff]  ;;  %v1062_v4 = vmov 0   ;;  %s1403_s18 = smov (!%p272_p4, %s1052_s18), 1  ;;  %v315_v8 = vld [vmem:[%s1394_s2 + $0x10] sm:$0xff] }
   0xd   : > { %v343_v2 = vsel %vm341_vm0, %v313_v0, 0  ;;  %v346_v3 = vsel %vm341_vm0, %v314_v1, 0  ;;  %1036 = vset.pattern.permute.xlu0 %v1062_v4  ;;  %v317_v5 = vld [vmem:[%s1395_s3] sm:$0xff]  ;;  %1037 = vset.pattern.permute.xlu1 %v1062_v4  ;;  %s1129_s29 = sshll.u32 %s1403_s18, 5  ;;  %v349_v15 = vsel %vm341_vm0, %v315_v8, 0  ;;  %v318_v24 = vld [vmem:[%s1395_s3 + $0x8] sm:$0xff] }
   0xe   : > { %v1122_v6 = vand.u32 4294901760, %v343_v2  ;;  %v1124_v7 = vand.u32 4294901760, %v346_v3  ;;  %323 = vperm.xlu0 %1036, %v317_v5   ;;  %s279_s7 = scalar_lea.vmem %s1392_s0, %s1129_s29  ;;  %v1185_v32 = vand.u32 4294901760, %v349_v15  ;;  %v316_v47 = vld [vmem:[%s1394_s2 + $0x18] sm:$0xff]  ;;  %s1356_s18 = scalar_lea.vmem %s1393_s1, %s1129_s29 }
   0xf   : > { %v304_v10 = vld [vmem:[%s279_s7 + $0x18] sm:$0xff]  ;;  %v303_v11 = vld [vmem:[%s279_s7 + $0x10] sm:$0xff]  ;;  %v302_v12 = vld [vmem:[%s279_s7 + $0x8] sm:$0xff]  ;;  %v352_v56 = vsel %vm341_vm0, %v316_v47, 0  ;;  %s1364_s23 = scalar_lea.vmem %s1397_s5, %s1129_s29 }
  0x10   : > { %v1132_v9 = vsub.f32 %v343_v2, %v1122_v6  ;;  %v1142_v14 = vsub.f32 %v346_v3, %v1124_v7  ;;  %v1145_v16 = vunpack.c.l.bf16 %v304_v10  ;;  %v1147_v17 = vunpack.c.l.bf16 %v303_v11  ;;  %v301_v19 = vld [vmem:[%s279_s7] sm:$0xff] }
  0x11   : > { %v1149_v18 = vunpack.c.l.bf16 %v302_v12  ;;  %v1151_v20 = vunpack.c.h.bf16 %v304_v10  ;;  %v1153_v21 = vunpack.c.l.bf16 %v301_v19  ;;  %v1157_v23 = vunpack.c.h.bf16 %v303_v11  ;;  %v319_v10 = vld [vmem:[%s1395_s3 + $0x10] sm:$0xff] }
  0x12   : > { %v1139_v13 = vand.u32 4294901760, %v1132_v9  ;;  %366 = vmatpush.msra.mxu0 %v1145_v16  ;;  %v415_v25 = vsub.f32 %v1145_v16, %v1145_v16  ;;  %v420_v26 = vsub.f32 %v1147_v17, %v1147_v17  ;;  %505 = vmatpush.msra.mxu3 %v1145_v16  ;;  %v1172_v28 = vunpack.c.h.bf16 %v302_v12 }
  0x13   : > { %v1170_v27 = vsub.f32 %v1149_v18, %v1149_v18  ;;  %v1176_v29 = vsub.f32 %v1153_v21, %v1153_v21  ;;  %v1180_v30 = vsub.f32 %v1151_v20, %v1151_v20  ;;  %v1183_v31 = vand.u32 4294901760, %v1142_v14  ;;  %333 = vperm.xlu1 %1037, %v319_v10  }
  0x14   : > { %v373_v22 = vsub.f32 %v1132_v9, %v1139_v13  ;;  %367 = vmatpush.msra.mxu0 %v1147_v17  ;;  %465 = vmatpush.msra.mxu2 %v415_v25  ;;  %v416_v33 = vand.u32 4294901760, %v415_v25  ;;  %v421_v34 = vand.u32 4294901760, %v420_v26  ;;  %v1191_v36 = vsub.f32 %v1157_v23, %v1157_v23 }
  0x15   : > { %v426_v35 = vand.u32 4294901760, %v1170_v27  ;;  %506 = vmatpush.msra.mxu3 %v1147_v17  ;;  %v670_v38 = vand.u32 4294901760, %v1180_v30  ;;  %v431_v39 = vand.u32 4294901760, %v1176_v29  ;;  %v1200_v40 = vsub.f32 %v1172_v28, %v1172_v28 }
  0x16   : > { %328 = vperm.xlu0 %1036, %v318_v24   ;;  %v1193_v37 = vand.u32 4294901760, %v373_v22  ;;  %368 = vmatpush.msra.mxu0 %v1149_v18  ;;  %v417_v41 = vsub.f32 %v415_v25, %v416_v33  ;;  %v422_v42 = vsub.f32 %v420_v26, %v421_v34  ;;  %v675_v44 = vand.u32 4294901760, %v1191_v36 }
  0x17   : > { %467 = vmatpush.msra.mxu2 %v420_v26  ;;  %v427_v43 = vsub.f32 %v1170_v27, %v426_v35  ;;  %507 = vmatpush.msra.mxu3 %v1149_v18  ;;  %v671_v45 = vsub.f32 %v1180_v30, %v670_v38  ;;  %v432_v46 = vsub.f32 %v1176_v29, %v431_v39  ;;  %v680_v51 = vand.u32 4294901760, %v1200_v40 }
  0x18   : > { %369 = vmatpush.msra.mxu0 %v1153_v21  ;;  %v418_v48 = vand.u32 4294901760, %v417_v41  ;;  %v423_v49 = vand.u32 4294901760, %v422_v42  ;;  %v676_v50 = vsub.f32 %v1191_v36, %v675_v44  ;;  %v381_v53 = vsub.f32 %v1142_v14, %v1183_v31 }
  0x19   : > { %469 = vmatpush.msra.mxu2 %v1170_v27  ;;  %375 = vmatmul.f32.vlgmr.msra.gmra.mxu0 %v1193_v37  ;;  %v672_v52 = vand.u32 4294901760, %v671_v45  ;;  %v1226_v54 = vsub.f32 %v349_v15, %v1185_v32  ;;  %v428_v55 = vand.u32 4294901760, %v427_v43  ;;  %v1230_v57 = vunpack.c.h.bf16 %v301_v19 }
  0x1a   : > { %508 = vmatpush.msra.mxu3 %v1153_v21  ;;  %419 = vmatpush.msra.mxu1 %v418_v48  ;;  %v677_v58 = vand.u32 4294901760, %v676_v50  ;;  %v433_v59 = vand.u32 4294901760, %v432_v46  ;;  %v681_v60 = vsub.f32 %v1200_v40, %v680_v51  ;;  %v1240_v62 = vand.u32 4294901760, %v381_v53 }
  0x1b   : > { %471 = vmatpush.msra.mxu2 %v1176_v29  ;;  %512 = vmatmul.f32.vlgmr.msra.gmra.mxu3 %v1139_v13  ;;  %v684_v61 = vsub.f32 %v1230_v57, %v1230_v57  ;;  %v1243_v63 = vand.u32 4294901760, %v1226_v54  ;;  %v1245_v0 = vand.u32 4294901760, %v352_v56 }
  0x1c   : > { %474 = vmatmul.f32.vlgmr.msra.gmra.mxu2 %v1132_v9  ;;  %424 = vmatpush.msra.mxu1 %v423_v49  ;;  %v682_v2 = vand.u32 4294901760, %v681_v60 }
  0x1d   : > { %620 = vmatpush.msrb.mxu2 %v1151_v20  ;;  %548 = vmatpush.msrb.mxu0 %v416_v33  ;;  %v685_v1 = vand.u32 4294901760, %v684_v61  ;;  %v389_v4 = vsub.f32 %v1226_v54, %v1243_v63  ;;  %v1254_v5 = vsub.f32 %v352_v56, %v1245_v0 }
  0x1e   : > { %673 = vmatpush.msrb.mxu3 %v672_v52  ;;  %429 = vmatpush.msra.mxu1 %v428_v55 }
  0x1f   : > { %621 = vmatpush.msrb.mxu2 %v1157_v23  ;;  %551 = vmatpush.msrb.mxu0 %v421_v34  ;;  %v686_v3 = vsub.f32 %v684_v61, %v685_v1  ;;  %v390_v11 = vand.u32 4294901760, %v389_v4  ;;  %v1264_v12 = vand.u32 4294901760, %v1254_v5 }
  0x20   : > { %678 = vmatpush.msrb.mxu3 %v677_v58  ;;  %434 = vmatpush.msra.mxu1 %v433_v59 }
  0x21   : > { %622 = vmatpush.msrb.mxu2 %v1172_v28  ;;  %383 = vmatmul.f32.gmra.mxu0 %v1240_v62  ;;  %v687_v8 = vand.u32 4294901760, %v686_v3  ;;  %v397_v15 = vsub.f32 %v1254_v5, %v1264_v12 }
  0x22   : > { %436 = vmatmul.f32.vlgmr.msra.gmra.mxu1 %v1122_v6  ;;  %554 = vmatpush.msrb.mxu0 %v426_v35 }
  0x23   : > { %587 = vmatpush.msrb.mxu1 %v1145_v16  ;;  %518 = vmatmul.f32.gmra.mxu3 %v1183_v31  ;;  %v320_v16 = vld [vmem:[%s1395_s3 + $0x18] sm:$0xff] }
  0x24   : > { %479 = vmatmul.f32.gmra.mxu2 %v1142_v14  ;;  %683 = vmatpush.msrb.mxu3 %v682_v2 }
  0x25   : > { %588 = vmatpush.msrb.mxu1 %v1147_v17  ;;  %623 = vmatpush.msrb.mxu2 %v1230_v57  ;;  %v398_v17 = vand.u32 4294901760, %v397_v15 }
  0x26   : > { %557 = vmatpush.msrb.mxu0 %v431_v39  ;;  %688 = vmatpush.msrb.mxu3 %v687_v8 }
  0x27   : > { %589 = vmatpush.msrb.mxu1 %v1149_v18  ;;  %802 = vmatpush.msra.mxu2 %v670_v38 }
  0x28   : > { %719 = vmatpush.msra.mxu0 %v1180_v30  ;;  %841 = vmatpush.msra.mxu3 %v1151_v20 }
  0x29   : > { %590 = vmatpush.msrb.mxu1 %v1153_v21  ;;  %391 = vmatmul.f32.gmra.mxu0 %v390_v11 }
  0x2a   : > { %440 = vmatmul.f32.gmra.mxu1 %v1124_v7  ;;  %805 = vmatpush.msra.mxu2 %v675_v44 }
  0x2b   : > { %759 = vmatpush.msra.mxu1 %v1151_v20  ;;  %524 = vmatmul.f32.gmra.mxu3 %v1243_v63 }
  0x2c   : > { %484 = vmatmul.f32.gmra.mxu2 %v1226_v54  ;;  %721 = vmatpush.msra.mxu0 %v1191_v36 }
  0x2d   : > { %842 = vmatpush.msra.mxu3 %v1157_v23  ;;  %760 = vmatpush.msra.mxu1 %v1157_v23 }
  0x2e   : > { %808 = vmatpush.msra.mxu2 %v680_v51  ;;  %723 = vmatpush.msra.mxu0 %v1200_v40 }
  0x2f   : > { %338 = vperm.xlu1 %1037, %v320_v16   ;;  %843 = vmatpush.msra.mxu3 %v1172_v28 }
  0x30   : > { %761 = vmatpush.msra.mxu1 %v1172_v28  ;;  %811 = vmatpush.msra.mxu2 %v685_v1 }
  0x31   : > { %399 = vmatmul.f32.gmra.mxu0 %v398_v17  ;;  %844 = vmatpush.msra.mxu3 %v1230_v57 }
  0x32   : > { %444 = vmatmul.f32.gmra.mxu1 %v1185_v32  ;;  %725 = vmatpush.msra.mxu0 %v684_v61 }
  0x33   : > { %530 = vmatmul.f32.gmra.mxu3 %v1264_v12  ;;  %762 = vmatpush.msra.mxu1 %v1230_v57  ;;  %v862_v57 = vld [vmem:[%s1356_s18] sm:$0xff] }
  0x34   : > { %489 = vmatmul.f32.gmra.mxu2 %v1254_v5  ;;  %v866_v3 = vunpack.c.l.bf16 %v862_v57  ;;  %v867_v10 = vunpack.c.h.bf16 %v862_v57 }
  0x39   : > { %559 = vmatmul.f32.vlgmr.msrb.gmra.mxu0 %v1122_v6 }
  0x3a   : > { %448 = vmatmul.f32.gmra.mxu1 %v1245_v0 }
  0x3b   : > { %690 = vmatmul.f32.vlgmr.msrb.gmra.mxu3 %v1122_v6 }
  0x3c   : > { %629 = vmatmul.f32.vlgmr.msrb.gmra.mxu2 %v1193_v37 }
  0x41   : > { %563 = vmatmul.f32.gmra.mxu0 %v1124_v7 }
  0x42   : > { %592 = vmatmul.f32.vlgmr.msrb.gmra.mxu1 %v1122_v6 }
  0x43   : > { %694 = vmatmul.f32.gmra.mxu3 %v1124_v7 }
  0x44   : > { %637 = vmatmul.f32.gmra.mxu2 %v1240_v62 }
  0x49   : > { %567 = vmatmul.f32.gmra.mxu0 %v1185_v32 }
  0x4a   : > { %596 = vmatmul.f32.gmra.mxu1 %v1124_v7 }
  0x4b   : > { %698 = vmatmul.f32.gmra.mxu3 %v1185_v32 }
  0x4c   : > { %645 = vmatmul.f32.gmra.mxu2 %v390_v11 }
  0x51   : > { %571 = vmatmul.f32.gmra.mxu0 %v1245_v0 }
  0x52   : > { %600 = vmatmul.f32.gmra.mxu1 %v1185_v32 }
  0x53   : > { %702 = vmatmul.f32.gmra.mxu3 %v1245_v0 }
  0x54   : > { %653 = vmatmul.f32.gmra.mxu2 %v398_v17 }
  0x59   : > { %728 = vmatmul.f32.vlgmr.msra.gmra.mxu0 %v1132_v9 }
  0x5a   : > { %604 = vmatmul.f32.gmra.mxu1 %v1245_v0 }
  0x5b   : > { %846 = vmatmul.f32.vlgmr.msra.gmra.mxu3 %v1122_v6 }
  0x5c   : > { %813 = vmatmul.f32.vlgmr.msra.gmra.mxu2 %v1122_v6 }
  0x61   : > { %733 = vmatmul.f32.gmra.mxu0 %v1142_v14 }
  0x62   : > { %766 = vmatmul.f32.vlgmr.msra.gmra.mxu1 %v1139_v13 }
  0x63   : > { %850 = vmatmul.f32.gmra.mxu3 %v1124_v7 }
  0x64   : > { %817 = vmatmul.f32.gmra.mxu2 %v1124_v7 }
  0x69   : > { %738 = vmatmul.f32.gmra.mxu0 %v1226_v54 }
  0x6a   : > { %772 = vmatmul.f32.gmra.mxu1 %v1183_v31 }
  0x6b   : > { %854 = vmatmul.f32.gmra.mxu3 %v1185_v32 }
  0x6c   : > { %821 = vmatmul.f32.gmra.mxu2 %v1185_v32 }
  0x71   : > { %743 = vmatmul.f32.gmra.mxu0 %v1254_v5 }
  0x72   : > { %778 = vmatmul.f32.gmra.mxu1 %v1243_v63 }
  0x73   : > { %858 = vmatmul.f32.gmra.mxu3 %v1245_v0 }
  0x74   : > { %825 = vmatmul.f32.gmra.mxu2 %v1245_v0 }
  0x7a   : > { %784 = vmatmul.f32.gmra.mxu1 %v1264_v12 }
  0x80   : > { %v324_v38 = vpop.permute.xlu0 %323 }
  0x85   : > { %v334_v54 = vpop.permute.xlu1 %333 }
  0x88   : > { %v329_v45 = vpop.permute.xlu0 %328 }
  0x96   : > { %v376_v6 = vpop.f32.mrf.mxu0 }
  0x97   : > { %v377_v43 = vadd.f32 %v376_v6, %v324_v38  ;;  %v863_v6 = vld [vmem:[%s1356_s18 + $0x8] sm:$0xff] }
  0x9e   : > { %v384_v7 = vpop.f32.mrf.mxu0  ;;  %v513_v14 = vpop.f32.mrf.mxu3 }
  0x9f   : > { %v437_v9 = vpop.f32.mrf.mxu1  ;;  %v475_v13 = vpop.f32.mrf.mxu2  ;;  %v385_v52 = vadd.f32 %v384_v7, %v329_v45 }
  0xa0   : > { %v438_v44 = vadd.f32 %v437_v9, %v377_v43 }
  0xa2   : > { %v476_v51 = vadd.f32 %v475_v13, %v438_v44  ;;  %v339_v13 = vpop.permute.xlu1 %338 }
  0xa4   : > { %v514_v55 = vadd.f32 %v513_v14, %v476_v51 }
  0xa6   : > { %v392_v18 = vpop.f32.mrf.mxu0  ;;  %v519_v21 = vpop.f32.mrf.mxu3 }
  0xa7   : > { %v441_v19 = vpop.f32.mrf.mxu1  ;;  %v480_v20 = vpop.f32.mrf.mxu2  ;;  %v393_v2 = vadd.f32 %v392_v18, %v334_v54 }
  0xa8   : > { %v442_v56 = vadd.f32 %v441_v19, %v385_v52 }
  0xaa   : > { %v481_v4 = vadd.f32 %v480_v20, %v442_v56 }
  0xac   : > { %v520_v16 = vadd.f32 %v519_v21, %v481_v4 }
  0xae   : > { %v1330_v22 = vpop.f32.mrf.mxu0  ;;  %v1334_v25 = vpop.f32.mrf.mxu3 }
  0xaf   : > { %v445_v23 = vpop.f32.mrf.mxu1  ;;  %v1332_v24 = vpop.f32.mrf.mxu2 }
  0xb0   : > { %v446_v15 = vadd.f32 %v445_v23, %v393_v2 }
  0xb6   : > { %v560_v27 = vpop.f32.mrf.mxu0  ;;  %v1340_v29 = vpop.f32.mrf.mxu3 }
  0xb7   : > { %v1336_v26 = vpop.f32.mrf.mxu1  ;;  %v1338_v28 = vpop.f32.mrf.mxu2  ;;  %v561_v61 = vadd.f32 %v560_v27, %v514_v55 }
  0xbe   : > { %v564_v30 = vpop.f32.mrf.mxu0  ;;  %v691_v33 = vpop.f32.mrf.mxu3 }
  0xbf   : > { %v593_v31 = vpop.f32.mrf.mxu1  ;;  %v630_v32 = vpop.f32.mrf.mxu2  ;;  %v565_v18 = vadd.f32 %v564_v30, %v520_v16 }
  0xc0   : > { %v631_v48 = vadd.f32 %v630_v32, %v324_v38  ;;  %v594_v5 = vadd.f32 %v593_v31, %v561_v61  ;;  %v486_v31 = vadd.f32 %v1332_v24, %v446_v15  ;;  %v868_v32 = vunpack.c.l.bf16 %v863_v6 }
  0xc1   : > { %v401_v38 = vadd.f32 %v1330_v22, %v339_v13 }
  0xc2   : > { %v692_v53 = vadd.f32 %v691_v33, %v631_v48  ;;  %v874_v17 = vadd.f32 %v866_v3, %v594_v5  ;;  %v864_v33 = vld [vmem:[%s1356_s18 + $0x10] sm:$0xff]  ;;  %v526_v30 = vadd.f32 %v1334_v25, %v486_v31 }
  0xc6   : > { %v1342_v34 = vpop.f32.mrf.mxu0  ;;  %v695_v37 = vpop.f32.mrf.mxu3 }
  0xc7   : > { %v597_v35 = vpop.f32.mrf.mxu1  ;;  %v638_v36 = vpop.f32.mrf.mxu2 }
  0xc8   : > { %v639_v62 = vadd.f32 %v638_v36, %v329_v45  ;;  %v865_v36 = vld [vmem:[%s1356_s18 + $0x18] sm:$0xff]  ;;  %v598_v43 = vadd.f32 %v597_v35, %v565_v18  ;;  %v869_v45 = vunpack.c.h.bf16 %v863_v6 }
  0xca   : > { %v696_v11 = vadd.f32 %v695_v37, %v639_v62  ;;  %v876_v51 = vadd.f32 %v868_v32, %v598_v43 }
  0xce   : > { %v1344_v39 = vpop.f32.mrf.mxu0  ;;  %v699_v42 = vpop.f32.mrf.mxu3 }
  0xcf   : > { %v1346_v40 = vpop.f32.mrf.mxu1  ;;  %v646_v41 = vpop.f32.mrf.mxu2 }
  0xd0   : > { %v647_v19 = vadd.f32 %v646_v41, %v334_v54  ;;  %v450_v41 = vadd.f32 %v1336_v26, %v401_v38  ;;  %v569_v54 = vadd.f32 %v1342_v34, %v526_v30 }
  0xd6   : > { %v729_v47 = vpop.f32.mrf.mxu0  ;;  %v1350_v50 = vpop.f32.mrf.mxu3 }
  0xd7   : > { %v1348_v46 = vpop.f32.mrf.mxu1  ;;  %v654_v49 = vpop.f32.mrf.mxu2  ;;  %v730_v58 = vadd.f32 %v729_v47, %v692_v53  ;;  %v700_v47 = vadd.f32 %v699_v42, %v647_v19  ;;  %v491_v42 = vadd.f32 %v1338_v28, %v450_v41 }
  0xd8   : > { %v655_v55 = vadd.f32 %v654_v49, %v339_v13 }
  0xd9   : > { %v532_v34 = vadd.f32 %v1340_v29, %v491_v42 }
  0xda   : > { %v704_v61 = vadd.f32 %v1350_v50, %v655_v55  ;;  %v873_v50 = vunpack.c.h.bf16 %v865_v36 }
  0xdb   : > { %v573_v2 = vadd.f32 %v1344_v39, %v532_v34 }
  0xdd   : > { %v606_v5 = vadd.f32 %v1348_v46, %v573_v2 }
  0xde   : > { %v734_v59 = vpop.f32.mrf.mxu0  ;;  %v847_v1 = vpop.f32.mrf.mxu3 }
  0xdf   : > { %v767_v60 = vpop.f32.mrf.mxu1  ;;  %v814_v0 = vpop.f32.mrf.mxu2  ;;  %v735_v7 = vadd.f32 %v734_v59, %v696_v11  ;;  %v602_v59 = vadd.f32 %v1346_v40, %v569_v54 }
  0xe0   : > { %v768_v63 = vadd.f32 %v767_v60, %v730_v58  ;;  %v870_v58 = vunpack.c.l.bf16 %v864_v33  ;;  %v871_v60 = vunpack.c.h.bf16 %v864_v33 }
  0xe2   : > { %v815_v8 = vadd.f32 %v814_v0, %v768_v63  ;;  %v878_v49 = vadd.f32 %v870_v58, %v602_v59 }
  0xe4   : > { %v848_v12 = vadd.f32 %v847_v1, %v815_v8  ;;  %v872_v8 = vunpack.c.l.bf16 %v865_v36 }
  0xe6   : > { %v875_v9 = vadd.f32 %v867_v10, %v848_v12  ;;  %v851_v21 = vpop.f32.mrf.mxu3  ;;  %v739_v37 = vpop.f32.mrf.mxu0  ;;  %v880_v12 = vadd.f32 %v872_v8, %v606_v5 }
  0xe7   : > { %v773_v14 = vpop.f32.mrf.mxu1  ;;  %v818_v23 = vpop.f32.mrf.mxu2  ;;  %v740_v52 = vadd.f32 %v739_v37, %v700_v47 }
  0xe8   : > { %v882_v20 = vpack.c.bf16 %v875_v9, %v874_v17  ;;  %v774_v27 = vadd.f32 %v773_v14, %v735_v7 }
  0xea   : > { %886 = vst [vmem:[%s1364_s23] sm:$0xff] %v882_v20  ;;  %v819_v44 = vadd.f32 %v818_v23, %v774_v27 }
  0xec   : > { %v852_v48 = vadd.f32 %v851_v21, %v819_v44 }
  0xee   : > { %v877_v24 = vadd.f32 %v869_v45, %v852_v48  ;;  %v855_v57 = vpop.f32.mrf.mxu3  ;;  %v744_v26 = vpop.f32.mrf.mxu0 }
  0xef   : > { %v779_v53 = vpop.f32.mrf.mxu1  ;;  %v822_v35 = vpop.f32.mrf.mxu2  ;;  %v745_v63 = vadd.f32 %v744_v26, %v704_v61 }
  0xf0   : > { %v883_v56 = vpack.c.bf16 %v877_v24, %v876_v51  ;;  %v780_v22 = vadd.f32 %v779_v53, %v740_v52 }
  0xf2   : > { %887 = vst [vmem:[%s1364_s23 + $0x8] sm:$0xff] %v883_v56  ;;  %v823_v25 = vadd.f32 %v822_v35, %v780_v22 }
  0xf4   : > { %v856_v62 = vadd.f32 %v855_v57, %v823_v25 }
  0xf6   : > { %v879_v0 = vadd.f32 %v871_v60, %v856_v62  ;;  %v859_v4 = vpop.f32.mrf.mxu3 }
  0xf7   : > { %v785_v1 = vpop.f32.mrf.mxu1  ;;  %v826_v40 = vpop.f32.mrf.mxu2 }
  0xf8   : > { %v884_v28 = vpack.c.bf16 %v879_v0, %v878_v49  ;;  %v786_v3 = vadd.f32 %v785_v1, %v745_v63 }
  0xfa   : > { %888 = vst [vmem:[%s1364_s23 + $0x10] sm:$0xff] %v884_v28  ;;  %v827_v10 = vadd.f32 %v826_v40, %v786_v3 }
  0xfc   : > { %v860_v11 = vadd.f32 %v859_v4, %v827_v10 }
  0xfe   : > { %v881_v29 = vadd.f32 %v873_v50, %v860_v11 }
 0x100   : > { %v885_v15 = vpack.c.bf16 %v881_v29, %v880_v12 }
 0x102   : > { %889 = vst [vmem:[%s1364_s23 + $0x18] sm:$0xff] %v885_v15 }
 0x103 PF: > { %s16_s20 = sadd.s32 1, %s1060_s20   ;;  %s1398_s18 = smov %s1056_s19 }
 0x104   : > { %p13_p5 = scmp.ge.s32.totalorder %s16_s20, 4   ;;  %s1399_s19 = smov %s1401_s4 }
 0x106   :  { %15 = sbr.rel (!%p13_p5) target bundleno = 2 (0x2), region = 73 }

// kernel: fno2d_forward.11
= control target key start
LH: loop header
LB: loop body
LE: loop exit
PB: predicated region body
PF: predicated region fallthrough
CT: control target
= control target key end

     0   :  { %s3481_s25 = smov 0   ;;  %s3483_s26 = smov 0   ;;  %s6071_s0 = inlined_call_operand.vmem [shape: bf16[2,32,256], index: 0, kind: input, shape index: {}]   ;;  %s6072_s1 = inlined_call_operand.vmem [shape: f32[128,32], index: 1, kind: input, shape index: {}]   ;;  %s6073_s2 = inlined_call_operand.vmem [shape: f32[128,1], index: 2, kind: input, shape index: {}]   ;;  %s6074_s3 = inlined_call_operand.<no memory space> [shape: f32[1], index: 3, kind: input, shape index: {}]   ;;  %s6075_s4 = inlined_call_operand.vmem [shape: f32[1,128], index: 4, kind: input, shape index: {}]   ;;  %s6076_s5 = inlined_call_operand.<no memory space> [shape: f32[1,1], index: 5, kind: input, shape index: {}]   ;;  %s6077_s6 = inlined_call_operand.vmem [shape: f32[2,1,256], index: 6, kind: output, shape index: {}]  }
   0x1   :  { %11 = sst [smem:[#allocation2]] %s6074_s3  ;;  %v12_v0 = vstv %s6076_s5  ;;  %s3485_s27 = smov 0  }
   0x2   :  { %13 = vst [vmem:[#allocation3] sm:$0x1] %v12_v0 }
   0x3 LB: > { %s31_s3 = sadd.s32 1, %s3432_s26  ;;  %p3216_p0 = scmp.ge.s32.totalorder %s3436_s27, 1  ;;  %s3436_s27 = sphi %s3485_s27, %s19_s27   ;;  %s3432_s26 = sphi %s3483_s26, %s6525_s26   ;;  %s3428_s25 = sphi %s3481_s25, %s6524_s25  }
   0x4   : > { %p33_p1 = scmp.ge.s32.totalorder %s31_s3, 2  ;;  %p236_p2 = scmp.lt.s32.totalorder %s3436_s27, 3 }
   0x6   : > { %s6527_s3 = smov (%p33_p1, %s31_s3), 0  ;;  %p237_p3 = pnand %p3216_p0, %p236_p2 }
   0x8   : > { %240 = sbr.rel (%p237_p3) target bundleno = 793 (0x319), region = 44 }
   0xd   : > { %v335_v1 = vld [vmem:[%s6073_s2 + $0x78] sm:$0xff]  ;;  %p274_p4 = scmp.lt.s32.totalorder %s3428_s25, 1  ;;  %v292_v2 = vld [vmem:[%s6072_s1] sm:$0xff]  ;;  %vm416_vm0 = vcmask 261120   ;;  %v3438_v3 = vmov 0   ;;  %v333_v5 = vld [vmem:[%s6073_s2 + $0x68] sm:$0xff] }
   0xe   : > { %3281 = vset.pattern.permute.xlu0 %v3438_v3  ;;  %3282 = vset.pattern.permute.xlu1 %v3438_v3  ;;  %v418_v4 = vsel %vm416_vm0, %v292_v2, 0  ;;  %v293_v6 = vld [vmem:[%s6072_s1 + $0x8] sm:$0xff]  ;;  %v331_v9 = vld [vmem:[%s6073_s2 + $0x58] sm:$0xff]  ;;  %v294_v12 = vld [vmem:[%s6072_s1 + $0x10] sm:$0xff]  ;;  %s1717_s29 = sld [smem:[#allocation2]] }
   0xf   : > { %413 = vperm.xlu0 %3281, %v335_v1   ;;  %s6529_s25 = smov (!%p274_p4, %s3428_s25), 1  ;;  %v3514_v7 = vand.u32 4294901760, %v418_v4  ;;  %403 = vperm.xlu1 %3282, %v333_v5   ;;  %v421_v8 = vsel %vm416_vm0, %v293_v6, 0  ;;  %v334_v18 = vld [vmem:[%s6073_s2 + $0x70] sm:$0xff]  ;;  %v332_v22 = vld [vmem:[%s6073_s2 + $0x60] sm:$0xff]  ;;  %v424_v26 = vsel %vm416_vm0, %v294_v12, 0 }
  0x10   : > { %3283 = vset.pattern.permute.xlu2 %v3438_v3  ;;  %s3254_s13 = sshll.u32 %s6529_s25, 5  ;;  %v3524_v11 = vand.u32 4294901760, %v421_v8  ;;  %v330_v30 = vld [vmem:[%s6073_s2 + $0x50] sm:$0xff]  ;;  %v3586_v35 = vand.u32 4294901760, %v424_v26  ;;  %v295_v43 = vld [vmem:[%s6072_s1 + $0x18] sm:$0xff]  ;;  %v329_v46 = vld [vmem:[%s6073_s2 + $0x48] sm:$0xff] }
  0x11   : > { %v3522_v10 = vsub.f32 %v418_v4, %v3514_v7  ;;  %393 = vperm.xlu2 %3283, %v331_v9   ;;  %s281_s16 = scalar_lea.vmem %s6071_s0, %s3254_s13  ;;  %v328_v53 = vld [vmem:[%s6073_s2 + $0x40] sm:$0xff]  ;;  %v427_v54 = vsel %vm416_vm0, %v295_v43, 0  ;;  %v327_v57 = vld [vmem:[%s6073_s2 + $0x38] sm:$0xff]  ;;  %v326_v63 = vld [vmem:[%s6073_s2 + $0x30] sm:$0xff]  ;;  %s3219_s8 = sshll.u32 %s6529_s25, 1 }
  0x12   : > { %v311_v13 = vld [vmem:[%s281_s16 + $0x18] sm:$0xff]  ;;  %v3532_v14 = vld [vmem:[%s281_s16 + $0x10] sm:$0xff]  ;;  %v3534_v15 = vld [vmem:[%s281_s16 + $0x8] sm:$0xff]  ;;  %v3561_v25 = vsub.f32 %v421_v8, %v3524_v11  ;;  %v3622_v50 = vsub.f32 %v424_v26, %v3586_v35  ;;  %v3643_v60 = vand.u32 4294901760, %v427_v54  ;;  %s290_s11 = scalar_lea.vmem %s6077_s6, %s3219_s8 }
  0x13   : > { %v3537_v16 = vand.u32 4294901760, %v3522_v10  ;;  %v3539_v17 = vunpack.c.l.bf16 %v311_v13  ;;  %v3545_v19 = vunpack.c.l.bf16 %v3532_v14  ;;  %v3548_v20 = vunpack.c.l.bf16 %v3534_v15  ;;  %v3550_v21 = vld [vmem:[%s281_s16] sm:$0xff]  ;;  %v325_v2 = vld [vmem:[%s6073_s2 + $0x28] sm:$0xff]  ;;  %v323_v12 = vld [vmem:[%s6073_s2 + $0x18] sm:$0xff] }
  0x14   : > { %v3556_v23 = vunpack.c.l.bf16 %v3550_v21  ;;  %v3593_v38 = vand.u32 4294901760, %v3561_v25  ;;  %v3595_v39 = vunpack.c.h.bf16 %v311_v13  ;;  %6167 = vst [vmem:[#allocation5_spill] sm:$0xff] %v3622_v50  ;;  %v3641_v59 = vand.u32 4294901760, %v3622_v50  ;;  %v296_v62 = vld [vmem:[%s6072_s1 + $0x20] sm:$0xff]  ;;  %v297_v9 = vld [vmem:[%s6072_s1 + $0x28] sm:$0xff]  ;;  %v298_v26 = vld [vmem:[%s6072_s1 + $0x30] sm:$0xff] }
  0x15   : > { %v484_v24 = vsub.f32 %v3522_v10, %v3537_v16  ;;  %477 = vmatpush.msra.mxu0 %v3539_v17  ;;  %v622_v27 = vsub.f32 %v3539_v17, %v3539_v17  ;;  %v3569_v28 = vsub.f32 %v3545_v19, %v3545_v19  ;;  %820 = vmatpush.msra.mxu3 %v3539_v17  ;;  %v430_v3 = vsel %vm416_vm0, %v296_v62, 0  ;;  %v324_v4 = vld [vmem:[%s6073_s2 + $0x20] sm:$0xff]  ;;  %v301_v62 = vld [vmem:[%s6072_s1 + $0x48] sm:$0xff] }
  0x16   : > { %v3574_v29 = vsub.f32 %v3548_v20, %v3548_v20  ;;  %v3581_v31 = vsub.f32 %v3556_v23, %v3556_v23  ;;  %6166 = vst [vmem:[#allocation4_spill] sm:$0xff] %v3593_v38  ;;  %v3607_v44 = vsub.f32 %v3595_v39, %v3595_v39  ;;  %v492_v49 = vsub.f32 %v3561_v25, %v3593_v38 }
  0x17   : > { %408 = vperm.xlu0 %3281, %v334_v18   ;;  %398 = vperm.xlu1 %3282, %v332_v22   ;;  %v623_v32 = vand.u32 4294901760, %v622_v27  ;;  %v628_v33 = vand.u32 4294901760, %v3569_v28  ;;  %v3588_v36 = vand.u32 4294901760, %v484_v24  ;;  %6168 = vst [vmem:[#allocation6_spill] sm:$0xff] %v3641_v59  ;;  %v500_v0 = vsub.f32 %v3622_v50, %v3641_v59  ;;  %v322_v18 = vld [vmem:[%s6073_s2 + $0x10] sm:$0xff] }
  0x18   : > { %478 = vmatpush.msra.mxu0 %v3545_v19  ;;  %720 = vmatpush.msra.mxu2 %v622_v27  ;;  %v633_v34 = vand.u32 4294901760, %v3574_v29  ;;  %v638_v37 = vand.u32 4294901760, %v3581_v31  ;;  %v6080_v51 = vand.u32 4294901760, %v3607_v44  ;;  %v3638_v58 = vand.u32 4294901760, %v492_v49 }
  0x19   : > { %821 = vmatpush.msra.mxu3 %v3545_v19  ;;  %388 = vperm.xlu2 %3283, %v330_v30   ;;  %v624_v40 = vsub.f32 %v622_v27, %v623_v32  ;;  %v629_v41 = vsub.f32 %v3569_v28, %v628_v33  ;;  %v3657_v1 = vsub.f32 %v427_v54, %v3643_v60  ;;  %v3670_v5 = vand.u32 4294901760, %v500_v0  ;;  %v320_v27 = vld [vmem:[%s6073_s2] sm:$0xff] }
  0x1a   : > { %479 = vmatpush.msra.mxu0 %v3548_v20  ;;  %722 = vmatpush.msra.mxu2 %v3569_v28  ;;  %v634_v42 = vsub.f32 %v3574_v29, %v633_v34  ;;  %v639_v48 = vsub.f32 %v3581_v31, %v638_v37  ;;  %v1250_v55 = vsub.f32 %v3607_v44, %v6080_v51  ;;  %v3675_v8 = vand.u32 4294901760, %v430_v3  ;;  %v306_v51 = vld [vmem:[%s6072_s1 + $0x70] sm:$0xff] }
  0x1b   : > { %822 = vmatpush.msra.mxu3 %v3548_v20  ;;  %v625_v45 = vand.u32 4294901760, %v624_v40  ;;  %v630_v47 = vand.u32 4294901760, %v629_v41  ;;  %6169 = vst [vmem:[#allocation7_spill] sm:$0xff] %v3657_v1  ;;  %v3673_v6 = vand.u32 4294901760, %v3657_v1  ;;  %v3726_v30 = vunpack.c.h.bf16 %v3532_v14  ;;  %v299_v40 = vld [vmem:[%s6072_s1 + $0x38] sm:$0xff] }
  0x1c   : > { %480 = vmatpush.msra.mxu0 %v3556_v23  ;;  %724 = vmatpush.msra.mxu2 %v3574_v29  ;;  %v635_v52 = vand.u32 4294901760, %v634_v42  ;;  %v640_v56 = vand.u32 4294901760, %v639_v48  ;;  %v1251_v61 = vand.u32 4294901760, %v1250_v55 }
  0x1d   : > { %486 = vmatmul.f32.vlgmr.msra.gmra.mxu0 %v3588_v36  ;;  %823 = vmatpush.msra.mxu3 %v3556_v23  ;;  %6170 = vst [vmem:[#allocation8_spill] sm:$0xff] %v3673_v6  ;;  %v508_v13 = vsub.f32 %v3657_v1, %v3673_v6 }
  0x1e   : > { %626 = vmatpush.msra.mxu1 %v625_v45  ;;  %726 = vmatpush.msra.mxu2 %v3581_v31  ;;  %v436_v31 = vsel %vm416_vm0, %v298_v26, 0 }
  0x1f   : > { %383 = vperm.xlu0 %3281, %v329_v46   ;;  %729 = vmatmul.f32.vlgmr.msra.gmra.mxu2 %v3522_v10  ;;  %v3705_v22 = vand.u32 4294901760, %v508_v13  ;;  %v3741_v14 = vand.u32 4294901760, %v436_v31  ;;  %v439_v46 = vsel %vm416_vm0, %v299_v40, 0  ;;  %v303_v40 = vld [vmem:[%s6072_s1 + $0x58] sm:$0xff] }
  0x20   : > { %631 = vmatpush.msra.mxu1 %v630_v47  ;;  %827 = vmatmul.f32.vlgmr.msra.gmra.mxu3 %v3537_v16  ;;  %v3767_v49 = vand.u32 4294901760, %v439_v46 }
  0x21   : > { %378 = vperm.xlu1 %3282, %v328_v53   ;;  %1103 = vmatpush.msrb.mxu2 %v3595_v39  ;;  %v3757_v43 = vsub.f32 %v436_v31, %v3741_v14 }
  0x22   : > { %636 = vmatpush.msra.mxu1 %v635_v52  ;;  %935 = vmatpush.msrb.mxu0 %v623_v32  ;;  %v3732_v32 = vsub.f32 %v3726_v30, %v3726_v30  ;;  %v300_v52 = vld [vmem:[%s6072_s1 + $0x40] sm:$0xff]  ;;  %v3777_v54 = vsub.f32 %v439_v46, %v3767_v49 }
  0x23   : > { %1252 = vmatpush.msrb.mxu3 %v1251_v61  ;;  %373 = vperm.xlu2 %3283, %v327_v57   ;;  %6175 = vst [vmem:[#allocation13_spill] sm:$0xff] %v3757_v43  ;;  %v3765_v48 = vand.u32 4294901760, %v3757_v43  ;;  %v442_v55 = vsel %vm416_vm0, %v300_v52, 0  ;;  %v451_v52 = vsel %vm416_vm0, %v303_v40, 0 }
  0x24   : > { %641 = vmatpush.msra.mxu1 %v640_v56  ;;  %938 = vmatpush.msrb.mxu0 %v628_v33  ;;  %6177 = vst [vmem:[#allocation15_spill] sm:$0xff] %v3777_v54  ;;  %v3785_v57 = vand.u32 4294901760, %v3777_v54  ;;  %v3787_v61 = vand.u32 4294901760, %v442_v55 }
  0x25   : > { %494 = vmatmul.f32.gmra.mxu0 %v3638_v58  ;;  %643 = vmatmul.f32.vlgmr.msra.gmra.mxu1 %v3514_v7  ;;  %6176 = vst [vmem:[#allocation14_spill] sm:$0xff] %v3765_v48  ;;  %v532_v53 = vsub.f32 %v3757_v43, %v3765_v48 }
  0x26   : > { %1022 = vmatpush.msrb.mxu1 %v3539_v17  ;;  %941 = vmatpush.msrb.mxu0 %v633_v34  ;;  %v3693_v17 = vsub.f32 %v430_v3, %v3675_v8  ;;  %6178 = vst [vmem:[#allocation16_spill] sm:$0xff] %v3785_v57  ;;  %v3797_v0 = vsub.f32 %v442_v55, %v3787_v61 }
  0x27   : > { %368 = vperm.xlu0 %3281, %v326_v63   ;;  %734 = vmatmul.f32.gmra.mxu2 %v3561_v25  ;;  %v3782_v56 = vand.u32 4294901760, %v532_v53  ;;  %v540_v63 = vsub.f32 %v3777_v54, %v3785_v57 }
  0x28   : > { %833 = vmatmul.f32.gmra.mxu3 %v3593_v38  ;;  %1023 = vmatpush.msrb.mxu1 %v3545_v19  ;;  %6171 = vst [vmem:[#allocation9_spill] sm:$0xff] %v3693_v17  ;;  %v433_v19 = vsel %vm416_vm0, %v297_v9, 0 }
  0x29   : > { %363 = vperm.xlu1 %3282, %v325_v2   ;;  %944 = vmatpush.msrb.mxu0 %v638_v37  ;;  %v3710_v24 = vand.u32 4294901760, %v433_v19  ;;  %v6079_v37 = vand.u32 4294901760, %v3732_v32  ;;  %6179 = vst [vmem:[#allocation17_spill] sm:$0xff] %v3797_v0  ;;  %v445_v2 = vsel %vm416_vm0, %v301_v62, 0  ;;  %v3802_v3 = vand.u32 4294901760, %v540_v63  ;;  %v304_v63 = vld [vmem:[%s6072_s1 + $0x60] sm:$0xff] }
  0x2a   : > { %1024 = vmatpush.msrb.mxu1 %v3548_v20  ;;  %v321_v20 = vld [vmem:[%s6073_s2 + $0x8] sm:$0xff]  ;;  %1104 = vmatpush.msrb.mxu2 %v3726_v30  ;;  %v3807_v9 = vand.u32 4294901760, %v445_v2  ;;  %v3861_v62 = vand.u32 4294901760, %v451_v52 }
  0x2b   : > { %1346 = vmatpush.msra.mxu0 %v3607_v44  ;;  %358 = vperm.xlu2 %3283, %v324_v4   ;;  %v3723_v29 = vsub.f32 %v433_v19, %v3710_v24  ;;  %v1255_v41 = vsub.f32 %v3732_v32, %v6079_v37  ;;  %v3805_v4 = vand.u32 4294901760, %v3797_v0  ;;  %v3820_v19 = vunpack.c.h.bf16 %v3534_v15 }
  0x2c   : > { %1025 = vmatpush.msrb.mxu1 %v3556_v23  ;;  %v3708_v23 = vand.u32 4294901760, %v3693_v17 }
  0x2d   : > { %502 = vmatmul.f32.gmra.mxu0 %v3670_v5  ;;  %647 = vmatmul.f32.gmra.mxu1 %v3524_v11  ;;  %6173 = vst [vmem:[#allocation11_spill] sm:$0xff] %v3723_v29  ;;  %v3739_v34 = vand.u32 4294901760, %v3723_v29  ;;  %v1256_v45 = vand.u32 4294901760, %v1255_v41  ;;  %v548_v13 = vsub.f32 %v3797_v0, %v3805_v4  ;;  %v3826_v26 = vsub.f32 %v3820_v19, %v3820_v19 }
  0x2e   : > { %1446 = vmatpush.msra.mxu1 %v3595_v39  ;;  %6172 = vst [vmem:[#allocation10_spill] sm:$0xff] %v3708_v23  ;;  %v516_v28 = vsub.f32 %v3693_v17, %v3708_v23  ;;  %1348 = vmatpush.msra.mxu0 %v3732_v32 }
  0x2f   : > { %353 = vperm.xlu0 %3281, %v323_v12   ;;  %739 = vmatmul.f32.gmra.mxu2 %v3622_v50  ;;  %6174 = vst [vmem:[#allocation12_spill] sm:$0xff] %v3739_v34  ;;  %v524_v42 = vsub.f32 %v3723_v29, %v3739_v34  ;;  %v302_v12 = vld [vmem:[%s6072_s1 + $0x50] sm:$0xff]  ;;  %v6078_v31 = vand.u32 4294901760, %v3826_v26 }
  0x30   : > { %839 = vmatmul.f32.gmra.mxu3 %v3641_v59  ;;  %v3736_v33 = vand.u32 4294901760, %v516_v28  ;;  %1447 = vmatpush.msra.mxu1 %v3726_v30  ;;  %6180 = vst [vmem:[#allocation18_spill] sm:$0xff] %v3805_v4 }
  0x31   : > { %348 = vperm.xlu1 %3282, %v322_v18   ;;  %1257 = vmatpush.msrb.mxu3 %v1256_v45  ;;  %v3762_v47 = vand.u32 4294901760, %v524_v42  ;;  %v3817_v18 = vsub.f32 %v445_v2, %v3807_v9  ;;  %v1260_v41 = vsub.f32 %v3826_v26, %v6078_v31 }
  0x32   : > { %1448 = vmatpush.msra.mxu1 %v3820_v19  ;;  %1105 = vmatpush.msrb.mxu2 %v3820_v19 }
  0x33   : > { %343 = vperm.xlu2 %3283, %v321_v20   ;;  %6181 = vst [vmem:[#allocation19_spill] sm:$0xff] %v3817_v18  ;;  %v448_v20 = vsel %vm416_vm0, %v302_v12, 0  ;;  %v3834_v28 = vand.u32 4294901760, %v3817_v18  ;;  %1350 = vmatpush.msra.mxu0 %v3826_v26  ;;  %v1261_v46 = vand.u32 4294901760, %v1260_v41  ;;  %v3871_v12 = vsub.f32 %v451_v52, %v3861_v62 }
  0x34   : > { %v3836_v15 = vand.u32 4294901760, %v448_v20 }
  0x35   : > { %510 = vmatmul.f32.gmra.mxu0 %v3705_v22  ;;  %651 = vmatmul.f32.gmra.mxu1 %v3586_v35  ;;  %6182 = vst [vmem:[#allocation20_spill] sm:$0xff] %v3834_v28  ;;  %v556_v42 = vsub.f32 %v3817_v18, %v3834_v28  ;;  %v3879_v40 = vand.u32 4294901760, %v3871_v12 }
  0x36   : > { %v3851_v45 = vsub.f32 %v448_v20, %v3836_v15  ;;  %1262 = vmatpush.msrb.mxu3 %v1261_v46  ;;  %6185 = vst [vmem:[#allocation23_spill] sm:$0xff] %v3871_v12 }
  0x37   : > { %338 = vperm.xlu0 %3281, %v320_v27   ;;  %744 = vmatmul.f32.gmra.mxu2 %v3657_v1  ;;  %v3831_v27 = vand.u32 4294901760, %v548_v13  ;;  %v3856_v53 = vand.u32 4294901760, %v556_v42  ;;  %v454_v13 = vsel %vm416_vm0, %v304_v63, 0  ;;  %6186 = vst [vmem:[#allocation24_spill] sm:$0xff] %v3879_v40  ;;  %v305_v42 = vld [vmem:[%s6072_s1 + $0x68] sm:$0xff]  ;;  %v572_v46 = vsub.f32 %v3871_v12, %v3879_v40 }
  0x38   : > { %845 = vmatmul.f32.gmra.mxu3 %v3673_v6  ;;  %6183 = vst [vmem:[#allocation21_spill] sm:$0xff] %v3851_v45  ;;  %v3859_v55 = vand.u32 4294901760, %v3851_v45  ;;  %v3881_v41 = vand.u32 4294901760, %v454_v13  ;;  %v457_v63 = vsel %vm416_vm0, %v305_v42, 0 }
  0x39   : > { %v3901_v37 = vand.u32 4294901760, %v457_v63 }
  0x3a   : > { %6184 = vst [vmem:[#allocation22_spill] sm:$0xff] %v3859_v55  ;;  %v564_v2 = vsub.f32 %v3851_v45, %v3859_v55  ;;  %v3891_v52 = vsub.f32 %v454_v13, %v3881_v41 }
  0x3b   : > { %v3911_v42 = vsub.f32 %v457_v63, %v3901_v37  ;;  %v6191_v63 = vand.u32 4294901760, %v3607_v44 }
  0x3c   : > { %v3876_v20 = vand.u32 4294901760, %v564_v2  ;;  %6187 = vst [vmem:[#allocation25_spill] sm:$0xff] %v3891_v52  ;;  %v3896_v2 = vand.u32 4294901760, %v572_v46  ;;  %v3899_v31 = vand.u32 4294901760, %v3891_v52  ;;  %v313_v46 = vunpack.c.h.bf16 %v3550_v21  ;;  %v307_v21 = vld [vmem:[%s6072_s1 + $0x78] sm:$0xff] }
  0x3d   : > { %518 = vmatmul.f32.gmra.mxu0 %v3736_v33  ;;  %655 = vmatmul.f32.gmra.mxu1 %v3643_v60  ;;  %6189 = vst [vmem:[#allocation27_spill] sm:$0xff] %v3911_v42 }
  0x3e   : > { %6188 = vst [vmem:[#allocation26_spill] sm:$0xff] %v3899_v31  ;;  %v580_v13 = vsub.f32 %v3891_v52, %v3899_v31  ;;  %1449 = vmatpush.msra.mxu1 %v313_v46  ;;  %1106 = vmatpush.msrb.mxu2 %v313_v46 }
  0x3f   : > { %749 = vmatmul.f32.gmra.mxu2 %v3693_v17 }
  0x40   : > { %851 = vmatmul.f32.gmra.mxu3 %v3708_v23  ;;  %1561 = vmatpush.msra.mxu2 %v6191_v63 }
  0x45   : > { %526 = vmatmul.f32.gmra.mxu0 %v3762_v47  ;;  %659 = vmatmul.f32.gmra.mxu1 %v3675_v8 }
  0x47   : > { %754 = vmatmul.f32.gmra.mxu2 %v3723_v29 }
  0x48   : > { %857 = vmatmul.f32.gmra.mxu3 %v3739_v34 }
  0x4d   : > { %534 = vmatmul.f32.gmra.mxu0 %v3782_v56  ;;  %663 = vmatmul.f32.gmra.mxu1 %v3710_v24 }
  0x4f   : > { %759 = vmatmul.f32.gmra.mxu2 %v3757_v43 }
  0x50   : > { %863 = vmatmul.f32.gmra.mxu3 %v3765_v48 }
  0x55   : > { %542 = vmatmul.f32.gmra.mxu0 %v3802_v3  ;;  %667 = vmatmul.f32.gmra.mxu1 %v3741_v14 }
  0x57   : > { %764 = vmatmul.f32.gmra.mxu2 %v3777_v54 }
  0x58   : > { %869 = vmatmul.f32.gmra.mxu3 %v3785_v57 }
  0x5d   : > { %550 = vmatmul.f32.gmra.mxu0 %v3831_v27  ;;  %671 = vmatmul.f32.gmra.mxu1 %v3767_v49 }
  0x5f   : > { %769 = vmatmul.f32.gmra.mxu2 %v3797_v0 }
  0x60   : > { %875 = vmatmul.f32.gmra.mxu3 %v3805_v4 }
  0x65   : > { %558 = vmatmul.f32.gmra.mxu0 %v3856_v53  ;;  %675 = vmatmul.f32.gmra.mxu1 %v3787_v61 }
  0x67   : > { %774 = vmatmul.f32.gmra.mxu2 %v3817_v18  ;;  %v1263_v18 = vsub.f32 %v313_v46, %v313_v46 }
  0x68   : > { %881 = vmatmul.f32.gmra.mxu3 %v3834_v28  ;;  %v3917_v28 = vand.u32 4294901760, %v580_v13 }
  0x69   : > { %v1264_v13 = vand.u32 4294901760, %v1263_v18  ;;  %1352 = vmatpush.msra.mxu0 %v1263_v18 }
  0x6b   : > { %v1265_v57 = vsub.f32 %v1263_v18, %v1264_v13 }
  0x6d   : > { %566 = vmatmul.f32.gmra.mxu0 %v3876_v20  ;;  %679 = vmatmul.f32.gmra.mxu1 %v3807_v9 }
  0x6f   : > { %779 = vmatmul.f32.gmra.mxu2 %v3851_v45  ;;  %v3920_v45 = vand.u32 4294901760, %v3911_v42 }
  0x70   : > { %887 = vmatmul.f32.gmra.mxu3 %v3859_v55  ;;  %v460_v55 = vsel %vm416_vm0, %v306_v51, 0  ;;  %v6192_v51 = vand.u32 4294901760, %v3732_v32  ;;  %v6194_v32 = vand.u32 4294901760, %v3826_v26 }
  0x71   : > { %6190 = vst [vmem:[#allocation28_spill] sm:$0xff] %v3920_v45  ;;  %v3922_v4 = vand.u32 4294901760, %v460_v55  ;;  %v588_v44 = vsub.f32 %v3911_v42, %v3920_v45 }
  0x72   : > { %1564 = vmatpush.msra.mxu2 %v6192_v51  ;;  %v1266_v51 = vand.u32 4294901760, %v1265_v57 }
  0x73   : > { %v3938_v63 = vsub.f32 %v460_v55, %v3922_v4  ;;  %v3947_v48 = vand.u32 4294901760, %v588_v44 }
  0x74   : > { %1567 = vmatpush.msra.mxu2 %v6194_v32  ;;  %1267 = vmatpush.msrb.mxu3 %v1266_v51 }
  0x75   : > { %574 = vmatmul.f32.gmra.mxu0 %v3896_v2  ;;  %683 = vmatmul.f32.gmra.mxu1 %v3836_v15  ;;  %6193 = vst [vmem:[#allocation29_spill] sm:$0xff] %v3938_v63  ;;  %v3950_v54 = vand.u32 4294901760, %v3938_v63 }
  0x76   : > { %1570 = vmatpush.msra.mxu2 %v1264_v13  ;;  %1648 = vmatpush.msra.mxu3 %v3595_v39 }
  0x77   : > { %784 = vmatmul.f32.gmra.mxu2 %v3871_v12  ;;  %v463_v12 = vsel %vm416_vm0, %v307_v21, 0  ;;  %6195 = vst [vmem:[#allocation30_spill] sm:$0xff] %v3950_v54  ;;  %v596_v57 = vsub.f32 %v3938_v63, %v3950_v54 }
  0x78   : > { %893 = vmatmul.f32.gmra.mxu3 %v3879_v40  ;;  %v3931_v40 = vpop.permute.xlu2 %393  ;;  %v3952_v55 = vand.u32 4294901760, %v463_v12 }
  0x79   : > { %1649 = vmatpush.msra.mxu3 %v3726_v30  ;;  %v3971_v39 = vand.u32 4294901760, %v596_v57 }
  0x7a   : > { %v3962_v26 = vsub.f32 %v463_v12, %v3952_v55 }
  0x7b   : > { %1650 = vmatpush.msra.mxu3 %v3820_v19 }
  0x7c   : > { %6196 = vst [vmem:[#allocation31_spill] sm:$0xff] %v3962_v26  ;;  %v3974_v44 = vand.u32 4294901760, %v3962_v26 }
  0x7d   : > { %582 = vmatmul.f32.gmra.mxu0 %v3917_v28  ;;  %687 = vmatmul.f32.gmra.mxu1 %v3861_v62 }
  0x7e   : > { %6198 = vst [vmem:[#allocation33_spill] sm:$0xff] %v3974_v44  ;;  %1651 = vmatpush.msra.mxu3 %v313_v46  ;;  %v604_v30 = vsub.f32 %v3962_v26, %v3974_v44 }
  0x7f   : > { %789 = vmatmul.f32.gmra.mxu2 %v3891_v52 }
  0x80   : > { %899 = vmatmul.f32.gmra.mxu3 %v3899_v31  ;;  %v3964_v21 = vpop.permute.xlu2 %388  ;;  %v3989_v57 = vand.u32 4294901760, %v604_v30 }
  0x81   : > { %v3945_v0 = vpop.permute.xlu0 %413  ;;  %v3954_v18 = vpop.permute.xlu1 %403  ;;  %6197 = vst [vmem:[#allocation32_spill] sm:$0xff] %v3964_v21 }
  0x85   : > { %590 = vmatmul.f32.gmra.mxu0 %v3947_v48  ;;  %691 = vmatmul.f32.gmra.mxu1 %v3881_v41 }
  0x87   : > { %794 = vmatmul.f32.gmra.mxu2 %v3911_v42 }
  0x88   : > { %905 = vmatmul.f32.gmra.mxu3 %v3920_v45  ;;  %v3985_v32 = vpop.permute.xlu2 %373 }
  0x89   : > { %v3969_v13 = vpop.permute.xlu0 %408  ;;  %v3981_v12 = vpop.permute.xlu1 %398 }
  0x8d   : > { %598 = vmatmul.f32.gmra.mxu0 %v3971_v39  ;;  %695 = vmatmul.f32.gmra.mxu1 %v3901_v37 }
  0x8f   : > { %799 = vmatmul.f32.gmra.mxu2 %v3938_v63 }
  0x90   : > { %911 = vmatmul.f32.gmra.mxu3 %v3950_v54  ;;  %v3999_v54 = vpop.permute.xlu2 %358 }
  0x91   : > { %v3987_v51 = vpop.permute.xlu0 %383 }
  0x92   : > { %6199 = vst [vmem:[#allocation34_spill] sm:$0xff] %v3987_v51 }
  0x93   : > { %v3994_v19 = vpop.permute.xlu1 %378 }
  0x94   : > { %6200 = vst [vmem:[#allocation35_spill] sm:$0xff] %v3994_v19 }
  0x95   : > { %606 = vmatmul.f32.gmra.mxu0 %v3989_v57  ;;  %699 = vmatmul.f32.gmra.mxu1 %v3922_v4 }
  0x97   : > { %804 = vmatmul.f32.gmra.mxu2 %v3962_v26 }
  0x98   : > { %917 = vmatmul.f32.gmra.mxu3 %v3974_v44  ;;  %v4009_v52 = vpop.permute.xlu2 %343 }
  0x99   : > { %v3997_v46 = vpop.permute.xlu0 %368  ;;  %6201 = vst [vmem:[#allocation36_spill] sm:$0xff] %v4009_v52 }
  0x9a   : > { %v487_v45 = vpop.f32.mrf.mxu0 }
  0x9b   : > { %v4007_v26 = vpop.permute.xlu1 %363 }
  0x9d   : > { %703 = vmatmul.f32.gmra.mxu1 %v3952_v55  ;;  %946 = vmatmul.f32.vlgmr.msrb.gmra.mxu0 %v3514_v7 }
  0x9f   : > { %1112 = vmatmul.f32.vlgmr.msrb.gmra.mxu2 %v3588_v36 }
  0xa0   : > { %1269 = vmatmul.f32.vlgmr.msrb.gmra.mxu3 %v3514_v7 }
  0xa1   : > { %v4005_v30 = vpop.permute.xlu0 %353 }
  0xa2   : > { %v495_v63 = vpop.f32.mrf.mxu0  ;;  %v644_v31 = vpop.f32.mrf.mxu1 }
  0xa3   : > { %v730_v44 = vpop.f32.mrf.mxu2  ;;  %v828_v42 = vpop.f32.mrf.mxu3  ;;  %v496_v34 = vadd.f32 %v495_v63, %v4009_v52 }
  0xa4   : > { %v4019_v38 = vpop.permute.xlu1 %348 }
  0xa5   : > { %950 = vmatmul.f32.gmra.mxu0 %v3524_v11  ;;  %1027 = vmatmul.f32.vlgmr.msrb.gmra.mxu1 %v3514_v7 }
  0xa7   : > { %1120 = vmatmul.f32.gmra.mxu2 %v3638_v58 }
  0xa8   : > { %1273 = vmatmul.f32.gmra.mxu3 %v3524_v11 }
  0xa9   : > { %v4016_v36 = vpop.permute.xlu0 %338 }
  0xaa   : > { %v488_v43 = vadd.f32 %v487_v45, %v4016_v36  ;;  %v503_v23 = vpop.f32.mrf.mxu0  ;;  %v648_v29 = vpop.f32.mrf.mxu1 }
  0xab   : > { %v649_v6 = vadd.f32 %v648_v29, %v496_v34  ;;  %v735_v17 = vpop.f32.mrf.mxu2  ;;  %v834_v59 = vpop.f32.mrf.mxu3  ;;  %v504_v52 = vadd.f32 %v503_v23, %v4019_v38 }
  0xac   : > { %v645_v1 = vadd.f32 %v644_v31, %v488_v43 }
  0xad   : > { %v736_v50 = vadd.f32 %v735_v17, %v649_v6  ;;  %954 = vmatmul.f32.gmra.mxu0 %v3586_v35  ;;  %1031 = vmatmul.f32.gmra.mxu1 %v3524_v11 }
  0xae   : > { %v731_v58 = vadd.f32 %v730_v44, %v645_v1 }
  0xaf   : > { %v4023_v63 = vadd.f32 %v834_v59, %v736_v50  ;;  %1128 = vmatmul.f32.gmra.mxu2 %v3670_v5 }
  0xb0   : > { %1277 = vmatmul.f32.gmra.mxu3 %v3586_v35  ;;  %v4028_v29 = vadd.f32 %v828_v42, %v731_v58 }
  0xb2   : > { %v511_v34 = vpop.f32.mrf.mxu0  ;;  %v652_v43 = vpop.f32.mrf.mxu1 }
  0xb3   : > { %v653_v31 = vadd.f32 %v652_v43, %v504_v52  ;;  %v740_v45 = vpop.f32.mrf.mxu2  ;;  %v840_v6 = vpop.f32.mrf.mxu3  ;;  %v512_v50 = vadd.f32 %v511_v34, %v4005_v30 }
  0xb5   : > { %v741_v17 = vadd.f32 %v740_v45, %v653_v31  ;;  %958 = vmatmul.f32.gmra.mxu0 %v3643_v60  ;;  %1035 = vmatmul.f32.gmra.mxu1 %v3586_v35 }
  0xb7   : > { %v4033_v59 = vadd.f32 %v840_v6, %v741_v17  ;;  %1136 = vmatmul.f32.gmra.mxu2 %v3705_v22 }
  0xb8   : > { %1281 = vmatmul.f32.gmra.mxu3 %v3643_v60 }
  0xba   : > { %v519_v1 = vpop.f32.mrf.mxu0  ;;  %v656_v5 = vpop.f32.mrf.mxu1 }
  0xbb   : > { %v657_v23 = vadd.f32 %v656_v5, %v512_v50  ;;  %v745_v42 = vpop.f32.mrf.mxu2  ;;  %v846_v52 = vpop.f32.mrf.mxu3  ;;  %v520_v58 = vadd.f32 %v519_v1, %v3999_v54 }
  0xbd   : > { %v746_v44 = vadd.f32 %v745_v42, %v657_v23  ;;  %962 = vmatmul.f32.gmra.mxu0 %v3675_v8  ;;  %1039 = vmatmul.f32.gmra.mxu1 %v3643_v60 }
  0xbf   : > { %v4040_v43 = vadd.f32 %v846_v52, %v746_v44  ;;  %1144 = vmatmul.f32.gmra.mxu2 %v3736_v33 }
  0xc0   : > { %1285 = vmatmul.f32.gmra.mxu3 %v3675_v8 }
  0xc2   : > { %v527_v22 = vpop.f32.mrf.mxu0  ;;  %v660_v34 = vpop.f32.mrf.mxu1 }
  0xc3   : > { %v661_v31 = vadd.f32 %v660_v34, %v520_v58  ;;  %v750_v45 = vpop.f32.mrf.mxu2  ;;  %v852_v6 = vpop.f32.mrf.mxu3  ;;  %v528_v50 = vadd.f32 %v527_v22, %v4007_v26 }
  0xc5   : > { %v751_v17 = vadd.f32 %v750_v45, %v661_v31  ;;  %966 = vmatmul.f32.gmra.mxu0 %v3710_v24  ;;  %1043 = vmatmul.f32.gmra.mxu1 %v3675_v8 }
  0xc7   : > { %v4047_v5 = vadd.f32 %v852_v6, %v751_v17  ;;  %1152 = vmatmul.f32.gmra.mxu2 %v3762_v47 }
  0xc8   : > { %1289 = vmatmul.f32.gmra.mxu3 %v3710_v24 }
  0xca   : > { %v535_v33 = vpop.f32.mrf.mxu0  ;;  %v664_v1 = vpop.f32.mrf.mxu1 }
  0xcb   : > { %v665_v23 = vadd.f32 %v664_v1, %v528_v50  ;;  %v755_v42 = vpop.f32.mrf.mxu2  ;;  %v858_v52 = vpop.f32.mrf.mxu3  ;;  %v536_v58 = vadd.f32 %v535_v33, %v3997_v46 }
  0xcd   : > { %v756_v44 = vadd.f32 %v755_v42, %v665_v23  ;;  %970 = vmatmul.f32.gmra.mxu0 %v3741_v14  ;;  %1047 = vmatmul.f32.gmra.mxu1 %v3710_v24 }
  0xcf   : > { %v4054_v34 = vadd.f32 %v858_v52, %v756_v44  ;;  %1160 = vmatmul.f32.gmra.mxu2 %v3782_v56 }
  0xd0   : > { %1293 = vmatmul.f32.gmra.mxu3 %v3741_v14 }
  0xd2   : > { %v543_v47 = vpop.f32.mrf.mxu0  ;;  %v668_v22 = vpop.f32.mrf.mxu1 }
  0xd3   : > { %v669_v31 = vadd.f32 %v668_v22, %v536_v58  ;;  %v760_v45 = vpop.f32.mrf.mxu2  ;;  %v864_v6 = vpop.f32.mrf.mxu3  ;;  %v544_v50 = vadd.f32 %v543_v47, %v3985_v32 }
  0xd5   : > { %v761_v17 = vadd.f32 %v760_v45, %v669_v31  ;;  %974 = vmatmul.f32.gmra.mxu0 %v3767_v49  ;;  %1051 = vmatmul.f32.gmra.mxu1 %v3741_v14 }
  0xd7   : > { %v4061_v1 = vadd.f32 %v864_v6, %v761_v17  ;;  %1168 = vmatmul.f32.gmra.mxu2 %v3802_v3 }
  0xd8   : > { %1297 = vmatmul.f32.gmra.mxu3 %v3767_v49 }
  0xda   : > { %v551_v56 = vpop.f32.mrf.mxu0  ;;  %v672_v33 = vpop.f32.mrf.mxu1 }
  0xdb   : > { %v673_v23 = vadd.f32 %v672_v33, %v544_v50  ;;  %v765_v42 = vpop.f32.mrf.mxu2  ;;  %v870_v52 = vpop.f32.mrf.mxu3  ;;  %v552_v58 = vadd.f32 %v551_v56, %v3994_v19 }
  0xdd   : > { %v766_v44 = vadd.f32 %v765_v42, %v673_v23  ;;  %978 = vmatmul.f32.gmra.mxu0 %v3787_v61  ;;  %1055 = vmatmul.f32.gmra.mxu1 %v3767_v49 }
  0xdf   : > { %v4068_v22 = vadd.f32 %v870_v52, %v766_v44  ;;  %1176 = vmatmul.f32.gmra.mxu2 %v3831_v27 }
  0xe0   : > { %1301 = vmatmul.f32.gmra.mxu3 %v3787_v61 }
  0xe2   : > { %v559_v3 = vpop.f32.mrf.mxu0  ;;  %v676_v47 = vpop.f32.mrf.mxu1 }
  0xe3   : > { %v677_v31 = vadd.f32 %v676_v47, %v552_v58  ;;  %v770_v45 = vpop.f32.mrf.mxu2  ;;  %v876_v6 = vpop.f32.mrf.mxu3  ;;  %v560_v50 = vadd.f32 %v559_v3, %v3987_v51 }
  0xe5   : > { %v771_v17 = vadd.f32 %v770_v45, %v677_v31  ;;  %982 = vmatmul.f32.gmra.mxu0 %v3807_v9  ;;  %1059 = vmatmul.f32.gmra.mxu1 %v3787_v61 }
  0xe7   : > { %v4075_v33 = vadd.f32 %v876_v6, %v771_v17  ;;  %1184 = vmatmul.f32.gmra.mxu2 %v3856_v53 }
  0xe8   : > { %1305 = vmatmul.f32.gmra.mxu3 %v3807_v9 }
  0xea   : > { %v567_v27 = vpop.f32.mrf.mxu0  ;;  %v680_v56 = vpop.f32.mrf.mxu1 }
  0xeb   : > { %v681_v23 = vadd.f32 %v680_v56, %v560_v50  ;;  %v775_v42 = vpop.f32.mrf.mxu2  ;;  %v882_v52 = vpop.f32.mrf.mxu3  ;;  %v568_v58 = vadd.f32 %v567_v27, %v3964_v21  ;;  %v6209_v21 = vld [vmem:[#allocation11_spill] sm:$0xff] }
  0xed   : > { %v776_v44 = vadd.f32 %v775_v42, %v681_v23  ;;  %986 = vmatmul.f32.gmra.mxu0 %v3836_v15  ;;  %1063 = vmatmul.f32.gmra.mxu1 %v3807_v9 }
  0xef   : > { %v4082_v47 = vadd.f32 %v882_v52, %v776_v44  ;;  %1192 = vmatmul.f32.gmra.mxu2 %v3876_v20 }
  0xf0   : > { %1309 = vmatmul.f32.gmra.mxu3 %v3836_v15 }
  0xf2   : > { %v575_v53 = vpop.f32.mrf.mxu0  ;;  %v684_v3 = vpop.f32.mrf.mxu1 }
  0xf3   : > { %v685_v31 = vadd.f32 %v684_v3, %v568_v58  ;;  %v780_v45 = vpop.f32.mrf.mxu2  ;;  %v888_v6 = vpop.f32.mrf.mxu3  ;;  %v576_v50 = vadd.f32 %v575_v53, %v3931_v40 }
  0xf5   : > { %v781_v17 = vadd.f32 %v780_v45, %v685_v31  ;;  %990 = vmatmul.f32.gmra.mxu0 %v3861_v62  ;;  %1067 = vmatmul.f32.gmra.mxu1 %v3836_v15 }
  0xf7   : > { %v4089_v56 = vadd.f32 %v888_v6, %v781_v17  ;;  %1200 = vmatmul.f32.gmra.mxu2 %v3896_v2 }
  0xf8   : > { %1313 = vmatmul.f32.gmra.mxu3 %v3861_v62 }
  0xfa   : > { %v583_v20 = vpop.f32.mrf.mxu0  ;;  %v688_v27 = vpop.f32.mrf.mxu1 }
  0xfb   : > { %v689_v23 = vadd.f32 %v688_v27, %v576_v50  ;;  %v785_v42 = vpop.f32.mrf.mxu2  ;;  %v894_v52 = vpop.f32.mrf.mxu3  ;;  %v584_v58 = vadd.f32 %v583_v20, %v3981_v12 }
  0xfd   : > { %v786_v44 = vadd.f32 %v785_v42, %v689_v23  ;;  %994 = vmatmul.f32.gmra.mxu0 %v3881_v41  ;;  %1071 = vmatmul.f32.gmra.mxu1 %v3861_v62 }
  0xff   : > { %v4096_v3 = vadd.f32 %v894_v52, %v786_v44  ;;  %1208 = vmatmul.f32.gmra.mxu2 %v3917_v28 }
 0x100   : > { %1317 = vmatmul.f32.gmra.mxu3 %v3881_v41 }
 0x102   : > { %v591_v2 = vpop.f32.mrf.mxu0  ;;  %v692_v53 = vpop.f32.mrf.mxu1 }
 0x103   : > { %v693_v31 = vadd.f32 %v692_v53, %v584_v58  ;;  %v790_v45 = vpop.f32.mrf.mxu2  ;;  %v900_v6 = vpop.f32.mrf.mxu3  ;;  %v592_v50 = vadd.f32 %v591_v2, %v3954_v18 }
 0x105   : > { %v791_v17 = vadd.f32 %v790_v45, %v693_v31  ;;  %998 = vmatmul.f32.gmra.mxu0 %v3901_v37  ;;  %1075 = vmatmul.f32.gmra.mxu1 %v3881_v41 }
 0x107   : > { %v4103_v27 = vadd.f32 %v900_v6, %v791_v17  ;;  %1216 = vmatmul.f32.gmra.mxu2 %v3947_v48 }
 0x108   : > { %1321 = vmatmul.f32.gmra.mxu3 %v3901_v37 }
 0x10a   : > { %v599_v28 = vpop.f32.mrf.mxu0  ;;  %v696_v20 = vpop.f32.mrf.mxu1 }
 0x10b   : > { %v697_v23 = vadd.f32 %v696_v20, %v592_v50  ;;  %v795_v42 = vpop.f32.mrf.mxu2  ;;  %v906_v52 = vpop.f32.mrf.mxu3  ;;  %v600_v58 = vadd.f32 %v599_v28, %v3969_v13 }
 0x10d   : > { %v796_v44 = vadd.f32 %v795_v42, %v697_v23  ;;  %1002 = vmatmul.f32.gmra.mxu0 %v3922_v4  ;;  %1079 = vmatmul.f32.gmra.mxu1 %v3901_v37 }
 0x10f   : > { %v4110_v53 = vadd.f32 %v906_v52, %v796_v44  ;;  %1224 = vmatmul.f32.gmra.mxu2 %v3971_v39 }
 0x110   : > { %1325 = vmatmul.f32.gmra.mxu3 %v3922_v4 }
 0x112   : > { %v607_v48 = vpop.f32.mrf.mxu0  ;;  %v700_v2 = vpop.f32.mrf.mxu1 }
 0x113   : > { %v701_v31 = vadd.f32 %v700_v2, %v600_v58  ;;  %v800_v45 = vpop.f32.mrf.mxu2  ;;  %v912_v6 = vpop.f32.mrf.mxu3  ;;  %v608_v50 = vadd.f32 %v607_v48, %v3945_v0 }
 0x115   : > { %v801_v17 = vadd.f32 %v800_v45, %v701_v31  ;;  %1006 = vmatmul.f32.gmra.mxu0 %v3952_v55  ;;  %1083 = vmatmul.f32.gmra.mxu1 %v3922_v4 }
 0x117   : > { %v4117_v20 = vadd.f32 %v912_v6, %v801_v17  ;;  %1232 = vmatmul.f32.gmra.mxu2 %v3989_v57 }
 0x118   : > { %1329 = vmatmul.f32.gmra.mxu3 %v3952_v55 }
 0x11a   : > { %v704_v39 = vpop.f32.mrf.mxu1  ;;  %v4121_v28 = vpop.f32.mrf.mxu0 }
 0x11b   : > { %v705_v23 = vadd.f32 %v704_v39, %v608_v50  ;;  %v805_v42 = vpop.f32.mrf.mxu2  ;;  %v918_v52 = vpop.f32.mrf.mxu3  ;;  %v6202_v39 = vld [vmem:[#allocation36_spill] sm:$0xff] }
 0x11d   : > { %v806_v44 = vadd.f32 %v805_v42, %v705_v23  ;;  %1087 = vmatmul.f32.gmra.mxu1 %v3952_v55  ;;  %1355 = vmatmul.f32.vlgmr.msra.gmra.mxu0 %v3522_v10  ;;  %v6203_v42 = vld [vmem:[#allocation5_spill] sm:$0xff] }
 0x11f   : > { %v4125_v58 = vadd.f32 %v918_v52, %v806_v44  ;;  %1572 = vmatmul.f32.vlgmr.msra.gmra.mxu2 %v3514_v7  ;;  %v6204_v52 = vld [vmem:[#allocation4_spill] sm:$0xff] }
 0x120   : > { %1653 = vmatmul.f32.vlgmr.msra.gmra.mxu3 %v3514_v7 }
 0x122   : > { %v4129_v57 = vpop.f32.mrf.mxu0  ;;  %v1028_v48 = vpop.f32.mrf.mxu1 }
 0x123   : > { %v1113_v2 = vpop.f32.mrf.mxu2  ;;  %v1270_v31 = vpop.f32.mrf.mxu3 }
 0x124   : > { %v1114_v45 = vadd.f32 %v1113_v2, %v4016_v36 }
 0x125   : > { %1360 = vmatmul.f32.gmra.mxu0 %v3561_v25  ;;  %1453 = vmatmul.f32.vlgmr.msra.gmra.mxu1 %v3537_v16 }
 0x126   : > { %v4134_v6 = vadd.f32 %v1270_v31, %v1114_v45  ;;  %v6205_v31 = vld [vmem:[#allocation7_spill] sm:$0xff]  ;;  %v6206_v45 = vld [vmem:[#allocation6_spill] sm:$0xff] }
 0x127   : > { %1576 = vmatmul.f32.gmra.mxu2 %v3524_v11 }
 0x128   : > { %1657 = vmatmul.f32.gmra.mxu3 %v3524_v11 }
 0x12a   : > { %v955_v10 = vpop.f32.mrf.mxu0  ;;  %v1032_v17 = vpop.f32.mrf.mxu1 }
 0x12b   : > { %v1121_v7 = vpop.f32.mrf.mxu2  ;;  %v1274_v50 = vpop.f32.mrf.mxu3 }
 0x12c   : > { %v1122_v23 = vadd.f32 %v1121_v7, %v6202_v39 }
 0x12d   : > { %1365 = vmatmul.f32.gmra.mxu0 %v6203_v42  ;;  %1459 = vmatmul.f32.gmra.mxu1 %v6204_v52  ;;  %v6207_v52 = vld [vmem:[#allocation9_spill] sm:$0xff] }
 0x12e   : > { %v4141_v36 = vadd.f32 %v1274_v50, %v1122_v23 }
 0x12f   : > { %1580 = vmatmul.f32.gmra.mxu2 %v3586_v35 }
 0x130   : > { %1661 = vmatmul.f32.gmra.mxu3 %v3586_v35 }
 0x132   : > { %v4145_v16 = vpop.f32.mrf.mxu0  ;;  %v1036_v25 = vpop.f32.mrf.mxu1 }
 0x133   : > { %v1129_v11 = vpop.f32.mrf.mxu2  ;;  %v1278_v44 = vpop.f32.mrf.mxu3 }
 0x134   : > { %v1130_v2 = vadd.f32 %v1129_v11, %v4019_v38  ;;  %v6208_v38 = vld [vmem:[#allocation8_spill] sm:$0xff] }
 0x135   : > { %1370 = vmatmul.f32.gmra.mxu0 %v6205_v31  ;;  %1465 = vmatmul.f32.gmra.mxu1 %v6206_v45 }
 0x136   : > { %v4150_v7 = vadd.f32 %v1278_v44, %v1130_v2 }
 0x137   : > { %1584 = vmatmul.f32.gmra.mxu2 %v3643_v60 }
 0x138   : > { %1665 = vmatmul.f32.gmra.mxu3 %v3643_v60 }
 0x13a   : > { %v4154_v50 = vpop.f32.mrf.mxu0  ;;  %v4156_v35 = vpop.f32.mrf.mxu1 }
 0x13b   : > { %v1137_v39 = vpop.f32.mrf.mxu2  ;;  %v1282_v23 = vpop.f32.mrf.mxu3 }
 0x13c   : > { %v1138_v42 = vadd.f32 %v1137_v39, %v4005_v30  ;;  %v6210_v30 = vld [vmem:[#allocation10_spill] sm:$0xff] }
 0x13d   : > { %1375 = vmatmul.f32.gmra.mxu0 %v6207_v52  ;;  %1471 = vmatmul.f32.gmra.mxu1 %v6208_v38 }
 0x13e   : > { %v4161_v11 = vadd.f32 %v1282_v23, %v1138_v42 }
 0x13f   : > { %1588 = vmatmul.f32.gmra.mxu2 %v3675_v8 }
 0x140   : > { %1669 = vmatmul.f32.gmra.mxu3 %v3675_v8 }
 0x142   : > { %v4165_v44 = vpop.f32.mrf.mxu0  ;;  %v4167_v60 = vpop.f32.mrf.mxu1 }
 0x143   : > { %v1145_v2 = vpop.f32.mrf.mxu2  ;;  %v1286_v31 = vpop.f32.mrf.mxu3 }
 0x144   : > { %v1146_v45 = vadd.f32 %v1145_v2, %v3999_v54  ;;  %v948_v54 = vadd.f32 %v4121_v28, %v4028_v29  ;;  %v6213_v2 = vld [vmem:[#allocation12_spill] sm:$0xff] }
 0x145   : > { %1380 = vmatmul.f32.gmra.mxu0 %v6209_v21  ;;  %1477 = vmatmul.f32.gmra.mxu1 %v6210_v30  ;;  %v6212_v21 = vld [vmem:[#allocation13_spill] sm:$0xff] }
 0x146   : > { %v4172_v39 = vadd.f32 %v1286_v31, %v1146_v45  ;;  %v4187_v45 = vadd.f32 %v1028_v48, %v948_v54  ;;  %v2431_v54 = vld [vmem:[#allocation3] sm:$0x1] }
 0x147   : > { %1592 = vmatmul.f32.gmra.mxu2 %v3710_v24  ;;  %2434 = vperm.xlu1 %3282, %v2431_v54  }
 0x148   : > { %6211 = vst [vmem:[#allocation36_spill] sm:$0xff] %v4172_v39  ;;  %1673 = vmatmul.f32.gmra.mxu3 %v3710_v24  ;;  %v4190_v24 = vstv %s1717_s29 }
 0x149   : > { %6215 = vst [vmem:[#allocation4_spill] sm:$0xff] %v4190_v24  ;;  %v1719_v28 = vmul.f32 %v4190_v24, %v4187_v45 }
 0x14a   : > { %v4176_v8 = vpop.f32.mrf.mxu0  ;;  %v4178_v23 = vpop.f32.mrf.mxu1 }
 0x14b   : > { %v1153_v42 = vpop.f32.mrf.mxu2  ;;  %v1290_v52 = vpop.f32.mrf.mxu3 }
 0x14c   : > { %v1154_v38 = vadd.f32 %v1153_v42, %v4007_v26  ;;  %v952_v26 = vadd.f32 %v4129_v57, %v4023_v63  ;;  %v6218_v63 = vld [vmem:[#allocation14_spill] sm:$0xff]  ;;  %v3220_v57 = vmul.f32 -1.442695, %v1719_v28 }
 0x14d   : > { %1385 = vmatmul.f32.gmra.mxu0 %v6212_v21  ;;  %1483 = vmatmul.f32.gmra.mxu1 %v6213_v2 }
 0x14e   : > { %v4185_v31 = vadd.f32 %v1290_v52, %v1154_v38  ;;  %v4201_v42 = vadd.f32 %v1032_v17, %v952_v26  ;;  %v956_v38 = vadd.f32 %v955_v10, %v4033_v59  ;;  %3284 = vpow2.f32 %v3220_v57 }
 0x14f   : > { %1596 = vmatmul.f32.gmra.mxu2 %v3741_v14 }
 0x150   : > { %6214 = vst [vmem:[#allocation5_spill] sm:$0xff] %v4185_v31  ;;  %1677 = vmatmul.f32.gmra.mxu3 %v3741_v14  ;;  %v6217_v14 = vld [vmem:[#allocation15_spill] sm:$0xff]  ;;  %v1721_v2 = vmul.f32 %v4190_v24, %v4201_v42  ;;  %v4209_v51 = vadd.f32 %v1036_v25, %v956_v38  ;;  %v6221_v25 = vld [vmem:[#allocation17_spill] sm:$0xff] }
 0x151   : > { %6216 = vst [vmem:[#allocation7_spill] sm:$0xff] %v4201_v42 }
 0x152   : > { %v4195_v30 = vpop.f32.mrf.mxu0  ;;  %v4197_v29 = vpop.f32.mrf.mxu1  ;;  %6219 = vst [vmem:[#allocation6_spill] sm:$0xff] %v4209_v51  ;;  %v3222_v10 = vmul.f32 -1.442695, %v1721_v2  ;;  %v1723_v26 = vmul.f32 %v4190_v24, %v4209_v51 }
 0x153   : > { %v1161_v48 = vpop.f32.mrf.mxu2  ;;  %v1294_v52 = vpop.f32.mrf.mxu3 }
 0x154   : > { %v1162_v21 = vadd.f32 %v1161_v48, %v3997_v46  ;;  %3286 = vpow2.f32 %v3222_v10  ;;  %v3224_v38 = vmul.f32 -1.442695, %v1723_v26 }
 0x155   : > { %1390 = vmatmul.f32.gmra.mxu0 %v6217_v14  ;;  %1489 = vmatmul.f32.gmra.mxu1 %v6218_v63  ;;  %v3285_v14 = vpop.eup %3284  ;;  %v3439_v63 = vmov 1.1  }
 0x156   : > { %v4211_v17 = vadd.f32 %v1294_v52, %v1162_v21  ;;  %v6222_v52 = vld [vmem:[#allocation16_spill] sm:$0xff]  ;;  %3288 = vrcp.f32 %v3439_v63  ;;  %v4239_v26 = vadd.f32 1.0, %v3285_v14 }
 0x157   : > { %1600 = vmatmul.f32.gmra.mxu2 %v3767_v49  ;;  %3290 = vpow2.f32 %v3224_v38  ;;  %v972_v38 = vadd.f32 %v4176_v8, %v4061_v1 }
 0x158   : > { %6220 = vst [vmem:[#allocation9_spill] sm:$0xff] %v4211_v17  ;;  %1681 = vmatmul.f32.gmra.mxu3 %v3767_v49  ;;  %v960_v49 = vadd.f32 %v4145_v16, %v4040_v43  ;;  %v964_v43 = vadd.f32 %v4154_v50, %v4047_v5  ;;  %v968_v5 = vadd.f32 %v4165_v44, %v4054_v34  ;;  %3292 = vrcp.f32 %v4239_v26 }
 0x159   : > { %vm1884_vm2 = vweird.f32 %v4239_v26 }
 0x15a   : > { %v4215_v59 = vpop.f32.mrf.mxu0  ;;  %v1056_v46 = vpop.f32.mrf.mxu1  ;;  %v4262_v14 = vadd.f32 %v4178_v23, %v968_v5  ;;  %v976_v23 = vadd.f32 %v4195_v30, %v4068_v22  ;;  %v6235_v5 = vld [vmem:[#allocation20_spill] sm:$0xff] }
 0x15b   : > { %v1169_v28 = vpop.f32.mrf.mxu2  ;;  %v1298_v48 = vpop.f32.mrf.mxu3 }
 0x15c   : > { %v1170_v54 = vadd.f32 %v1169_v28, %v3985_v32  ;;  %v4229_v32 = vadd.f32 %v4156_v35, %v960_v49  ;;  %v4244_v35 = vadd.f32 %v4167_v60, %v964_v43  ;;  %6230 = vst [vmem:[#allocation15_spill] sm:$0xff] %v4262_v14  ;;  %v4266_v43 = vadd.f32 %v4197_v29, %v972_v38 }
 0x15d   : > { %1395 = vmatmul.f32.gmra.mxu0 %v6221_v25  ;;  %1495 = vmatmul.f32.gmra.mxu1 %v6222_v52  ;;  %v1729_v8 = vmul.f32 %v4190_v24, %v4262_v14 }
 0x15e   : > { %v4224_v21 = vadd.f32 %v1298_v48, %v1170_v54  ;;  %6224 = vst [vmem:[#allocation11_spill] sm:$0xff] %v4229_v32  ;;  %v1725_v28 = vmul.f32 %v4190_v24, %v4229_v32  ;;  %v6228_v48 = vld [vmem:[#allocation19_spill] sm:$0xff]  ;;  %v6229_v54 = vld [vmem:[#allocation18_spill] sm:$0xff]  ;;  %v1727_v49 = vmul.f32 %v4190_v24, %v4244_v35  ;;  %v1731_v38 = vmul.f32 %v4190_v24, %v4266_v43 }
 0x15f   : > { %1604 = vmatmul.f32.gmra.mxu2 %v3787_v61  ;;  %6227 = vst [vmem:[#allocation12_spill] sm:$0xff] %v4244_v35  ;;  %v3230_v30 = vmul.f32 -1.442695, %v1729_v8  ;;  %v980_v8 = vadd.f32 %v4215_v59, %v4075_v33 }
 0x160   : > { %6223 = vst [vmem:[#allocation8_spill] sm:$0xff] %v4224_v21  ;;  %1685 = vmatmul.f32.gmra.mxu3 %v3787_v61  ;;  %v3287_v61 = vpop.eup %3286  ;;  %v3226_v60 = vmul.f32 -1.442695, %v1725_v28  ;;  %v3228_v1 = vmul.f32 -1.442695, %v1727_v49 }
 0x161   : > { %v4248_v25 = vpop.eup %3288  ;;  %v4254_v50 = vadd.f32 1.0, %v3287_v61  ;;  %6231 = vst [vmem:[#allocation14_spill] sm:$0xff] %v4266_v43 }
 0x162   : > { %v983_v57 = vpop.f32.mrf.mxu0  ;;  %v4231_v2 = vpop.f32.mrf.mxu1  ;;  %v2392_v34 = vmul.f32 1.1, %v4248_v25  ;;  %vm2396_vm1 = vweird.f32 %v4248_v25 }
 0x163   : > { %v4235_v16 = vpop.f32.mrf.mxu2  ;;  %v4237_v10 = vpop.f32.mrf.mxu3  ;;  %3294 = vrcp.f32 %v4254_v50  ;;  %vm1914_vm6 = vweird.f32 %v4254_v50 }
 0x164   : > { %6225 = vst [vmem:[#allocation10_spill] sm:$0xff] %v4235_v16  ;;  %v3291_v52 = vpop.eup %3290  ;;  %3296 = vpow2.f32 %v3226_v60 }
 0x165   : > { %6226 = vst [vmem:[#allocation13_spill] sm:$0xff] %v4237_v10  ;;  %1400 = vmatmul.f32.gmra.mxu0 %v6228_v48  ;;  %1501 = vmatmul.f32.gmra.mxu1 %v6229_v54  ;;  %v4273_v28 = vadd.f32 1.0, %v3291_v52  ;;  %v6234_v48 = vld [vmem:[#allocation21_spill] sm:$0xff]  ;;  %v4280_v29 = vpop.eup %3292  ;;  %v2393_v54 = vsub.f32 1.0, %v2392_v34  ;;  %v4285_v52 = vadd.f32 %v1056_v46, %v976_v23  ;;  %v984_v34 = vadd.f32 %v983_v57, %v4082_v47 }
 0x166   : > { %v1880_v22 = vmul.f32 %v4280_v29, %v4239_v26  ;;  %vm1885_vm3 = vweird.f32 %v4280_v29 }
 0x167   : > { %1608 = vmatmul.f32.gmra.mxu2 %v3807_v9  ;;  %6236 = vst [vmem:[#allocation19_spill] sm:$0xff] %v4285_v52  ;;  %3298 = vrcp.f32 %v4273_v28  ;;  %v2394_v49 = vmul.f32 %v4248_v25, %v2393_v54  ;;  %v6239_v54 = vld [vmem:[#allocation23_spill] sm:$0xff]  ;;  %vm4367_vm5 = vmor %vm1884_vm2, %vm1885_vm3  ;;  %vm1944_vm10 = vweird.f32 %v4273_v28 }
 0x168   : > { %1689 = vmatmul.f32.gmra.mxu3 %v3807_v9  ;;  %3300 = vpow2.f32 %v3228_v1  ;;  %v1881_v1 = vsub.f32 1.0, %v1880_v22 }
 0x169   : > { %v4292_v60 = vpop.eup %3294  ;;  %3302 = vpow2.f32 %v3230_v30  ;;  %v2395_v57 = vadd.f32 %v4248_v25, %v2394_v49  ;;  %v4316_v30 = vadd.f32 %v4231_v2, %v980_v8 }
 0x16a   : > { %v987_v44 = vpop.f32.mrf.mxu0  ;;  %v1064_v63 = vpop.f32.mrf.mxu1  ;;  %v1882_v49 = vmul.f32 %v4280_v29, %v1881_v1  ;;  %vm1915_vm7 = vweird.f32 %v4292_v60 }
 0x16b   : > { %v4268_v61 = vpop.f32.mrf.mxu2  ;;  %v4270_v9 = vpop.f32.mrf.mxu3  ;;  %v4302_v10 = vadd.f32 %v1064_v63, %v984_v34  ;;  %6241 = vst [vmem:[#allocation20_spill] sm:$0xff] %v4316_v30  ;;  %v988_v33 = vadd.f32 %v987_v44, %v4089_v56  ;;  %v4334_v8 = vsel %vm2396_vm1, %v4248_v25, %v2395_v57  ;;  %vm4402_vm8 = vmor %vm1914_vm6, %vm1915_vm7 }
 0x16c   : > { %6232 = vst [vmem:[#allocation17_spill] sm:$0xff] %v4268_v61  ;;  %v3297_v23 = vpop.eup %3296 }
 0x16d   : > { %6233 = vst [vmem:[#allocation16_spill] sm:$0xff] %v4270_v9  ;;  %1405 = vmatmul.f32.gmra.mxu0 %v6234_v48  ;;  %1507 = vmatmul.f32.gmra.mxu1 %v6235_v5  ;;  %v3232_v5 = vmul.f32 -1.442695, %v1731_v38  ;;  %v1733_v9 = vmul.f32 %v4190_v24, %v4285_v52  ;;  %v4307_v47 = vpop.eup %3298  ;;  %v1910_v38 = vmul.f32 %v4292_v60, %v4254_v50  ;;  %v4312_v16 = vadd.f32 1.0, %v3297_v23 }
 0x16e   : > { %v3301_v63 = vpop.eup %3300  ;;  %v1737_v59 = vmul.f32 %v4190_v24, %v4302_v10  ;;  %v1940_v2 = vmul.f32 %v4307_v47, %v4273_v28  ;;  %vm1945_vm9 = vweird.f32 %v4307_v47 }
 0x16f   : > { %1612 = vmatmul.f32.gmra.mxu2 %v3836_v15  ;;  %3304 = vpow2.f32 %v3232_v5  ;;  %v3234_v22 = vmul.f32 -1.442695, %v1733_v9  ;;  %v1911_v34 = vsub.f32 1.0, %v1910_v38  ;;  %v4330_v56 = vadd.f32 1.0, %v3301_v63  ;;  %v3303_v23 = vpop.eup %3302  ;;  %vm4433_vm12 = vmor %vm1944_vm10, %vm1945_vm9 }
 0x170   : > { %1693 = vmatmul.f32.gmra.mxu3 %v3836_v15  ;;  %3306 = vrcp.f32 %v4312_v16  ;;  %v1888_v5 = vand.u32 2147483647, %v4239_v26  ;;  %v3238_v38 = vmul.f32 -1.442695, %v1737_v59  ;;  %v1941_v21 = vsub.f32 1.0, %v1940_v2  ;;  %v6243_v59 = vld [vmem:[#allocation24_spill] sm:$0xff] }
 0x171   : > { %3308 = vpow2.f32 %v3234_v22  ;;  %v6242_v22 = vld [vmem:[#allocation25_spill] sm:$0xff]  ;;  %v1912_v19 = vmul.f32 %v4292_v60, %v1911_v34  ;;  %v4349_v17 = vadd.f32 1.0, %v3303_v23  ;;  %vm2004_vm14 = vweird.f32 %v4330_v56 }
 0x172   : > { %v991_v48 = vpop.f32.mrf.mxu0  ;;  %v1068_v46 = vpop.f32.mrf.mxu1  ;;  %3310 = vrcp.f32 %v4330_v56  ;;  %vm4352_vm4 = vcmp.eq.f32.partialorder %v1888_v5, 8.507059e+37  ;;  %v1918_v5 = vand.u32 2147483647, %v4254_v50 }
 0x173   : > { %v4298_v61 = vpop.f32.mrf.mxu2  ;;  %v4300_v15 = vpop.f32.mrf.mxu3  ;;  %3312 = vpow2.f32 %v3238_v38  ;;  %v1920_v38 = vand.u32 2147483648, %v4254_v50  ;;  %vm2034_vm0 = vweird.f32 %v4349_v17 }
 0x174   : > { %6237 = vst [vmem:[#allocation18_spill] sm:$0xff] %v4298_v61  ;;  %v6240_v61 = vld [vmem:[#allocation22_spill] sm:$0xff]  ;;  %3314 = vrcp.f32 %v4349_v17  ;;  %vm1919_vm11 = vcmp.eq.f32.partialorder %v1918_v5, 8.507059e+37 }
 0x175   : > { %6238 = vst [vmem:[#allocation21_spill] sm:$0xff] %v4300_v15  ;;  %1410 = vmatmul.f32.gmra.mxu0 %v6239_v54  ;;  %1513 = vmatmul.f32.gmra.mxu1 %v6240_v61  ;;  %v4325_v61 = vadd.f32 %v1068_v46, %v988_v33  ;;  %v1890_v54 = vand.u32 2147483648, %v4239_v26  ;;  %v3305_v63 = vpop.eup %3304  ;;  %v1883_v33 = vadd.f32 %v4280_v29, %v1882_v49 }
 0x176   : > { %v992_v15 = vadd.f32 %v991_v48, %v4096_v3  ;;  %v4372_v23 = vadd.f32 1.0, %v3305_v63 }
 0x177   : > { %1616 = vmatmul.f32.gmra.mxu2 %v3861_v62  ;;  %v1739_v25 = vmul.f32 %v4190_v24, %v4325_v61  ;;  %v1891_v2 = vor.u32 1.1754944e-38, %v1890_v54 }
 0x178   : > { %1697 = vmatmul.f32.gmra.mxu3 %v3861_v62  ;;  %v1735_v62 = vmul.f32 %v4190_v24, %v4316_v30  ;;  %vm2064_vm2 = vweird.f32 %v4372_v23 }
 0x179   : > { %v3240_v26 = vmul.f32 -1.442695, %v1739_v25 }
 0x17a   : > { %v995_v44 = vpop.f32.mrf.mxu0  ;;  %v1072_v9 = vpop.f32.mrf.mxu1  ;;  %v3236_v3 = vmul.f32 -1.442695, %v1735_v62 }
 0x17b   : > { %v1201_v46 = vpop.f32.mrf.mxu2  ;;  %v1314_v1 = vpop.f32.mrf.mxu3  ;;  %v4356_v48 = vadd.f32 %v1072_v9, %v992_v15  ;;  %v1887_v9 = vsel %vm4367_vm5, %v4280_v29, %v1883_v33  ;;  %v996_v62 = vadd.f32 %v995_v44, %v4103_v27 }
 0x17c   : > { %v1202_v57 = vadd.f32 %v1201_v46, %v3931_v40  ;;  %v4361_v40 = vpop.eup %3306  ;;  %v1913_v46 = vadd.f32 %v4292_v60, %v1912_v19  ;;  %3316 = vpow2.f32 %v3236_v3  ;;  %v1892_v19 = vsel %vm4352_vm4, %v1891_v2, %v1887_v9  ;;  %v6252_v3 = vld [vmem:[#allocation27_spill] sm:$0xff]  ;;  %v6253_v9 = vld [vmem:[#allocation26_spill] sm:$0xff] }
 0x17d   : > { %1415 = vmatmul.f32.gmra.mxu0 %v6242_v22  ;;  %1519 = vmatmul.f32.gmra.mxu1 %v6243_v59  ;;  %v3309_v15 = vpop.eup %3308  ;;  %v1741_v29 = vmul.f32 %v4190_v24, %v4356_v48  ;;  %3318 = vrcp.f32 %v4372_v23  ;;  %v1948_v22 = vand.u32 2147483647, %v4273_v28 }
 0x17e   : > { %v4358_v51 = vadd.f32 %v1314_v1, %v1202_v57  ;;  %v1942_v1 = vmul.f32 %v4307_v47, %v1941_v21  ;;  %v4389_v44 = vpop.eup %3310  ;;  %v1970_v21 = vmul.f32 %v4361_v40, %v4312_v16  ;;  %v4396_v25 = vadd.f32 1.0, %v3309_v15 }
 0x17f   : > { %1620 = vmatmul.f32.gmra.mxu2 %v3881_v41  ;;  %6249 = vst [vmem:[#allocation22_spill] sm:$0xff] %v4389_v44  ;;  %3320 = vpow2.f32 %v3240_v26  ;;  %v3313_v34 = vpop.eup %3312  ;;  %v1917_v2 = vsel %vm4402_vm8, %v4292_v60, %v1913_v46  ;;  %v1950_v15 = vand.u32 2147483648, %v4273_v28  ;;  %v2000_v26 = vmul.f32 %v4389_v44, %v4330_v56 }
 0x180   : > { %6246 = vst [vmem:[#allocation23_spill] sm:$0xff] %v4358_v51  ;;  %1701 = vmatmul.f32.gmra.mxu3 %v3881_v41  ;;  %v1943_v50 = vadd.f32 %v4307_v47, %v1942_v1  ;;  %v1921_v60 = vor.u32 1.1754944e-38, %v1920_v38  ;;  %v1971_v46 = vsub.f32 1.0, %v1970_v21  ;;  %3322 = vrcp.f32 %v4396_v25 }
 0x181   : > { %v4429_v57 = vmul.f32 %v1892_v19, %v4187_v45  ;;  %vm4446_vm13 = vcmp.eq.f32.partialorder %v1948_v22, 8.507059e+37  ;;  %v1951_v5 = vor.u32 1.1754944e-38, %v1950_v15  ;;  %v2010_v22 = vand.u32 2147483648, %v4330_v56 }
 0x182   : > { %v999_v54 = vpop.f32.mrf.mxu0  ;;  %v1076_v41 = vpop.f32.mrf.mxu1  ;;  %v4441_v38 = vsel %vm1919_vm11, %v1921_v60, %v1917_v2  ;;  %vm2005_vm15 = vweird.f32 %v4389_v44  ;;  %vm2094_vm6 = vweird.f32 %v4396_v25 }
 0x183   : > { %v4387_v63 = vadd.f32 %v1076_v41, %v996_v62  ;;  %v1209_v33 = vpop.f32.mrf.mxu2  ;;  %v1318_v27 = vpop.f32.mrf.mxu3  ;;  %v3242_v62 = vmul.f32 -1.442695, %v1741_v29  ;;  %6256 = vst [vmem:[#allocation27_spill] sm:$0xff] %v4429_v57  ;;  %v6265_v29 = vld [vmem:[#allocation28_spill] sm:$0xff]  ;;  %v4483_v45 = vor.u32 1.1754944e-38, %v2010_v22  ;;  %vm4523_vm3 = vmor %vm2004_vm14, %vm2005_vm15 }
 0x184   : > { %v1210_v49 = vadd.f32 %v1209_v33, %v3981_v12  ;;  %v4423_v33 = vpop.eup %3314  ;;  %6260 = vst [vmem:[#allocation37_spill] sm:$0xff] %v4441_v38 }
 0x185   : > { %v1743_v59 = vmul.f32 %v4190_v24, %v4387_v63  ;;  %1420 = vmatmul.f32.gmra.mxu0 %v6252_v3  ;;  %1525 = vmatmul.f32.gmra.mxu1 %v6253_v9  ;;  %6255 = vst [vmem:[#allocation24_spill] sm:$0xff] %v4423_v33  ;;  %v3317_v1 = vpop.eup %3316  ;;  %v2030_v3 = vmul.f32 %v4423_v33, %v4349_v17  ;;  %vm2035_vm1 = vweird.f32 %v4423_v33 }
 0x186   : > { %v4420_v41 = vadd.f32 %v1318_v27, %v1210_v49  ;;  %v4437_v27 = vadd.f32 1.0, %v3313_v34  ;;  %v4439_v28 = vpop.eup %3318  ;;  %v2001_v49 = vsub.f32 1.0, %v2000_v26  ;;  %v1000_v34 = vadd.f32 %v999_v54, %v4110_v53  ;;  %v6263_v53 = vld [vmem:[#allocation29_spill] sm:$0xff]  ;;  %6267 = vst [vmem:[#allocation38_spill] sm:$0xff] %v4483_v45  ;;  %vm4561_vm5 = vmor %vm2034_vm0, %vm2035_vm1 }
 0x187   : > { %v3244_v12 = vmul.f32 -1.442695, %v1743_v59  ;;  %1624 = vmatmul.f32.gmra.mxu2 %v3901_v37  ;;  %6259 = vst [vmem:[#allocation26_spill] sm:$0xff] %v4439_v28  ;;  %v3321_v59 = vpop.eup %3320  ;;  %v2060_v15 = vmul.f32 %v4439_v28, %v4372_v23  ;;  %vm2065_vm4 = vweird.f32 %v4439_v28 }
 0x188   : > { %6254 = vst [vmem:[#allocation25_spill] sm:$0xff] %v4420_v41  ;;  %1705 = vmatmul.f32.gmra.mxu3 %v3901_v37  ;;  %v1947_v37 = vsel %vm4433_vm12, %v4307_v47, %v1943_v50  ;;  %v4456_v50 = vadd.f32 1.0, %v3317_v1  ;;  %v4465_v54 = vpop.eup %3322  ;;  %v4473_v1 = vadd.f32 1.0, %v3321_v59  ;;  %vm4587_vm7 = vmor %vm2064_vm2, %vm2065_vm4  ;;  %vm2154_vm9 = vweird.f32 %v4437_v27 }
 0x189   : > { %3324 = vpow2.f32 %v3244_v12  ;;  %v1972_v12 = vmul.f32 %v4361_v40, %v1971_v46  ;;  %v4469_v60 = vsel %vm4446_vm13, %v1951_v5, %v1947_v37  ;;  %v2040_v5 = vand.u32 2147483648, %v4349_v17 }
 0x18a   : > { %v1003_v19 = vpop.f32.mrf.mxu0  ;;  %v1080_v21 = vpop.f32.mrf.mxu1  ;;  %3326 = vpow2.f32 %v3242_v62  ;;  %6264 = vst [vmem:[#allocation29_spill] sm:$0xff] %v4469_v60  ;;  %vm2095_vm8 = vweird.f32 %v4465_v54  ;;  %vm2184_vm13 = vweird.f32 %v4473_v1 }
 0x18b   : > { %v1217_v2 = vpop.f32.mrf.mxu2  ;;  %v1322_v9 = vpop.f32.mrf.mxu3  ;;  %3328 = vrcp.f32 %v4437_v27  ;;  %v4461_v26 = vadd.f32 %v1080_v21, %v1000_v34  ;;  %v2002_v34 = vmul.f32 %v4389_v44, %v2001_v49  ;;  %v4489_v49 = vadd.f32 %v4361_v40, %v1972_v12  ;;  %vm4619_vm10 = vmor %vm2094_vm6, %vm2095_vm8 }
 0x18c   : > { %v1218_v62 = vadd.f32 %v1217_v2, %v3954_v18  ;;  %v2031_v18 = vsub.f32 1.0, %v2030_v3  ;;  %3330 = vrcp.f32 %v4456_v50  ;;  %v2061_v3 = vsub.f32 1.0, %v2060_v15 }
 0x18d   : > { %1425 = vmatmul.f32.gmra.mxu0 %v6263_v53  ;;  %1531 = vmatmul.f32.gmra.mxu1 %v6265_v29  ;;  %v1745_v2 = vmul.f32 %v4190_v24, %v4461_v26  ;;  %6268 = vst [vmem:[#allocation39_spill] sm:$0xff] %v4489_v49  ;;  %3332 = vrcp.f32 %v4473_v1  ;;  %v1004_v29 = vadd.f32 %v1003_v19, %v4117_v20 }
 0x18e   : > { %v4479_v53 = vadd.f32 %v1322_v9, %v1218_v62  ;;  %v2090_v62 = vmul.f32 %v4465_v54, %v4396_v25  ;;  %v4501_v12 = vadd.f32 %v4389_v44, %v2002_v34  ;;  %v2032_v37 = vmul.f32 %v4423_v33, %v2031_v18  ;;  %v6271_v18 = vld [vmem:[#allocation31_spill] sm:$0xff] }
 0x18f   : > { %v3325_v21 = vpop.eup %3324  ;;  %1628 = vmatmul.f32.gmra.mxu2 %v3922_v4  ;;  %v3246_v9 = vmul.f32 -1.442695, %v1745_v2  ;;  %v2062_v19 = vmul.f32 %v4439_v28, %v2061_v3  ;;  %v6275_v3 = vld [vmem:[#allocation30_spill] sm:$0xff] }
 0x190   : > { %6266 = vst [vmem:[#allocation28_spill] sm:$0xff] %v4479_v53  ;;  %1709 = vmatmul.f32.gmra.mxu3 %v3922_v4  ;;  %v3327_v59 = vpop.eup %3326  ;;  %v4495_v22 = vadd.f32 1.0, %v3325_v21  ;;  %v4506_v21 = vor.u32 1.1754944e-38, %v2040_v5  ;;  %v6272_v5 = vmov 0 }
 0x191   : > { %v4498_v4 = vpop.eup %3328  ;;  %6269 = vst [vmem:[#allocation40_spill] sm:$0xff] %v4501_v12  ;;  %3334 = vpow2.f32 %v3246_v9  ;;  %v4508_v41 = vadd.f32 1.0, %v3327_v59  ;;  %v6273_v5 = vsel %vm4523_vm3, 4294967295, %v6272_v5 }
 0x192   : > { %v1007_v46 = vpop.f32.mrf.mxu0  ;;  %v1084_v47 = vpop.f32.mrf.mxu1  ;;  %6270 = vst [vmem:[#allocation41_spill] sm:$0xff] %v4506_v21  ;;  %v2150_v59 = vmul.f32 %v4498_v4, %v4437_v27  ;;  %3336 = vrcp.f32 %v4495_v22  ;;  %vm2155_vm11 = vweird.f32 %v4498_v4 }
 0x193   : > { %v1225_v15 = vpop.f32.mrf.mxu2  ;;  %v1326_v2 = vpop.f32.mrf.mxu3  ;;  %v4510_v20 = vadd.f32 %v1084_v47, %v1004_v29  ;;  %6274 = vst [vmem:[#allocation31_spill] sm:$0xff] %v6273_v5  ;;  %v2091_v47 = vsub.f32 1.0, %v2090_v62  ;;  %3338 = vrcp.f32 %v4508_v41  ;;  %v1008_v62 = vadd.f32 %v1007_v46, %v4125_v58  ;;  %vm4655_vm12 = vmor %vm2154_vm9, %vm2155_vm11 }
 0x194   : > { %v1226_v34 = vadd.f32 %v1225_v15, %v3969_v13  ;;  %v4517_v9 = vpop.eup %3330  ;;  %v4538_v15 = vadd.f32 %v4423_v33, %v2032_v37  ;;  %v4551_v37 = vadd.f32 %v4439_v28, %v2062_v19  ;;  %v2220_v5 = vand.u32 2147483648, %v4508_v41 }
 0x195   : > { %1430 = vmatmul.f32.gmra.mxu0 %v6271_v18  ;;  %v1747_v13 = vmul.f32 %v4190_v24, %v4510_v20  ;;  %1537 = vmatmul.f32.gmra.mxu1 %v6275_v3  ;;  %v4544_v53 = vpop.eup %3332  ;;  %v6279_v3 = vmov 0  ;;  %vm2214_vm15 = vweird.f32 %v4508_v41  ;;  %vm2244_vm11 = vweird.f32 %v4495_v22 }
 0x196   : > { %6276 = vst [vmem:[#allocation30_spill] sm:$0xff] %v4538_v15  ;;  %v4541_v18 = vadd.f32 %v1326_v2, %v1226_v34  ;;  %v2100_v2 = vand.u32 2147483648, %v4396_v25  ;;  %v2120_v34 = vmul.f32 %v4517_v9, %v4456_v50  ;;  %v6280_v3 = vsel %vm4561_vm5, 4294967295, %v6279_v3 }
 0x197   : > { %1632 = vmatmul.f32.gmra.mxu2 %v3952_v55  ;;  %v3248_v51 = vmul.f32 -1.442695, %v1747_v13  ;;  %v3335_v29 = vpop.eup %3334  ;;  %6278 = vst [vmem:[#allocation43_spill] sm:$0xff] %v4551_v37  ;;  %v2151_v13 = vsub.f32 1.0, %v2150_v59  ;;  %vm2185_vm14 = vweird.f32 %v4544_v53  ;;  %v4676_v37 = vor.u32 1.1754944e-38, %v2220_v5 }
 0x198   : > { %6277 = vst [vmem:[#allocation42_spill] sm:$0xff] %v4541_v18  ;;  %1713 = vmatmul.f32.gmra.mxu3 %v3952_v55  ;;  %v2092_v55 = vmul.f32 %v4465_v54, %v2091_v47  ;;  %v4566_v19 = vadd.f32 1.0, %v3335_v29  ;;  %v4576_v47 = vpop.eup %3336  ;;  %v2180_v29 = vmul.f32 %v4544_v53, %v4473_v1 }
 0x199   : > { %6281 = vst [vmem:[#allocation44_spill] sm:$0xff] %v6280_v3  ;;  %3340 = vpow2.f32 %v3248_v51  ;;  %v2130_v51 = vand.u32 2147483648, %v4456_v50  ;;  %v4596_v59 = vpop.eup %3338  ;;  %vm2245_vm6 = vweird.f32 %v4576_v47 }
 0x19a   : > { %v1088_v18 = vpop.f32.mrf.mxu1  ;;  %v1356_v57 = vpop.f32.mrf.mxu0  ;;  %3342 = vrcp.f32 %v4566_v19  ;;  %v4603_v35 = vadd.f32 %v4465_v54, %v2092_v55  ;;  %v2160_v55 = vand.u32 2147483648, %v4437_v27  ;;  %v2181_v32 = vsub.f32 1.0, %v2180_v29  ;;  %vm4716_vm9 = vmor %vm2244_vm11, %vm2245_vm6 }
 0x19b   : > { %v4573_v46 = vadd.f32 %v1088_v18, %v1008_v62  ;;  %v1357_v60 = vadd.f32 %v1356_v57, %v4134_v6  ;;  %v1233_v38 = vpop.f32.mrf.mxu2  ;;  %v1330_v42 = vpop.f32.mrf.mxu3  ;;  %v6282_v62 = vmov 0  ;;  %v4591_v6 = vor.u32 1.1754944e-38, %v2100_v2  ;;  %vm4735_vm6 = vmor %vm2184_vm13, %vm2185_vm14 }
 0x19c   : > { %v6283_v62 = vsel %vm4587_vm7, 4294967295, %v6282_v62  ;;  %v2121_v57 = vsub.f32 1.0, %v2120_v34  ;;  %v1234_v58 = vadd.f32 %v1233_v38, %v3945_v0  ;;  %v2152_v2 = vmul.f32 %v4498_v4, %v2151_v13  ;;  %v6285_v34 = vld [vmem:[#allocation33_spill] sm:$0xff] }
 0x19d   : > { %6284 = vst [vmem:[#allocation45_spill] sm:$0xff] %v6283_v62  ;;  %v1749_v18 = vmul.f32 %v4190_v24, %v4573_v46  ;;  %1543 = vmatmul.f32.gmra.mxu1 %v6285_v34  ;;  %v2240_v0 = vmul.f32 %v4576_v47, %v4495_v22  ;;  %v4613_v14 = vor.u32 1.1754944e-38, %v2130_v51  ;;  %v4643_v29 = vor.u32 1.1754944e-38, %v2160_v55 }
 0x19e   : > { %v4611_v31 = vadd.f32 %v1330_v42, %v1234_v58  ;;  %v2122_v34 = vmul.f32 %v4517_v9, %v2121_v57  ;;  %v2210_v42 = vmul.f32 %v4596_v59, %v4508_v41  ;;  %v2190_v57 = vand.u32 2147483648, %v4473_v1 }
 0x19f   : > { %v3250_v38 = vmul.f32 -1.442695, %v1749_v18  ;;  %v3341_v43 = vpop.eup %3340  ;;  %v4635_v18 = vadd.f32 %v4498_v4, %v2152_v2  ;;  %v2241_v45 = vsub.f32 1.0, %v2240_v0  ;;  %v2182_v2 = vmul.f32 %v4544_v53, %v2181_v32 }
 0x1a0   : > { %6286 = vst [vmem:[#allocation33_spill] sm:$0xff] %v4611_v31  ;;  %v4626_v58 = vadd.f32 1.0, %v3341_v43  ;;  %v4628_v51 = vpop.eup %3342  ;;  %v4649_v30 = vadd.f32 %v4517_v9, %v2122_v34  ;;  %v2211_v43 = vsub.f32 1.0, %v2210_v42  ;;  %v2218_v42 = vand.u32 2147483647, %v4508_v41 }
 0x1a1   : > { %3344 = vpow2.f32 %v3250_v38  ;;  %v2270_v38 = vmul.f32 %v4628_v51, %v4566_v19  ;;  %v4673_v32 = vadd.f32 %v4544_v53, %v2182_v2  ;;  %vm2215_vm0 = vweird.f32 %v4596_v59 }
 0x1a2   : > { %v1361_v24 = vpop.f32.mrf.mxu0  ;;  %v1454_v31 = vpop.f32.mrf.mxu1  ;;  %3346 = vrcp.f32 %v4626_v58  ;;  %v2212_v28 = vmul.f32 %v4596_v59, %v2211_v43  ;;  %v2248_v62 = vand.u32 2147483647, %v4495_v22  ;;  %vm2275_vm2 = vweird.f32 %v4628_v51  ;;  %vm4762_vm14 = vmor %vm2214_vm15, %vm2215_vm0 }
 0x1a3   : > { %v1573_v12 = vpop.f32.mrf.mxu2  ;;  %v1654_v44 = vpop.f32.mrf.mxu3  ;;  %v1362_v49 = vadd.f32 %v1361_v24, %v4141_v36  ;;  %v2271_v55 = vsub.f32 1.0, %v2270_v38  ;;  %v1455_v52 = vadd.f32 %v1454_v31, %v1357_v60  ;;  %v4666_v24 = vor.u32 1.1754944e-38, %v2190_v57 }
 0x1a4   : > { %v2242_v31 = vmul.f32 %v4576_v47, %v2241_v45  ;;  %v2250_v45 = vand.u32 2147483648, %v4495_v22  ;;  %vm4693_vm4 = vcmp.eq.f32.partialorder %v2218_v42, 8.507059e+37  ;;  %vm2274_vm8 = vweird.f32 %v4566_v19 }
 0x1a5   : > { %v2272_v60 = vmul.f32 %v4628_v51, %v2271_v55  ;;  %v1574_v38 = vadd.f32 %v1573_v12, %v1455_v52  ;;  %v2280_v55 = vand.u32 2147483648, %v4566_v19  ;;  %v2213_v33 = vadd.f32 %v4596_v59, %v2212_v28  ;;  %vm4708_vm1 = vmor %vm2274_vm8, %vm2275_vm2 }
 0x1a6   : > { %v2308_v3 = vand.u32 2147483647, %v4626_v58  ;;  %v2310_v39 = vand.u32 2147483648, %v4626_v58  ;;  %v6298_v22 = vand.u32 2147483647, %v4437_v27  ;;  %v2251_v27 = vor.u32 1.1754944e-38, %v2250_v45 }
 0x1a7   : > { %v3345_v34 = vpop.eup %3344  ;;  %v4685_v21 = vadd.f32 %v1654_v44, %v1574_v38  ;;  %v2273_v52 = vadd.f32 %v4628_v51, %v2272_v60  ;;  %v2243_v44 = vadd.f32 %v4576_v47, %v2242_v31  ;;  %v2278_v38 = vand.u32 2147483647, %v4566_v19 }
 0x1a8   : > { %v4678_v36 = vadd.f32 1.0, %v3345_v34  ;;  %v4680_v57 = vpop.eup %3346  ;;  %vm4727_vm8 = vcmp.eq.f32.partialorder %v6298_v22, 8.507059e+37  ;;  %v6308_v31 = vand.u32 2147483647, %v4456_v50  ;;  %vm2304_vm2 = vweird.f32 %v4626_v58 }
 0x1a9   : > { %6291 = vst [vmem:[#allocation46_spill] sm:$0xff] %v4685_v21  ;;  %v2300_v12 = vmul.f32 %v4680_v57, %v4626_v58  ;;  %v2217_v45 = vsel %vm4762_vm14, %v4596_v59, %v2213_v33  ;;  %vm6314_vm3 = vweird.f32 %v4680_v57  ;;  %v2311_v41 = vor.u32 1.1754944e-38, %v2310_v39 }
 0x1aa   : > { %3348 = vrcp.f32 %v4678_v36  ;;  %v1366_v5 = vpop.f32.mrf.mxu0  ;;  %v1460_v2 = vpop.f32.mrf.mxu1  ;;  %vm4754_vm13 = vcmp.eq.f32.partialorder %v6308_v31, 8.507059e+37  ;;  %vm2306_vm7 = vmor %vm2304_vm2, %vm6314_vm3  ;;  %vm2309_vm15 = vcmp.eq.f32.partialorder %v2308_v3, 8.507059e+37  ;;  %vm1975_vm0 = vweird.f32 %v4361_v40 }
 0x1ab   : > { %v1577_v34 = vpop.f32.mrf.mxu2  ;;  %v1658_v60 = vpop.f32.mrf.mxu3  ;;  %v2301_v21 = vsub.f32 1.0, %v2300_v12  ;;  %v1367_v42 = vadd.f32 %v1366_v5, %v4150_v7  ;;  %v1461_v15 = vadd.f32 %v1460_v2, %v1362_v49  ;;  %v2277_v7 = vsel %vm4708_vm1, %v4628_v51, %v2273_v52 }
 0x1ac   : > { %vm4742_vm1 = vcmp.eq.f32.partialorder %v2248_v62, 8.507059e+37  ;;  %v2281_v51 = vor.u32 1.1754944e-38, %v2280_v55  ;;  %v6305_v2 = vand.u32 2147483647, %v4396_v25  ;;  %v6315_v59 = vand.u32 2147483647, %v4349_v17 }
 0x1ad   : > { %v2302_v28 = vmul.f32 %v4680_v57, %v2301_v21  ;;  %v1578_v49 = vadd.f32 %v1577_v34, %v1461_v15  ;;  %v2247_v21 = vsel %vm4716_vm9, %v4576_v47, %v2243_v44  ;;  %vm2279_vm9 = vcmp.eq.f32.partialorder %v2278_v38, 8.507059e+37  ;;  %v6336_v34 = vld [vmem:[#allocation36_spill] sm:$0xff] }
 0x1ae   : > { %vm4748_vm11 = vcmp.eq.f32.partialorder %v6305_v2, 8.507059e+37  ;;  %v2282_v44 = vsel %vm2279_vm9, %v2281_v51, %v2277_v7  ;;  %v2187_v38 = vsel %vm4735_vm6, %v4544_v53, %v4673_v32  ;;  %v2252_v58 = vsel %vm4742_vm1, %v2251_v27, %v2247_v21 }
 0x1af   : > { %v2303_v25 = vadd.f32 %v4680_v57, %v2302_v28  ;;  %v4768_v62 = vadd.f32 %v1658_v60, %v1578_v49  ;;  %vm4786_vm3 = vcmp.eq.f32.partialorder %v6315_v59, 8.507059e+37  ;;  %v2222_v17 = vsel %vm4693_vm4, %v4676_v37, %v2217_v45 }
 0x1b0   : > { %v3349_v52 = vpop.eup %3348  ;;  %v2385_v21 = vmul.f32 %v2282_v44, %v4461_v26  ;;  %v2340_v27 = vand.u32 2147483648, %v4678_v36  ;;  %vm1974_vm2 = vweird.f32 %v4312_v16  ;;  %vm6321_vm6 = vweird.f32 %v4517_v9 }
 0x1b1   : > { %6313 = vst [vmem:[#allocation47_spill] sm:$0xff] %v4768_v62  ;;  %v2330_v55 = vmul.f32 %v3349_v52, %v4678_v36  ;;  %v2307_v60 = vsel %vm2306_vm7, %v4680_v57, %v2303_v25  ;;  %v6318_v57 = vand.u32 2147483647, %v4372_v23  ;;  %vm6322_vm1 = vweird.f32 %v4456_v50 }
 0x1b2   : > { %v1371_v19 = vpop.f32.mrf.mxu0  ;;  %v1466_v33 = vpop.f32.mrf.mxu1  ;;  %v2312_v7 = vsel %vm2309_vm15, %v2311_v41, %v2307_v60  ;;  %vm4808_vm14 = vmor %vm6322_vm1, %vm6321_vm6  ;;  %vm2335_vm9 = vweird.f32 %v3349_v52  ;;  %v2338_v37 = vand.u32 2147483647, %v4678_v36  ;;  %v6325_v26 = vand.u32 2147483647, %v4330_v56  ;;  %v6339_v60 = vld [vmem:[#allocation30_spill] sm:$0xff] }
 0x1b3   : > { %v2331_v28 = vsub.f32 1.0, %v2330_v55  ;;  %v1372_v53 = vadd.f32 %v1371_v19, %v4161_v11  ;;  %v1467_v32 = vadd.f32 %v1466_v33, %v1367_v42  ;;  %v1581_v49 = vpop.f32.mrf.mxu2  ;;  %v1662_v5 = vpop.f32.mrf.mxu3  ;;  %vm4793_vm7 = vcmp.eq.f32.partialorder %v6318_v57, 8.507059e+37  ;;  %v6341_v33 = vld [vmem:[#allocation41_spill] sm:$0xff]  ;;  %v6347_v57 = vld [vmem:[#allocation19_spill] sm:$0xff] }
 0x1b4   : > { %v2387_v15 = vmul.f32 %v2312_v7, %v4510_v20  ;;  %vm4815_vm4 = vcmp.eq.f32.partialorder %v6325_v26, 8.507059e+37  ;;  %v2127_v50 = vsel %vm4808_vm14, %v4517_v9, %v4649_v30  ;;  %v6328_v51 = vand.u32 2147483647, %v4473_v1  ;;  %v6352_v26 = vld [vmem:[#allocation31_spill] sm:$0xff] }
 0x1b5   : > { %v2332_v42 = vmul.f32 %v3349_v52, %v2331_v28  ;;  %v1582_v43 = vadd.f32 %v1581_v49, %v1467_v32  ;;  %v2383_v2 = vmul.f32 %v2252_v58, %v4387_v63  ;;  %vm2334_vm6 = vweird.f32 %v4678_v36  ;;  %v6338_v58 = vld [vmem:[#allocation24_spill] sm:$0xff]  ;;  %v6342_v28 = vld [vmem:[#allocation45_spill] sm:$0xff]  ;;  %v6345_v32 = vld [vmem:[#allocation43_spill] sm:$0xff] }
 0x1b6   : > { %vm2189_vm15 = vcmp.eq.f32.partialorder %v6328_v51, 8.507059e+37  ;;  %v2426_v31 = vmul.f32 %v4334_v8, %v2387_v15  ;;  %v6330_v45 = vsel %vm4655_vm12, %v4498_v4, %v4635_v18  ;;  %v2381_v63 = vmul.f32 %v2222_v17, %v4356_v48  ;;  %vm2336_vm1 = vmor %vm2334_vm6, %vm2335_vm9  ;;  %v6355_v51 = vld [vmem:[#allocation40_spill] sm:$0xff] }
 0x1b7   : > { %v2192_v47 = vsel %vm2189_vm15, %v4666_v24, %v2187_v38  ;;  %v2333_v25 = vadd.f32 %v3349_v52, %v2332_v42  ;;  %v4829_v56 = vadd.f32 %v1662_v5, %v1582_v43  ;;  %v2162_v30 = vsel %vm4727_vm8, %v4643_v29, %v6330_v45 }
 0x1b8   : > { %v2424_v1 = vmul.f32 %v4334_v8, %v2385_v21  ;;  %v2341_v9 = vor.u32 1.1754944e-38, %v2340_v27  ;;  %v6331_v36 = vsel %vm4619_vm10, %v4465_v54, %v4603_v35  ;;  %v2132_v29 = vsel %vm4754_vm13, %v4613_v14, %v2127_v50  ;;  %v6348_v21 = vld [vmem:[#allocation20_spill] sm:$0xff]  ;;  %v6354_v50 = vld [vmem:[#allocation22_spill] sm:$0xff] }
 0x1b9   : > { %6329 = vst [vmem:[#allocation48_spill] sm:$0xff] %v4829_v56  ;;  %v2102_v4 = vsel %vm4748_vm11, %v4591_v6, %v6331_v36  ;;  %v2337_v18 = vsel %vm2336_vm1, %v3349_v52, %v2333_v25  ;;  %vm2339_vm12 = vcmp.eq.f32.partialorder %v2338_v37, 8.507059e+37  ;;  %v2379_v48 = vmul.f32 %v2192_v47, %v4325_v61  ;;  %v6351_v37 = vld [vmem:[#allocation39_spill] sm:$0xff]  ;;  %v6357_v47 = vld [vmem:[#allocation38_spill] sm:$0xff] }
 0x1ba   : > { %v2422_v0 = vmul.f32 %v4334_v8, %v2383_v2  ;;  %v4855_v24 = vand.u32 4294901760, %v2426_v31  ;;  %v2342_v13 = vsel %vm2339_vm12, %v2341_v9, %v2337_v18  ;;  %v1376_v12 = vpop.f32.mrf.mxu0  ;;  %v1472_v44 = vpop.f32.mrf.mxu1  ;;  %v6332_v35 = vand.u32 2147483647, %v4312_v16  ;;  %v6361_v18 = vld [vmem:[#allocation14_spill] sm:$0xff] }
 0x1bb   : > { %v6335_v6 = vand.u32 2147483648, %v4372_v23  ;;  %v2377_v52 = vmul.f32 %v2162_v30, %v4302_v10  ;;  %v2389_v61 = vmul.f32 %v2342_v13, %v4573_v46  ;;  %v1377_v22 = vadd.f32 %v1376_v12, %v6336_v34  ;;  %v1585_v41 = vpop.f32.mrf.mxu2  ;;  %v1666_v55 = vpop.f32.mrf.mxu3  ;;  %v6344_v46 = vld [vmem:[#allocation26_spill] sm:$0xff] }
 0x1bc   : > { %vm4859_vm10 = vcmp.eq.f32.partialorder %v6332_v35, 8.507059e+37  ;;  %v6340_v19 = vsel %vm4561_vm5, %v6338_v58, %v6339_v60  ;;  %v2420_v23 = vmul.f32 %v4334_v8, %v2381_v63  ;;  %v4877_v7 = vand.u32 4294901760, %v2424_v1  ;;  %vm4893_vm5 = vmor %vm1974_vm2, %vm1975_vm0  ;;  %v6363_v58 = vld [vmem:[#allocation12_spill] sm:$0xff] }
 0x1bd   : > { %v2071_v14 = vor.u32 1.1754944e-38, %v6335_v6  ;;  %v2042_v59 = vsel %vm4786_vm3, %v6341_v33, %v6340_v19  ;;  %v1473_v10 = vadd.f32 %v1472_v44, %v1372_v53  ;;  %vm6343_vm8 = vnez %v6342_v28 }
 0x1be   : > { %v6346_v49 = vsel %vm6343_vm8, %v6344_v46, %v6345_v32  ;;  %v2373_v17 = vmul.f32 %v2102_v4, %v6347_v57  ;;  %v2375_v15 = vmul.f32 %v2132_v29, %v6348_v21  ;;  %v2428_v39 = vmul.f32 %v4334_v8, %v2389_v61  ;;  %v6364_v32 = vld [vmem:[#allocation11_spill] sm:$0xff] }
 0x1bf   : > { %v2072_v5 = vsel %vm4793_vm7, %v2071_v14, %v6346_v49  ;;  %v2418_v27 = vmul.f32 %v4334_v8, %v2379_v48  ;;  %v4898_v11 = vand.u32 4294901760, %v2422_v0  ;;  %v1586_v3 = vadd.f32 %v1585_v41, %v1473_v10  ;;  %v6362_v14 = vld [vmem:[#allocation5_spill] sm:$0xff] }
 0x1c0   : > { %v4901_v42 = vsub.f32 %v2426_v31, %v4855_v24  ;;  %v1977_v43 = vsel %vm4893_vm5, %v4361_v40, %v6351_v37  ;;  %vm6353_vm11 = vnez %v6352_v26  ;;  %v2416_v45 = vmul.f32 %v4334_v8, %v2377_v52  ;;  %v6358_v31 = vld [vmem:[#allocation15_spill] sm:$0xff]  ;;  %v6369_v26 = vld [vmem:[#allocation29_spill] sm:$0xff] }
 0x1c1   : > { %v6356_v2 = vsel %vm6353_vm11, %v6354_v50, %v6355_v51  ;;  %v4916_v30 = vand.u32 4294901760, %v2428_v39  ;;  %v2369_v63 = vmul.f32 %v2042_v59, %v6358_v31  ;;  %v4919_v9 = vand.u32 4294901760, %v2420_v23 }
 0x1c2   : > { %v2012_v25 = vsel %vm4815_vm4, %v6357_v47, %v6356_v2  ;;  %v4921_v36 = vadd.f32 %v1666_v55, %v1586_v3  ;;  %v4924_v40 = vsub.f32 %v2424_v1, %v4877_v7  ;;  %v6360_v4 = vand.u32 2147483648, %v4312_v16  ;;  %v1381_v44 = vpop.f32.mrf.mxu0  ;;  %v1478_v1 = vpop.f32.mrf.mxu1  ;;  %v6367_v3 = vld [vmem:[#allocation37_spill] sm:$0xff] }
 0x1c3   : > { %v2371_v48 = vmul.f32 %v2072_v5, %v6361_v18  ;;  %v4930_v20 = vmul.f32 %v4334_v8, %v2373_v17  ;;  %v4933_v13 = vsub.f32 %v2428_v39, %v4916_v30  ;;  %2439 = vmatpush.msrb.mxu0 %v4916_v30  ;;  %2635 = vmatpush.msrb.mxu3 %v4916_v30  ;;  %v4941_v16 = vand.u32 4294901760, %v2418_v27  ;;  %v1589_v34 = vpop.f32.mrf.mxu2  ;;  %v1670_v41 = vpop.f32.mrf.mxu3 }
 0x1c4   : > { %6359 = vst [vmem:[#allocation36_spill] sm:$0xff] %v4921_v36  ;;  %v1981_v29 = vor.u32 1.1754944e-38, %v6360_v4  ;;  %v2414_v12 = vmul.f32 %v4334_v8, %v2375_v15  ;;  %v4939_v35 = vsub.f32 %v2422_v0, %v4898_v11  ;;  %v2487_v6 = vand.u32 4294901760, %v4901_v42 }
 0x1c5   : > { %v1382_v52 = vadd.f32 %v1381_v44, %v6362_v14  ;;  %v1479_v61 = vadd.f32 %v1478_v1, %v1377_v22  ;;  %2441 = vmatpush.msrb.mxu0 %v4855_v24  ;;  %2582 = vmatpush.msrb.mxu2 %v4933_v13  ;;  %v2481_v55 = vand.u32 4294901760, %v4933_v13  ;;  %v4948_v38 = vand.u32 4294901760, %v2416_v45 }
 0x1c6   : > { %v1982_v0 = vsel %vm4859_vm10, %v1981_v29, %v1977_v43  ;;  %v2367_v60 = vmul.f32 %v2012_v25, %v6363_v58  ;;  %2637 = vmatpush.msrb.mxu3 %v4855_v24  ;;  %v4955_v19 = vsub.f32 %v2420_v23, %v4919_v9  ;;  %v2493_v22 = vand.u32 4294901760, %v4924_v40  ;;  %v6368_v43 = vld [vmem:[#allocation6_spill] sm:$0xff]  ;;  %v2430_v29 = vld [vmem:[%s6075_s4] sm:$0x1] }
 0x1c7   : > { %v2410_v33 = vmul.f32 %v4334_v8, %v2371_v48  ;;  %v1590_v59 = vadd.f32 %v1589_v34, %v1479_v61  ;;  %2443 = vmatpush.msrb.mxu0 %v4877_v7  ;;  %2585 = vmatpush.msrb.mxu2 %v4901_v42  ;;  %v2482_v54 = vsub.f32 %v4933_v13, %v2481_v55  ;;  %v4971_v28 = vand.u32 4294901760, %v2414_v12  ;;  %v6370_v48 = vld [vmem:[#allocation9_spill] sm:$0xff] }
 0x1c8   : > { %2639 = vmatpush.msrb.mxu3 %v4877_v7  ;;  %v2488_v23 = vsub.f32 %v4901_v42, %v2487_v6  ;;  %v4969_v10 = vsub.f32 %v2418_v27, %v4941_v16  ;;  %v6144_v46 = vand.u32 4294901760, %v4939_v35  ;;  %v2365_v49 = vmul.f32 %v1982_v0, %v6364_v32  ;;  %v6366_v27 = vld [vmem:[#allocation7_spill] sm:$0xff] }
 0x1c9   : > { %v2408_v5 = vmul.f32 %v4334_v8, %v2369_v63  ;;  %2445 = vmatpush.msrb.mxu0 %v4898_v11  ;;  %2588 = vmatpush.msrb.mxu2 %v4924_v40  ;;  %v4979_v57 = vsub.f32 %v2416_v45, %v4948_v38  ;;  %v4982_v17 = vand.u32 4294901760, %v4930_v20  ;;  %v4984_v21 = vadd.f32 %v1670_v41, %v1590_v59 }
 0x1ca   : > { %2641 = vmatpush.msrb.mxu3 %v4898_v11  ;;  %v2483_v15 = vand.u32 4294901760, %v2482_v54  ;;  %v2494_v39 = vsub.f32 %v4924_v40, %v2493_v22  ;;  %v6143_v53 = vand.u32 4294901760, %v4955_v19  ;;  %v2361_v37 = vmul.f32 %v6367_v3, %v6366_v27  ;;  %v1386_v47 = vpop.f32.mrf.mxu0  ;;  %v1484_v25 = vpop.f32.mrf.mxu1 }
 0x1cb   : > { %6365 = vst [vmem:[#allocation44_spill] sm:$0xff] %v4984_v21  ;;  %v2363_v50 = vmul.f32 %v6369_v26, %v6368_v43  ;;  %v2406_v51 = vmul.f32 %v4334_v8, %v2367_v60  ;;  %2447 = vmatpush.msrb.mxu0 %v4919_v9  ;;  %2591 = vmatpush.msrb.mxu2 %v4939_v35  ;;  %v4998_v2 = vand.u32 4294901760, %v2410_v33  ;;  %v2489_v45 = vand.u32 4294901760, %v2488_v23  ;;  %v1593_v14 = vpop.f32.mrf.mxu2  ;;  %v1674_v61 = vpop.f32.mrf.mxu3  ;;  %v6373_v26 = vld [vmem:[#allocation27_spill] sm:$0xff] }
 0x1cc   : > { %2484 = vmatpush.msrb.mxu1 %v2483_v15  ;;  %2643 = vmatpush.msrb.mxu3 %v4919_v9  ;;  %v2500_v31 = vsub.f32 %v4939_v35, %v6144_v46  ;;  %v5005_v63 = vsub.f32 %v2414_v12, %v4971_v28  ;;  %v6141_v4 = vand.u32 4294901760, %v4969_v10  ;;  %v2404_v18 = vmul.f32 %v4334_v8, %v2365_v49 }
 0x1cd   : > { %v1387_v44 = vadd.f32 %v1386_v47, %v6370_v48  ;;  %v1485_v1 = vadd.f32 %v1484_v25, %v1382_v52  ;;  %2449 = vmatpush.msrb.mxu0 %v4941_v16  ;;  %2594 = vmatpush.msrb.mxu2 %v4955_v19  ;;  %v5015_v34 = vand.u32 4294901760, %v2408_v5  ;;  %v2495_v12 = vand.u32 4294901760, %v2494_v39 }
 0x1ce   : > { %2490 = vmatpush.msrb.mxu1 %v2489_v45  ;;  %2645 = vmatpush.msrb.mxu3 %v4941_v16  ;;  %v2506_v41 = vsub.f32 %v4955_v19, %v6143_v53  ;;  %v5023_v0 = vsub.f32 %v4930_v20, %v4982_v17  ;;  %v6140_v52 = vand.u32 4294901760, %v4979_v57  ;;  %v2402_v58 = vmul.f32 %v4334_v8, %v2363_v50 }
 0x1cf   : > { %v1594_v60 = vadd.f32 %v1593_v14, %v1485_v1  ;;  %2451 = vmatpush.msrb.mxu0 %v4948_v38  ;;  %2597 = vmatpush.msrb.mxu2 %v4969_v10  ;;  %v5029_v59 = vand.u32 4294901760, %v2406_v51  ;;  %v5031_v54 = vand.u32 4294901760, %v2430_v29  ;;  %v2501_v23 = vand.u32 4294901760, %v2500_v31  ;;  %v6375_v14 = vld [vmem:[#allocation8_spill] sm:$0xff] }
 0x1d0   : > { %2496 = vmatpush.msrb.mxu1 %v2495_v12  ;;  %2647 = vmatpush.msrb.mxu3 %v4948_v38  ;;  %v2512_v20 = vsub.f32 %v4969_v10, %v6141_v4  ;;  %v5038_v32 = vsub.f32 %v2410_v33, %v4998_v2  ;;  %v6139_v49 = vand.u32 4294901760, %v5005_v63  ;;  %v2400_v15 = vmul.f32 %v4334_v8, %v2361_v37 }
 0x1d1   : > { %6371 = vst [vmem:[#allocation24_spill] sm:$0xff] %v5031_v54  ;;  %v5042_v39 = vadd.f32 %v1674_v61, %v1594_v60  ;;  %2453 = vmatpush.msrb.mxu0 %v4971_v28  ;;  %2600 = vmatpush.msrb.mxu2 %v4979_v57  ;;  %v5046_v27 = vand.u32 4294901760, %v2404_v18  ;;  %v2507_v3 = vand.u32 4294901760, %v2506_v41  ;;  %v2518_v33 = vsub.f32 %v4979_v57, %v6140_v52  ;;  %v6379_v52 = vld [vmem:[#allocation10_spill] sm:$0xff] }
 0x1d2   : > { %2502 = vmatpush.msrb.mxu1 %v2501_v23  ;;  %2649 = vmatpush.msrb.mxu3 %v4971_v28  ;;  %v5053_v43 = vsub.f32 %v2408_v5, %v5015_v34  ;;  %v6136_v37 = vand.u32 4294901760, %v5023_v0  ;;  %v2398_v50 = vmul.f32 %v4334_v8, %v6373_v26  ;;  %v5060_v47 = vand.u32 4294901760, %v2402_v58  ;;  %v1391_v45 = vpop.f32.mrf.mxu0  ;;  %v1490_v12 = vpop.f32.mrf.mxu1 }
 0x1d3   : > { %6372 = vst [vmem:[#allocation30_spill] sm:$0xff] %v5042_v39  ;;  %2455 = vmatpush.msrb.mxu0 %v4982_v17  ;;  %2603 = vmatpush.msrb.mxu2 %v5005_v63  ;;  %v5063_v25 = vsub.f32 %v2430_v29, %v5031_v54  ;;  %v2513_v5 = vand.u32 4294901760, %v2512_v20  ;;  %v2524_v31 = vsub.f32 %v5005_v63, %v6139_v49  ;;  %v6138_v1 = vand.u32 4294901760, %v5038_v32  ;;  %v1597_v29 = vpop.f32.mrf.mxu2  ;;  %v1678_v20 = vpop.f32.mrf.mxu3  ;;  %v6378_v49 = vld [vmem:[#allocation35_spill] sm:$0xff] }
 0x1d4   : > { %2508 = vmatpush.msrb.mxu1 %v2507_v3  ;;  %2651 = vmatpush.msrb.mxu3 %v4982_v17  ;;  %v5070_v48 = vsub.f32 %v2406_v51, %v5029_v59  ;;  %v1392_v61 = vadd.f32 %v1391_v45, %v6375_v14  ;;  %v5077_v41 = vsub.f32 %v2404_v18, %v5046_v27  ;;  %v5079_v60 = vand.u32 4294901760, %v2400_v15 }
 0x1d5   : > { %6374 = vst [vmem:[#allocation41_spill] sm:$0xff] %v5063_v25  ;;  %2457 = vmatpush.msrb.mxu0 %v4998_v2  ;;  %2606 = vmatpush.msrb.mxu2 %v5023_v0  ;;  %v1491_v23 = vadd.f32 %v1490_v12, %v1387_v44  ;;  %v2519_v51 = vand.u32 4294901760, %v2518_v33  ;;  %v2530_v3 = vsub.f32 %v5023_v0, %v6136_v37  ;;  %v6137_v26 = vand.u32 4294901760, %v5053_v43 }
 0x1d6   : > { %2514 = vmatpush.msrb.mxu1 %v2513_v5  ;;  %2653 = vmatpush.msrb.mxu3 %v4998_v2  ;;  %v5089_v18 = vsub.f32 %v2402_v58, %v5060_v47  ;;  %v5091_v45 = vand.u32 4294901760, %v2398_v50  ;;  %v5094_v44 = vand.u32 4294901760, %v5063_v25  ;;  %v2525_v5 = vand.u32 4294901760, %v2524_v31 }
 0x1d7   : > { %2459 = vmatpush.msrb.mxu0 %v5015_v34  ;;  %2609 = vmatpush.msrb.mxu2 %v5038_v32  ;;  %v1598_v33 = vadd.f32 %v1597_v29, %v1491_v23  ;;  %v2536_v14 = vsub.f32 %v5038_v32, %v6138_v1  ;;  %v6142_v12 = vand.u32 4294901760, %v5070_v48  ;;  %v5104_v58 = vsub.f32 %v2400_v15, %v5079_v60 }
 0x1d8   : > { %6376 = vst [vmem:[#allocation45_spill] sm:$0xff] %v5094_v44  ;;  %2520 = vmatpush.msrb.mxu1 %v2519_v51  ;;  %2655 = vmatpush.msrb.mxu3 %v5015_v34  ;;  %v2531_v29 = vand.u32 4294901760, %v2530_v3  ;;  %v2542_v31 = vsub.f32 %v5053_v43, %v6137_v26  ;;  %v2553_v23 = vand.u32 4294901760, %v5077_v41  ;;  %v2473_v15 = vsub.f32 %v5063_v25, %v5094_v44 }
 0x1d9   : > { %2461 = vmatpush.msrb.mxu0 %v5029_v59  ;;  %2612 = vmatpush.msrb.mxu2 %v5053_v43  ;;  %v5106_v37 = vadd.f32 %v1678_v20, %v1598_v33  ;;  %v2537_v20 = vand.u32 4294901760, %v2536_v14  ;;  %v2548_v3 = vsub.f32 %v5070_v48, %v6142_v12  ;;  %v5122_v33 = vsub.f32 %v2398_v50, %v5091_v45 }
 0x1da   : > { %2526 = vmatpush.msrb.mxu1 %v2525_v5  ;;  %2657 = vmatpush.msrb.mxu3 %v5029_v59  ;;  %v1396_v51 = vpop.f32.mrf.mxu0  ;;  %v6145_v5 = vand.u32 4294901760, %v5089_v18  ;;  %v1496_v26 = vpop.f32.mrf.mxu1  ;;  %v1178_v14 = vadd.f32 %v6379_v52, %v6378_v49  ;;  %v2543_v12 = vand.u32 4294901760, %v2542_v31  ;;  %v2554_v53 = vsub.f32 %v5077_v41, %v2553_v23 }
 0x1db   : > { %6377 = vst [vmem:[#allocation26_spill] sm:$0xff] %v5106_v37  ;;  %2463 = vmatpush.msrb.mxu0 %v5046_v27  ;;  %2615 = vmatpush.msrb.mxu2 %v5070_v48  ;;  %v1601_v1 = vpop.f32.mrf.mxu2  ;;  %v1497_v4 = vadd.f32 %v1496_v26, %v1392_v61  ;;  %v1682_v50 = vpop.f32.mrf.mxu3  ;;  %v5136_v46 = vand.u32 4294901760, %v2473_v15  ;;  %v2549_v52 = vand.u32 4294901760, %v2548_v3  ;;  %v2571_v61 = vand.u32 4294901760, %v5122_v33  ;;  %v6381_v26 = vld [vmem:[#allocation13_spill] sm:$0xff] }
 0x1dc   : > { %2532 = vmatpush.msrb.mxu1 %v2531_v29  ;;  %2659 = vmatpush.msrb.mxu3 %v5046_v27  ;;  %v2565_v29 = vand.u32 4294901760, %v5104_v58  ;;  %v2560_v49 = vsub.f32 %v5089_v18, %v6145_v5  ;;  %v1303_v31 = vadd.f32 %v6381_v26, %v1178_v14  ;;  %v6387_v42 = vand.u32 4294901760, %v4955_v19  ;;  %v6390_v19 = vld [vmem:[#allocation34_spill] sm:$0xff] }
 0x1dd   : > { %2465 = vmatpush.msrb.mxu0 %v5060_v47  ;;  %2618 = vmatpush.msrb.mxu2 %v5077_v41  ;;  %6380 = vst [vmem:[#allocation43_spill] sm:$0xff] %v5136_v46 }
 0x1de   : > { %2538 = vmatpush.msrb.mxu1 %v2537_v20  ;;  %2661 = vmatpush.msrb.mxu3 %v5060_v47  ;;  %v1602_v20 = vadd.f32 %v1601_v1, %v1497_v4  ;;  %v2566_v15 = vsub.f32 %v5104_v58, %v2565_v29  ;;  %v1397_v3 = vadd.f32 %v1396_v51, %v1303_v31  ;;  %v2561_v1 = vand.u32 4294901760, %v2560_v49  ;;  %v6384_v31 = vld [vmem:[#allocation46_spill] sm:$0xff] }
 0x1df   : > { %2467 = vmatpush.msrb.mxu0 %v5079_v60  ;;  %2621 = vmatpush.msrb.mxu2 %v5089_v18  ;;  %v6383_v49 = vand.u32 4294901760, %v4939_v35 }
 0x1e0   : > { %2544 = vmatpush.msrb.mxu1 %v2543_v12  ;;  %2663 = vmatpush.msrb.mxu3 %v5079_v60  ;;  %v2555_v12 = vand.u32 4294901760, %v2554_v53  ;;  %v5152_v5 = vadd.f32 %v1682_v50, %v1602_v20  ;;  %v2572_v53 = vsub.f32 %v5122_v33, %v2571_v61  ;;  %v2567_v13 = vand.u32 4294901760, %v2566_v15  ;;  %v6385_v20 = vld [vmem:[#allocation4_spill] sm:$0xff] }
 0x1e1   : > { %2469 = vmatpush.msrb.mxu0 %v5091_v45  ;;  %2624 = vmatpush.msrb.mxu2 %v5104_v58  ;;  %v6388_v15 = vand.u32 4294901760, %v4969_v10  ;;  %v6393_v10 = vand.u32 4294901760, %v5023_v0 }
 0x1e2   : > { %2550 = vmatpush.msrb.mxu1 %v2549_v52  ;;  %2665 = vmatpush.msrb.mxu3 %v5091_v45  ;;  %6382 = vst [vmem:[#allocation19_spill] sm:$0xff] %v5152_v5  ;;  %v1401_v4 = vpop.f32.mrf.mxu0  ;;  %v1502_v14 = vpop.f32.mrf.mxu1  ;;  %v2573_v50 = vand.u32 4294901760, %v2572_v53  ;;  %v6389_v53 = vand.u32 4294901760, %v4979_v57  ;;  %v6394_v57 = vld [vmem:[#allocation16_spill] sm:$0xff] }
 0x1e3   : > { %2475 = vmatmul.f32.vlgmr.msrb.gmra.mxu0 %v5136_v46  ;;  %2627 = vmatpush.msrb.mxu2 %v5122_v33  ;;  %v1605_v52 = vpop.f32.mrf.mxu2  ;;  %v1503_v26 = vadd.f32 %v1502_v14, %v1397_v3  ;;  %v6391_v14 = vld [vmem:[#allocation17_spill] sm:$0xff] }
 0x1e4   : > { %2676 = vmatpush.msra.mxu0 %v2481_v55  ;;  %2556 = vmatpush.msrb.mxu1 %v2555_v12  ;;  %v1686_v55 = vpop.f32.mrf.mxu3  ;;  %v1720_v12 = vmul.f32 %v6385_v20, %v6384_v31 }
 0x1e5   : > { %2630 = vmatmul.f32.vlgmr.msrb.gmra.mxu2 %v5063_v25  ;;  %2669 = vmatmul.f32.vlgmr.msrb.gmra.mxu3 %v5094_v44  ;;  %v1606_v51 = vadd.f32 %v1605_v52, %v1503_v26  ;;  %v1186_v52 = vadd.f32 %v6391_v14, %v6390_v19  ;;  %v6392_v26 = vand.u32 4294901760, %v5005_v63  ;;  %v6396_v63 = vld [vmem:[#allocation18_spill] sm:$0xff] }
 0x1e6   : > { %2680 = vmatpush.msra.mxu0 %v2487_v6  ;;  %2562 = vmatpush.msrb.mxu1 %v2561_v1  ;;  %v3221_v1 = vmul.f32 -1.442695, %v1720_v12 }
 0x1e7   : > { %v5169_v3 = vadd.f32 %v1686_v55, %v1606_v51 }
 0x1e8   : > { %2684 = vmatpush.msra.mxu0 %v2493_v22  ;;  %2568 = vmatpush.msrb.mxu1 %v2567_v13  ;;  %3350 = vpow2.f32 %v3221_v1  ;;  %v1307_v13 = vadd.f32 %v6394_v57, %v1186_v52  ;;  %v6399_v52 = vld [vmem:[#allocation21_spill] sm:$0xff] }
 0x1e9   : > { %6386 = vst [vmem:[#allocation20_spill] sm:$0xff] %v5169_v3 }
 0x1ea   : > { %2688 = vmatpush.msra.mxu0 %v6383_v49  ;;  %2574 = vmatpush.msrb.mxu1 %v2573_v50  ;;  %v1406_v40 = vpop.f32.mrf.mxu0  ;;  %v1508_v6 = vpop.f32.mrf.mxu1  ;;  %v6395_v49 = vld [vmem:[#allocation32_spill] sm:$0xff] }
 0x1eb   : > { %2576 = vmatmul.f32.vlgmr.msrb.gmra.mxu1 %v5031_v54  ;;  %v1609_v22 = vpop.f32.mrf.mxu2  ;;  %v1194_v12 = vadd.f32 %v6396_v63, %v6395_v49 }
 0x1ec   : > { %2692 = vmatpush.msra.mxu0 %v6387_v42  ;;  %2743 = vmatpush.msra.mxu1 %v4916_v30  ;;  %v5178_v35 = vpop.f32.mrf.mxu3  ;;  %v1722_v30 = vmul.f32 %v6385_v20, %v4768_v62  ;;  %v6397_v42 = vand.u32 4294901760, %v5038_v32  ;;  %v1730_v32 = vmul.f32 %v6385_v20, %v5042_v39 }
 0x1ee   : > { %2696 = vmatpush.msra.mxu0 %v6388_v15  ;;  %2745 = vmatpush.msra.mxu1 %v4855_v24  ;;  %v1724_v24 = vmul.f32 %v6385_v20, %v4829_v56  ;;  %v3223_v55 = vmul.f32 -1.442695, %v1722_v30  ;;  %v1402_v15 = vadd.f32 %v1401_v4, %v1307_v13  ;;  %v3351_v19 = vpop.eup %3350 }
 0x1f0   : > { %2700 = vmatpush.msra.mxu0 %v6389_v53  ;;  %2747 = vmatpush.msra.mxu1 %v4877_v7  ;;  %v3225_v1 = vmul.f32 -1.442695, %v1724_v24  ;;  %v6398_v53 = vand.u32 4294901760, %v5053_v43  ;;  %3352 = vpow2.f32 %v3223_v55  ;;  %v1509_v14 = vadd.f32 %v1508_v6, %v1402_v15 }
 0x1f1   : > { %v1732_v43 = vmul.f32 %v6385_v20, %v5106_v37  ;;  %v5218_v24 = vadd.f32 1.0, %v3351_v19 }
 0x1f2   : > { %2704 = vmatpush.msra.mxu0 %v6392_v26  ;;  %2749 = vmatpush.msra.mxu1 %v4898_v11  ;;  %v1411_v7 = vpop.f32.mrf.mxu0  ;;  %v1514_v51 = vpop.f32.mrf.mxu1  ;;  %v1726_v11 = vmul.f32 %v6385_v20, %v4921_v36  ;;  %v6400_v26 = vand.u32 4294901760, %v5070_v48  ;;  %3354 = vpow2.f32 %v3225_v1  ;;  %v3231_v48 = vmul.f32 -1.442695, %v1730_v32 }
 0x1f3   : > { %v1613_v50 = vpop.f32.mrf.mxu2  ;;  %6401 = vst [vmem:[#allocation39_spill] sm:$0xff] %v5218_v24  ;;  %v1610_v13 = vadd.f32 %v1609_v22, %v1509_v14  ;;  %v3233_v41 = vmul.f32 -1.442695, %v1732_v43  ;;  %vm1899_vm13 = vweird.f32 %v5218_v24 }
 0x1f4   : > { %2708 = vmatpush.msra.mxu0 %v6393_v10  ;;  %2751 = vmatpush.msra.mxu1 %v4919_v9  ;;  %v5203_v0 = vpop.f32.mrf.mxu3  ;;  %v1728_v9 = vmul.f32 %v6385_v20, %v4984_v21  ;;  %v3227_v30 = vmul.f32 -1.442695, %v1726_v11  ;;  %v6402_v10 = vld [vmem:[#allocation23_spill] sm:$0xff] }
 0x1f5   : > { %v1412_v57 = vadd.f32 %v1411_v7, %v6402_v10 }
 0x1f6   : > { %2712 = vmatpush.msra.mxu0 %v6397_v42  ;;  %2753 = vmatpush.msra.mxu1 %v4941_v16  ;;  %v1311_v16 = vadd.f32 %v6399_v52, %v1194_v12  ;;  %v3229_v4 = vmul.f32 -1.442695, %v1728_v9  ;;  %3356 = vpow2.f32 %v3227_v30  ;;  %v6403_v12 = vand.u32 4294901760, %v5089_v18  ;;  %v3353_v7 = vpop.eup %3352 }
 0x1f7   : > { %v5234_v18 = vadd.f32 %v5178_v35, %v1610_v13  ;;  %v5236_v22 = vadd.f32 1.0, %v3353_v7  ;;  %v6404_v35 = vld [vmem:[#allocation25_spill] sm:$0xff] }
 0x1f8   : > { %2716 = vmatpush.msra.mxu0 %v6398_v53  ;;  %2755 = vmatpush.msra.mxu1 %v4948_v38  ;;  %v1407_v38 = vadd.f32 %v1406_v40, %v1311_v16  ;;  %3358 = vpow2.f32 %v3229_v4 }
 0x1f9   : > { %3360 = vrcp.f32 %v5218_v24  ;;  %v1738_v33 = vmul.f32 %v6385_v20, %v5234_v18 }
 0x1fa   : > { %2720 = vmatpush.msra.mxu0 %v6400_v26  ;;  %2757 = vmatpush.msra.mxu1 %v4971_v28  ;;  %v1416_v6 = vpop.f32.mrf.mxu0  ;;  %v1520_v55 = vpop.f32.mrf.mxu1  ;;  %v1515_v49 = vadd.f32 %v1514_v51, %v1407_v38  ;;  %3362 = vpow2.f32 %v3231_v48  ;;  %v1734_v51 = vmul.f32 %v6385_v20, %v5152_v5  ;;  %v6406_v48 = vld [vmem:[#allocation28_spill] sm:$0xff] }
 0x1fb   : > { %v1617_v28 = vpop.f32.mrf.mxu2  ;;  %v1521_v63 = vadd.f32 %v1520_v55, %v1412_v57  ;;  %3364 = vpow2.f32 %v3233_v41  ;;  %v1417_v42 = vadd.f32 %v1416_v6, %v6404_v35 }
 0x1fc   : > { %2724 = vmatpush.msra.mxu0 %v2553_v23  ;;  %2759 = vmatpush.msra.mxu1 %v4982_v17  ;;  %v1698_v40 = vpop.f32.mrf.mxu3  ;;  %v1736_v17 = vmul.f32 %v6385_v20, %v5169_v3  ;;  %v1614_v11 = vadd.f32 %v1613_v50, %v1515_v49  ;;  %3366 = vrcp.f32 %v5236_v22  ;;  %v3235_v53 = vmul.f32 -1.442695, %v1734_v51 }
 0x1fd   : > { %v1618_v23 = vadd.f32 %v1617_v28, %v1521_v63 }
 0x1fe   : > { %2728 = vmatpush.msra.mxu0 %v6403_v12  ;;  %2761 = vmatpush.msra.mxu1 %v4998_v2  ;;  %v3355_v2 = vpop.eup %3354  ;;  %v5256_v19 = vadd.f32 %v5203_v0, %v1614_v11  ;;  %v1905_v11 = vand.u32 2147483648, %v5218_v24 }
 0x1ff   : > { %v5243_v58 = vadd.f32 %v1698_v40, %v1618_v23  ;;  %v5248_v1 = vadd.f32 1.0, %v3355_v2 }
 0x200   : > { %2732 = vmatpush.msra.mxu0 %v2565_v29  ;;  %2763 = vmatpush.msra.mxu1 %v5015_v34  ;;  %v3357_v34 = vpop.eup %3356  ;;  %v3237_v29 = vmul.f32 -1.442695, %v1736_v17  ;;  %v1740_v38 = vmul.f32 %v6385_v20, %v5256_v19 }
 0x201   : > { %v3359_v15 = vpop.eup %3358  ;;  %v5259_v52 = vadd.f32 1.0, %v3357_v34  ;;  %v1742_v16 = vmul.f32 %v6385_v20, %v5243_v58 }
 0x202   : > { %2736 = vmatpush.msra.mxu0 %v2571_v61  ;;  %2765 = vmatpush.msra.mxu1 %v5029_v59  ;;  %v1421_v9 = vpop.f32.mrf.mxu0  ;;  %v1526_v61 = vpop.f32.mrf.mxu1  ;;  %v5263_v30 = vadd.f32 1.0, %v3359_v15  ;;  %3368 = vpow2.f32 %v3237_v29  ;;  %v3241_v12 = vmul.f32 -1.442695, %v1740_v38 }
 0x203   : > { %2738 = vmatmul.f32.vlgmr.msra.gmra.mxu0 %v5031_v54  ;;  %v1621_v59 = vpop.f32.mrf.mxu2  ;;  %v5252_v50 = vpop.eup %3360  ;;  %v1527_v32 = vadd.f32 %v1526_v61, %v1417_v42  ;;  %3370 = vrcp.f32 %v5248_v1  ;;  %v1422_v13 = vadd.f32 %v1421_v9, %v6406_v48 }
 0x204   : > { %2767 = vmatpush.msra.mxu1 %v5046_v27  ;;  %6405 = vst [vmem:[#allocation31_spill] sm:$0xff] %v5252_v50  ;;  %v1702_v27 = vpop.f32.mrf.mxu3  ;;  %v3363_v14 = vpop.eup %3362  ;;  %v1895_v0 = vmul.f32 %v5252_v50, %v5218_v24  ;;  %3372 = vpow2.f32 %v3235_v53  ;;  %vm1900_vm0 = vweird.f32 %v5252_v50 }
 0x205   : > { %v1622_v26 = vadd.f32 %v1621_v59, %v1527_v32  ;;  %v3365_v4 = vpop.eup %3364  ;;  %v5269_v43 = vadd.f32 1.0, %v3363_v14  ;;  %3374 = vrcp.f32 %v5259_v52  ;;  %v1935_v32 = vand.u32 2147483648, %v5236_v22  ;;  %vm5337_vm3 = vmor %vm1899_vm13, %vm1900_vm0 }
 0x206   : > { %2769 = vmatpush.msra.mxu1 %v5060_v47  ;;  %v3239_v47 = vmul.f32 -1.442695, %v1738_v33  ;;  %v5278_v57 = vpop.eup %3366  ;;  %3376 = vrcp.f32 %v5263_v30  ;;  %v5281_v6 = vadd.f32 1.0, %v3365_v4  ;;  %v1896_v55 = vsub.f32 1.0, %v1895_v0 }
 0x207   : > { %v5273_v10 = vadd.f32 %v1702_v27, %v1622_v26  ;;  %v1925_v17 = vmul.f32 %v5278_v57, %v5236_v22  ;;  %v6408_v26 = vld [vmem:[#allocation42_spill] sm:$0xff] }
 0x208   : > { %2771 = vmatpush.msra.mxu1 %v5079_v60  ;;  %v3243_v60 = vmul.f32 -1.442695, %v1742_v16  ;;  %3378 = vpow2.f32 %v3239_v47  ;;  %v3369_v63 = vpop.eup %3368  ;;  %v1897_v35 = vmul.f32 %v5252_v50, %v1896_v55  ;;  %v5312_v16 = vor.u32 1.1754944e-38, %v1905_v11 }
 0x209   : > { %v1744_v28 = vmul.f32 %v6385_v20, %v5273_v10  ;;  %3380 = vrcp.f32 %v5269_v43  ;;  %v5287_v41 = vpop.eup %3370  ;;  %v5296_v42 = vadd.f32 1.0, %v3369_v63  ;;  %v1926_v53 = vsub.f32 1.0, %v1925_v17 }
 0x20a   : > { %2773 = vmatpush.msra.mxu1 %v5091_v45  ;;  %v1532_v49 = vpop.f32.mrf.mxu1  ;;  %3382 = vpow2.f32 %v3243_v60  ;;  %v1426_v2 = vpop.f32.mrf.mxu0  ;;  %v1955_v15 = vmul.f32 %v5287_v41, %v5248_v1  ;;  %6407 = vst [vmem:[#allocation22_spill] sm:$0xff] %v5312_v16  ;;  %v5318_v38 = vadd.f32 %v5252_v50, %v1897_v35  ;;  %v1965_v60 = vand.u32 2147483648, %v5248_v1 }
 0x20b   : > { %2775 = vmatmul.f32.vlgmr.msra.gmra.mxu1 %v5031_v54  ;;  %v1625_v45 = vpop.f32.mrf.mxu2  ;;  %v1533_v40 = vadd.f32 %v1532_v49, %v1422_v13  ;;  %v3245_v23 = vmul.f32 -1.442695, %v1744_v28  ;;  %v3373_v51 = vpop.eup %3372  ;;  %3384 = vrcp.f32 %v5281_v6  ;;  %v1427_v4 = vadd.f32 %v1426_v2, %v6408_v26 }
 0x20c   : > { %v1706_v7 = vpop.f32.mrf.mxu3  ;;  %v5293_v29 = vpop.eup %3374  ;;  %v5307_v27 = vadd.f32 1.0, %v3373_v51  ;;  %6409 = vst [vmem:[#allocation40_spill] sm:$0xff] %v5318_v38  ;;  %v1956_v49 = vsub.f32 1.0, %v1955_v15  ;;  %v1927_v17 = vmul.f32 %v5278_v57, %v1926_v53  ;;  %v5330_v2 = vor.u32 1.1754944e-38, %v1935_v32 }
 0x20d   : > { %v1626_v34 = vadd.f32 %v1625_v45, %v1533_v40  ;;  %3386 = vpow2.f32 %v3245_v23  ;;  %v5298_v9 = vpop.eup %3376  ;;  %v1985_v48 = vmul.f32 %v5293_v29, %v5259_v52  ;;  %v6412_v11 = vmov 0 }
 0x20e   : > { %3388 = vpow2.f32 %v3241_v12  ;;  %v3379_v61 = vpop.eup %3378  ;;  %6411 = vst [vmem:[#allocation15_spill] sm:$0xff] %v5330_v2  ;;  %v6413_v11 = vsel %vm5337_vm3, 4294967295, %v6412_v11  ;;  %vm2079_vm7 = vweird.f32 %v5281_v6  ;;  %vm2139_vm4 = vweird.f32 %v5296_v42 }
 0x20f   : > { %v5303_v33 = vadd.f32 %v1706_v7, %v1626_v34  ;;  %v5309_v14 = vpop.eup %3380  ;;  %3390 = vrcp.f32 %v5296_v42  ;;  %v5326_v45 = vadd.f32 1.0, %v3379_v61  ;;  %6414 = vst [vmem:[#allocation14_spill] sm:$0xff] %v6413_v11  ;;  %v2015_v34 = vmul.f32 %v5298_v9, %v5263_v30  ;;  %v6417_v61 = vld [vmem:[#allocation33_spill] sm:$0xff] }
 0x210   : > { %v3383_v47 = vpop.eup %3382  ;;  %3392 = vrcp.f32 %v5307_v27  ;;  %v1986_v32 = vsub.f32 1.0, %v1985_v48 }
 0x211   : > { %v1746_v0 = vmul.f32 %v6385_v20, %v5303_v33  ;;  %v5324_v28 = vpop.eup %3384  ;;  %v5343_v35 = vadd.f32 1.0, %v3383_v47  ;;  %v2045_v47 = vmul.f32 %v5309_v14, %v5269_v43  ;;  %vm2169_vm10 = vweird.f32 %v5326_v45 }
 0x212   : > { %v1538_v13 = vpop.f32.mrf.mxu1  ;;  %6410 = vst [vmem:[#allocation38_spill] sm:$0xff] %v5324_v28  ;;  %v2075_v48 = vmul.f32 %v5324_v28, %v5281_v6  ;;  %v1987_v53 = vmul.f32 %v5293_v29, %v1986_v32  ;;  %vm2080_vm2 = vweird.f32 %v5324_v28 }
 0x213   : > { %v1629_v55 = vpop.f32.mrf.mxu2  ;;  %v3247_v63 = vmul.f32 -1.442695, %v1746_v0  ;;  %v1539_v12 = vadd.f32 %v1538_v13, %v1427_v4  ;;  %v3387_v7 = vpop.eup %3386  ;;  %v1957_v0 = vmul.f32 %v5287_v41, %v1956_v49  ;;  %v5353_v13 = vor.u32 1.1754944e-38, %v1965_v60  ;;  %vm5451_vm9 = vmor %vm2079_vm7, %vm2080_vm2 }
 0x214   : > { %v1710_v40 = vpop.f32.mrf.mxu3  ;;  %v3389_v51 = vpop.eup %3388  ;;  %v5350_v26 = vadd.f32 1.0, %v3387_v7  ;;  %v1995_v60 = vand.u32 2147483648, %v5259_v52  ;;  %v2016_v49 = vsub.f32 1.0, %v2015_v34  ;;  %v2046_v44 = vsub.f32 1.0, %v2045_v47 }
 0x215   : > { %3394 = vpow2.f32 %v3247_v63  ;;  %v1630_v15 = vadd.f32 %v1629_v55, %v1539_v12  ;;  %v1431_v4 = vpop.f32.mrf.mxu0  ;;  %6415 = vst [vmem:[#allocation5_spill] sm:$0xff] %v5353_v13  ;;  %v5358_v55 = vpop.eup %3390  ;;  %v5361_v63 = vadd.f32 %v5278_v57, %v1927_v17  ;;  %v5365_v12 = vadd.f32 1.0, %v3389_v51 }
 0x216   : > { %3396 = vrcp.f32 %v5326_v45  ;;  %v1432_v59 = vadd.f32 %v1431_v4, %v6417_v61  ;;  %v5372_v23 = vpop.eup %3392  ;;  %v5380_v34 = vadd.f32 %v5287_v41, %v1957_v0  ;;  %v2135_v61 = vmul.f32 %v5358_v55, %v5296_v42 }
 0x217   : > { %6416 = vst [vmem:[#allocation12_spill] sm:$0xff] %v5361_v63  ;;  %v5367_v7 = vadd.f32 %v1710_v40, %v1630_v15  ;;  %3398 = vrcp.f32 %v5343_v35  ;;  %v2076_v25 = vsub.f32 1.0, %v2075_v48  ;;  %v5389_v31 = vor.u32 1.1754944e-38, %v1995_v60 }
 0x218   : > { %3400 = vrcp.f32 %v5350_v26  ;;  %6418 = vst [vmem:[#allocation11_spill] sm:$0xff] %v5380_v34  ;;  %v2017_v62 = vmul.f32 %v5298_v9, %v2016_v49  ;;  %v2105_v0 = vmul.f32 %v5372_v23, %v5307_v27  ;;  %v5395_v16 = vadd.f32 %v5293_v29, %v1987_v53 }
 0x219   : > { %v1748_v51 = vmul.f32 %v6385_v20, %v5367_v7  ;;  %3402 = vrcp.f32 %v5365_v12  ;;  %6419 = vst [vmem:[#allocation7_spill] sm:$0xff] %v5389_v31  ;;  %v2047_v60 = vmul.f32 %v5309_v14, %v2046_v44  ;;  %v2077_v53 = vmul.f32 %v5324_v28, %v2076_v25 }
 0x21a   : > { %v1544_v40 = vpop.f32.mrf.mxu1  ;;  %6420 = vst [vmem:[#allocation37_spill] sm:$0xff] %v5395_v16  ;;  %v2106_v49 = vsub.f32 1.0, %v2105_v0  ;;  %v2115_v25 = vand.u32 2147483648, %v5307_v27  ;;  %vm2140_vm14 = vweird.f32 %v5358_v55  ;;  %vm2199_vm1 = vweird.f32 %v5365_v12 }
 0x21b   : > { %v1633_v15 = vpop.f32.mrf.mxu2  ;;  %v3395_v54 = vpop.eup %3394  ;;  %v1545_v4 = vadd.f32 %v1544_v40, %v1432_v59  ;;  %v3249_v17 = vmul.f32 -1.442695, %v1748_v51  ;;  %v2136_v40 = vsub.f32 1.0, %v2135_v61  ;;  %v5413_v59 = vadd.f32 %v5298_v9, %v2017_v62  ;;  %vm5475_vm15 = vmor %vm2139_vm4, %vm2140_vm14 }
 0x21c   : > { %v5385_v32 = vadd.f32 1.0, %v3395_v54  ;;  %v5387_v46 = vpop.eup %3396  ;;  %v1714_v56 = vpop.f32.mrf.mxu3  ;;  %v5426_v62 = vadd.f32 %v5309_v14, %v2047_v60  ;;  %v5435_v61 = vadd.f32 %v5324_v28, %v2077_v53  ;;  %v2145_v60 = vand.u32 2147483648, %v5296_v42 }
 0x21d   : > { %v1634_v47 = vadd.f32 %v1633_v15, %v1545_v4  ;;  %v5400_v48 = vpop.eup %3398  ;;  %v2165_v4 = vmul.f32 %v5387_v46, %v5326_v45  ;;  %v5444_v21 = vor.u32 1.1754944e-38, %v2115_v25  ;;  %vm2170_vm6 = vweird.f32 %v5387_v46 }
 0x21e   : > { %3404 = vrcp.f32 %v5385_v32  ;;  %v5405_v15 = vpop.eup %3400  ;;  %v2225_v38 = vmul.f32 %v5400_v48, %v5343_v35  ;;  %6421 = vst [vmem:[#allocation6_spill] sm:$0xff] %v5435_v61  ;;  %vm2229_vm12 = vweird.f32 %v5343_v35  ;;  %vm2230_vm8 = vweird.f32 %v5400_v48 }
 0x21f   : > { %3406 = vpow2.f32 %v3249_v17  ;;  %v5410_v54 = vadd.f32 %v1714_v56, %v1634_v47  ;;  %v5417_v51 = vpop.eup %3402  ;;  %v2137_v17 = vmul.f32 %v5358_v55, %v2136_v40  ;;  %v2255_v0 = vmul.f32 %v5405_v15, %v5350_v26  ;;  %vm5522_vm2 = vmor %vm2229_vm12, %vm2230_vm8 }
 0x220   : > { %v2166_v50 = vsub.f32 1.0, %v2165_v4  ;;  %v2195_v36 = vmul.f32 %v5417_v51, %v5365_v12  ;;  %v2226_v53 = vsub.f32 1.0, %v2225_v38  ;;  %vm2260_vm13 = vweird.f32 %v5405_v15 }
 0x221   : > { %v1750_v56 = vmul.f32 %v6385_v20, %v5410_v54  ;;  %v2107_v20 = vmul.f32 %v5372_v23, %v2106_v49  ;;  %v6422_v49 = vmov 0  ;;  %v5456_v4 = vadd.f32 %v5358_v55, %v2137_v17 }
 0x222   : > { %v6423_v49 = vsel %vm5451_vm9, 4294967295, %v6422_v49  ;;  %v2167_v25 = vmul.f32 %v5387_v46, %v2166_v50  ;;  %v5470_v17 = vor.u32 1.1754944e-38, %v2145_v60  ;;  %v2227_v50 = vmul.f32 %v5400_v48, %v2226_v53 }
 0x223   : > { %v3251_v11 = vmul.f32 -1.442695, %v1750_v56  ;;  %6424 = vst [vmem:[#allocation29_spill] sm:$0xff] %v6423_v49  ;;  %v2256_v56 = vsub.f32 1.0, %v2255_v0  ;;  %v5468_v39 = vadd.f32 %v5372_v23, %v2107_v20  ;;  %v2196_v0 = vsub.f32 1.0, %v2195_v36 }
 0x224   : > { %v5432_v47 = vpop.eup %3404  ;;  %v2205_v53 = vand.u32 2147483648, %v5365_v12  ;;  %v2233_v36 = vand.u32 2147483647, %v5343_v35  ;;  %v2295_v34 = vand.u32 2147483648, %v5385_v32  ;;  %vm2200_vm0 = vweird.f32 %v5417_v51 }
 0x225   : > { %v2285_v40 = vmul.f32 %v5432_v47, %v5385_v32  ;;  %v3407_v2 = vpop.eup %3406  ;;  %3408 = vpow2.f32 %v3251_v11  ;;  %v2143_v11 = vand.u32 2147483647, %v5296_v42  ;;  %v2257_v60 = vmul.f32 %v5405_v15, %v2256_v56 }
 0x226   : > { %v5458_v13 = vadd.f32 1.0, %v3407_v2  ;;  %v2203_v42 = vand.u32 2147483647, %v5365_v12  ;;  %v2228_v56 = vadd.f32 %v5400_v48, %v2227_v50  ;;  %vm2290_vm5 = vweird.f32 %v5432_v47 }
 0x227   : > { %v2286_v44 = vsub.f32 1.0, %v2285_v40  ;;  %v5491_v40 = vadd.f32 %v5387_v46, %v2167_v25  ;;  %v2265_v25 = vand.u32 2147483648, %v5350_v26  ;;  %vm2289_vm14 = vweird.f32 %v5385_v32 }
 0x228   : > { %3410 = vrcp.f32 %v5458_v13  ;;  %vm5514_vm7 = vcmp.eq.f32.partialorder %v2203_v42, 8.507059e+37  ;;  %v2235_v24 = vand.u32 2147483648, %v5343_v35  ;;  %vm2259_vm11 = vweird.f32 %v5350_v26  ;;  %vm5537_vm12 = vmor %vm2289_vm14, %vm2290_vm5 }
 0x229   : > { %v2287_v20 = vmul.f32 %v5432_v47, %v2286_v44  ;;  %v2197_v44 = vmul.f32 %v5417_v51, %v2196_v0  ;;  %v2258_v0 = vadd.f32 %v5405_v15, %v2257_v60  ;;  %v2263_v5 = vand.u32 2147483647, %v5350_v26  ;;  %vm5547_vm4 = vmor %vm2259_vm11, %vm2260_vm13 }
 0x22a   : > { %vm5541_vm8 = vcmp.eq.f32.partialorder %v2233_v36, 8.507059e+37  ;;  %v2266_v35 = vor.u32 1.1754944e-38, %v2265_v25  ;;  %vm2050_vm5 = vweird.f32 %v5309_v14  ;;  %v2232_v36 = vsel %vm5522_vm2, %v5400_v48, %v2228_v56  ;;  %vm5570_vm13 = vmor %vm2199_vm1, %vm2200_vm0 }
 0x22b   : > { %v3409_v38 = vpop.eup %3408  ;;  %v2288_v63 = vadd.f32 %v5432_v47, %v2287_v20  ;;  %v2293_v20 = vand.u32 2147483647, %v5385_v32  ;;  %v2198_v42 = vadd.f32 %v5417_v51, %v2197_v44  ;;  %v2262_v61 = vsel %vm5547_vm4, %v5405_v15, %v2258_v0  ;;  %vm5594_vm4 = vmor %vm2169_vm10, %vm2170_vm6 }
 0x22c   : > { %v5500_v31 = vadd.f32 1.0, %v3409_v38  ;;  %v2296_v28 = vor.u32 1.1754944e-38, %v2295_v34  ;;  %v2325_v49 = vand.u32 2147483648, %v5458_v13  ;;  %vm5562_vm11 = vcmp.eq.f32.partialorder %v2143_v11, 8.507059e+37 }
 0x22d   : > { %v2292_v26 = vsel %vm5537_vm12, %v5432_v47, %v2288_v63  ;;  %vm2294_vm2 = vcmp.eq.f32.partialorder %v2293_v20, 8.507059e+37  ;;  %v2323_v34 = vand.u32 2147483647, %v5458_v13  ;;  %v2202_v12 = vsel %vm5570_vm13, %v5417_v51, %v2198_v42 }
 0x22e   : > { %v5506_v37 = vpop.eup %3410  ;;  %3412 = vrcp.f32 %v5500_v31  ;;  %v2236_v15 = vor.u32 1.1754944e-38, %v2235_v24  ;;  %vm2264_vm1 = vcmp.eq.f32.partialorder %v2263_v5, 8.507059e+37  ;;  %v2297_v47 = vsel %vm2294_vm2, %v2296_v28, %v2292_v26 }
 0x22f   : > { %v2315_v60 = vmul.f32 %v5506_v37, %v5458_v13  ;;  %vm2320_vm14 = vweird.f32 %v5506_v37  ;;  %v6441_v11 = vand.u32 2147483647, %v5307_v27  ;;  %v2267_v0 = vsel %vm2264_vm1, %v2266_v35, %v2262_v61 }
 0x230   : > { %vm2319_vm13 = vweird.f32 %v5458_v13  ;;  %vm2019_vm12 = vweird.f32 %v5263_v30  ;;  %v2172_v24 = vsel %vm5594_vm4, %v5387_v46, %v5491_v40  ;;  %v2206_v28 = vor.u32 1.1754944e-38, %v2205_v53 }
 0x231   : > { %v2316_v3 = vsub.f32 1.0, %v2315_v60  ;;  %vm5586_vm0 = vcmp.eq.f32.partialorder %v6441_v11, 8.507059e+37  ;;  %v2237_v61 = vsel %vm5541_vm8, %v2236_v15, %v2232_v36  ;;  %vm2321_vm6 = vmor %vm2319_vm13, %vm2320_vm14  ;;  %v2326_v13 = vor.u32 1.1754944e-38, %v2325_v49 }
 0x232   : > { %v6446_v50 = vand.u32 2147483647, %v5281_v6  ;;  %v2386_v60 = vmul.f32 %v2297_v47, %v5303_v33  ;;  %vm2324_vm1 = vcmp.eq.f32.partialorder %v2323_v34, 8.507059e+37  ;;  %v2207_v40 = vsel %vm5514_vm7, %v2206_v28, %v2202_v12 }
 0x233   : > { %v2317_v63 = vmul.f32 %v5506_v37, %v2316_v3  ;;  %v2384_v49 = vmul.f32 %v2267_v0, %v5273_v10  ;;  %v2355_v32 = vand.u32 2147483648, %v5500_v31  ;;  %v6449_v44 = vand.u32 2147483647, %v5269_v43 }
 0x234   : > { %v5577_v48 = vpop.eup %3412  ;;  %vm5614_vm10 = vcmp.eq.f32.partialorder %v6446_v50, 8.507059e+37  ;;  %vm6452_vm13 = vweird.f32 %v5372_v23  ;;  %v2353_v35 = vand.u32 2147483647, %v5500_v31  ;;  %v6456_v26 = vand.u32 2147483647, %v5326_v45  ;;  %v6510_v50 = vld [vmem:[#allocation15_spill] sm:$0xff] }
 0x235   : > { %v2318_v51 = vadd.f32 %v5506_v37, %v2317_v63  ;;  %v2345_v5 = vmul.f32 %v5577_v48, %v5500_v31  ;;  %vm5628_vm14 = vcmp.eq.f32.partialorder %v6449_v44, 8.507059e+37  ;;  %vm2350_vm7 = vweird.f32 %v5577_v48  ;;  %v6488_v44 = vld [vmem:[#allocation37_spill] sm:$0xff] }
 0x236   : > { %v2382_v16 = vmul.f32 %v2237_v61, %v5243_v58  ;;  %v6458_v63 = vand.u32 2147483647, %v5263_v30  ;;  %v2425_v12 = vmul.f32 %v4334_v8, %v2386_v60  ;;  %v6461_v58 = vsel %vm5475_vm15, %v5358_v55, %v5456_v4  ;;  %v6477_v60 = vld [vmem:[#allocation38_spill] sm:$0xff]  ;;  %v6506_v55 = vld [vmem:[#allocation7_spill] sm:$0xff] }
 0x237   : > { %v2322_v42 = vsel %vm2321_vm6, %v5506_v37, %v2318_v51  ;;  %v2346_v46 = vsub.f32 1.0, %v2345_v5  ;;  %vm6453_vm6 = vweird.f32 %v5307_v27  ;;  %v2380_v47 = vmul.f32 %v2207_v40, %v5256_v19  ;;  %v6480_v40 = vld [vmem:[#allocation20_spill] sm:$0xff] }
 0x238   : > { %v2327_v53 = vsel %vm2324_vm1, %v2326_v13, %v2322_v42  ;;  %vm5636_vm4 = vmor %vm6453_vm6, %vm6452_vm13  ;;  %vm2174_vm13 = vcmp.eq.f32.partialorder %v6456_v26, 8.507059e+37  ;;  %vm5657_vm6 = vcmp.eq.f32.partialorder %v6458_v63, 8.507059e+37  ;;  %v2356_v11 = vor.u32 1.1754944e-38, %v2355_v32  ;;  %v6478_v42 = vld [vmem:[#allocation6_spill] sm:$0xff]  ;;  %v6491_v26 = vld [vmem:[#allocation39_spill] sm:$0xff] }
 0x239   : > { %v2388_v38 = vmul.f32 %v2327_v53, %v5367_v7  ;;  %v2347_v10 = vmul.f32 %v5577_v48, %v2346_v46  ;;  %v2112_v27 = vsel %vm5636_vm4, %v5372_v23, %v5468_v39  ;;  %v6457_v7 = vand.u32 2147483648, %v5326_v45 }
 0x23a   : > { %vm2349_vm4 = vweird.f32 %v5500_v31  ;;  %v2147_v45 = vsel %vm5562_vm11, %v5470_v17, %v6461_v58  ;;  %v6462_v31 = vand.u32 2147483647, %v5259_v52  ;;  %vm6465_vm15 = vweird.f32 %v5269_v43  ;;  %v6500_v58 = vld [vmem:[#allocation26_spill] sm:$0xff] }
 0x23b   : > { %v2176_v36 = vor.u32 1.1754944e-38, %v6457_v7  ;;  %v2427_v15 = vmul.f32 %v4334_v8, %v2388_v38  ;;  %v2348_v39 = vadd.f32 %v5577_v48, %v2347_v10  ;;  %vm2351_vm8 = vmor %vm2349_vm4, %vm2350_vm7  ;;  %v2423_v19 = vmul.f32 %v4334_v8, %v2384_v49 }
 0x23c   : > { %vm5679_vm2 = vcmp.eq.f32.partialorder %v6462_v31, 8.507059e+37  ;;  %vm5687_vm1 = vmor %vm6465_vm15, %vm2050_vm5  ;;  %vm2354_vm11 = vcmp.eq.f32.partialorder %v2353_v35, 8.507059e+37  ;;  %v6468_v25 = vand.u32 2147483648, %v5281_v6  ;;  %v2117_v51 = vsel %vm5586_vm0, %v5444_v21, %v2112_v27  ;;  %v6490_v35 = vld [vmem:[#allocation19_spill] sm:$0xff]  ;;  %v6505_v31 = vld [vmem:[#allocation12_spill] sm:$0xff] }
 0x23d   : > { %v2177_v23 = vsel %vm2174_vm13, %v2176_v36, %v2172_v24  ;;  %v5692_v4 = vand.u32 4294901760, %v2427_v15  ;;  %v2352_v17 = vsel %vm2351_vm8, %v5577_v48, %v2348_v39  ;;  %v2052_v2 = vsel %vm5687_vm1, %v5309_v14, %v5426_v62  ;;  %v6509_v14 = vld [vmem:[#allocation44_spill] sm:$0xff] }
 0x23e   : > { %v2086_v0 = vor.u32 1.1754944e-38, %v6468_v25  ;;  %v2357_v5 = vsel %vm2354_vm11, %v2356_v11, %v2352_v17  ;;  %v6469_v24 = vand.u32 2147483647, %v5248_v1  ;;  %vm6472_vm8 = vweird.f32 %v5298_v9 }
 0x23f   : > { %vm5714_vm7 = vmor %vm2019_vm12, %vm6472_vm8  ;;  %v2378_v6 = vmul.f32 %v2177_v23, %v5234_v18  ;;  %v2421_v62 = vmul.f32 %v4334_v8, %v2382_v16  ;;  %v5720_v21 = vand.u32 4294901760, %v2425_v12  ;;  %v2390_v48 = vmul.f32 %v2357_v5, %v5410_v54 }
 0x240   : > { %vm5706_vm5 = vcmp.eq.f32.partialorder %v6469_v24, 8.507059e+37  ;;  %v2022_v3 = vsel %vm5714_vm7, %v5298_v9, %v5413_v59  ;;  %v6475_v61 = vand.u32 2147483648, %v5269_v43  ;;  %v6479_v46 = vsel %vm5451_vm9, %v6477_v60, %v6478_v42  ;;  %v6508_v24 = vld [vmem:[#allocation5_spill] sm:$0xff]  ;;  %v6511_v42 = vld [vmem:[#allocation36_spill] sm:$0xff] }
 0x241   : > { %v2087_v18 = vsel %vm5614_vm10, %v2086_v0, %v6479_v46  ;;  %v2376_v49 = vmul.f32 %v2147_v45, %v6480_v40  ;;  %v6481_v54 = vand.u32 2147483647, %v5236_v22  ;;  %vm6484_vm0 = vweird.f32 %v5293_v29 }
 0x242   : > { %v2056_v13 = vor.u32 1.1754944e-38, %v6475_v61  ;;  %vm6485_vm1 = vweird.f32 %v5259_v52  ;;  %v2419_v9 = vmul.f32 %v4334_v8, %v2380_v47  ;;  %v5752_v59 = vand.u32 4294901760, %v2423_v19 }
 0x243   : > { %vm5739_vm12 = vcmp.eq.f32.partialorder %v6481_v54, 8.507059e+37  ;;  %vm5747_vm13 = vmor %vm6485_vm1, %vm6484_vm0  ;;  %v2429_v20 = vmul.f32 %v4334_v8, %v2390_v48  ;;  %v5756_v32 = vsub.f32 %v2427_v15, %v5692_v4  ;;  %v6489_v52 = vand.u32 2147483648, %v5263_v30  ;;  %v6499_v15 = vld [vmem:[#allocation11_spill] sm:$0xff] }
 0x244   : > { %v1992_v37 = vsel %vm5747_vm13, %v5293_v29, %v6488_v44  ;;  %v2057_v10 = vsel %vm5628_vm14, %v2056_v13, %v2052_v2  ;;  %v2374_v27 = vmul.f32 %v2117_v51, %v6490_v35  ;;  %v6492_v7 = vand.u32 2147483647, %v6491_v26  ;;  %v6507_v2 = vld [vmem:[#allocation30_spill] sm:$0xff]  ;;  %v6514_v44 = vld [vmem:[#allocation40_spill] sm:$0xff] }
 0x245   : > { %v2026_v38 = vor.u32 1.1754944e-38, %v6489_v52  ;;  %vm6495_vm10 = vweird.f32 %v5287_v41  ;;  %vm6496_vm4 = vweird.f32 %v5248_v1  ;;  %v2417_v30 = vmul.f32 %v4334_v8, %v2378_v6  ;;  %v6516_v52 = vld [vmem:[#allocation22_spill] sm:$0xff] }
 0x246   : > { %vm5769_vm9 = vcmp.eq.f32.partialorder %v6492_v7, 8.507059e+37  ;;  %vm5777_vm15 = vmor %vm6496_vm4, %vm6495_vm10  ;;  %v5782_v33 = vand.u32 4294901760, %v2421_v62  ;;  %v5784_v16 = vand.u32 4294901760, %v2429_v20  ;;  %v5787_v63 = vsub.f32 %v2425_v12, %v5720_v21 }
 0x247   : > { %v1962_v39 = vsel %vm5777_vm15, %v5287_v41, %v6499_v15  ;;  %v2027_v1 = vsel %vm5657_vm6, %v2026_v38, %v2022_v3  ;;  %v2372_v45 = vmul.f32 %v2087_v18, %v6500_v58  ;;  %v2415_v23 = vmul.f32 %v4334_v8, %v2376_v49  ;;  %v6518_v15 = vld [vmem:[#allocation47_spill] sm:$0xff] }
 0x248   : > { %vm6501_vm14 = vweird.f32 %v5278_v57  ;;  %vm6502_vm11 = vweird.f32 %v5236_v22  ;;  %v5805_v12 = vand.u32 4294901760, %v2419_v9  ;;  %v5808_v11 = vsub.f32 %v2429_v20, %v5784_v16  ;;  %2780 = vmatpush.msra.mxu2 %v5784_v16  ;;  %2976 = vmatpush.msrb.mxu1 %v5784_v16  ;;  %v6513_v20 = vld [vmem:[#allocation31_spill] sm:$0xff] }
 0x249   : > { %vm5801_vm8 = vmor %vm6502_vm11, %vm6501_vm14  ;;  %v5813_v41 = vsub.f32 %v2423_v19, %v5752_v59  ;;  %v2828_v34 = vand.u32 4294901760, %v5756_v32  ;;  %v1997_v17 = vsel %vm5679_vm2, %v6506_v55, %v1992_v37  ;;  %v2370_v25 = vmul.f32 %v2057_v10, %v6507_v2  ;;  %v6517_v10 = vld [vmem:[#allocation48_spill] sm:$0xff] }
 0x24a   : > { %v1932_v22 = vsel %vm5801_vm8, %v5278_v57, %v6505_v31  ;;  %v2413_v0 = vmul.f32 %v4334_v8, %v2374_v27  ;;  %v5825_v51 = vand.u32 4294901760, %v2417_v30  ;;  %2782 = vmatpush.msra.mxu2 %v5692_v4  ;;  %2923 = vmatpush.msrb.mxu0 %v5808_v11  ;;  %v2822_v19 = vand.u32 4294901760, %v5808_v11 }
 0x24b   : > { %v5831_v5 = vsub.f32 %v2421_v62, %v5782_v33  ;;  %v2834_v57 = vand.u32 4294901760, %v5787_v63  ;;  %v1967_v56 = vsel %vm5706_vm5, %v6508_v24, %v1962_v39  ;;  %v2368_v6 = vmul.f32 %v2027_v1, %v6509_v14  ;;  %2978 = vmatpush.msrb.mxu1 %v5692_v4 }
 0x24c   : > { %v2411_v48 = vmul.f32 %v4334_v8, %v2372_v45  ;;  %v5839_v3 = vand.u32 4294901760, %v2415_v23  ;;  %2784 = vmatpush.msra.mxu2 %v5720_v21  ;;  %2926 = vmatpush.msrb.mxu0 %v5756_v32  ;;  %v2823_v62 = vsub.f32 %v5808_v11, %v2822_v19  ;;  %v2829_v28 = vsub.f32 %v5756_v32, %v2828_v34  ;;  %v6523_v11 = vld [vmem:[#allocation24_spill] sm:$0xff] }
 0x24d   : > { %v5851_v61 = vsub.f32 %v2419_v9, %v5805_v12  ;;  %v2840_v13 = vand.u32 4294901760, %v5813_v41  ;;  %v1937_v60 = vsel %vm5739_vm12, %v6510_v50, %v1932_v22  ;;  %v2366_v46 = vmul.f32 %v1997_v17, %v6511_v42  ;;  %2980 = vmatpush.msrb.mxu1 %v5720_v21  ;;  %v6519_v22 = vld [vmem:[#allocation46_spill] sm:$0xff] }
 0x24e   : > { %v2409_v18 = vmul.f32 %v4334_v8, %v2370_v25  ;;  %v5859_v40 = vand.u32 4294901760, %v2413_v0  ;;  %2786 = vmatpush.msra.mxu2 %v5752_v59  ;;  %2929 = vmatpush.msrb.mxu0 %v5787_v63  ;;  %v2824_v49 = vand.u32 4294901760, %v2823_v62  ;;  %v2835_v54 = vsub.f32 %v5787_v63, %v2834_v57 }
 0x24f   : > { %v5868_v53 = vsub.f32 %v2417_v30, %v5825_v51  ;;  %v2846_v43 = vand.u32 4294901760, %v5831_v5  ;;  %v6515_v37 = vsel %vm5337_vm3, %v6513_v20, %v6514_v44  ;;  %v2364_v35 = vmul.f32 %v1967_v56, %v6517_v10  ;;  %2982 = vmatpush.msrb.mxu1 %v5752_v59 }
 0x250   : > { %v1907_v38 = vsel %vm5769_vm9, %v6516_v52, %v6515_v37  ;;  %v2407_v27 = vmul.f32 %v4334_v8, %v2368_v6  ;;  %v5881_v26 = vand.u32 4294901760, %v2411_v48  ;;  %2788 = vmatpush.msra.mxu2 %v5782_v33  ;;  %2825 = vmatpush.msra.mxu3 %v2824_v49  ;;  %v2830_v7 = vand.u32 4294901760, %v2829_v28 }
 0x251   : > { %v2841_v29 = vsub.f32 %v5813_v41, %v2840_v13  ;;  %v5889_v30 = vsub.f32 %v2415_v23, %v5839_v3  ;;  %v2852_v36 = vand.u32 4294901760, %v5851_v61  ;;  %v2362_v39 = vmul.f32 %v1937_v60, %v6518_v15  ;;  %2932 = vmatpush.msrb.mxu0 %v5813_v41  ;;  %2984 = vmatpush.msrb.mxu1 %v5782_v33 }
 0x252   : > { %v2405_v1 = vmul.f32 %v4334_v8, %v2366_v46  ;;  %v5894_v58 = vand.u32 4294901760, %v2409_v18  ;;  %2790 = vmatpush.msra.mxu2 %v5805_v12  ;;  %2831 = vmatpush.msra.mxu3 %v2830_v7  ;;  %v2836_v45 = vand.u32 4294901760, %v2835_v54  ;;  %v2847_v23 = vsub.f32 %v5831_v5, %v2846_v43 }
 0x253   : > { %v5903_v47 = vsub.f32 %v2413_v0, %v5859_v40  ;;  %v2858_v31 = vand.u32 4294901760, %v5868_v53  ;;  %v2360_v55 = vmul.f32 %v1907_v38, %v6519_v22  ;;  %v2403_v17 = vmul.f32 %v4334_v8, %v2364_v35  ;;  %2935 = vmatpush.msrb.mxu0 %v5831_v5  ;;  %2986 = vmatpush.msrb.mxu1 %v5805_v12 }
 0x254   : > { %v5908_v2 = vand.u32 4294901760, %v2407_v27  ;;  %2792 = vmatpush.msra.mxu2 %v5825_v51  ;;  %2837 = vmatpush.msra.mxu3 %v2836_v45  ;;  %v2842_v25 = vand.u32 4294901760, %v2841_v29  ;;  %v2853_v0 = vsub.f32 %v5851_v61, %v2852_v36  ;;  %v5917_v24 = vsub.f32 %v2411_v48, %v5881_v26 }
 0x255   : > { %v2864_v56 = vand.u32 4294901760, %v5889_v30  ;;  %v2401_v14 = vmul.f32 %v4334_v8, %v2362_v39  ;;  %v5921_v6 = vand.u32 4294901760, %v2405_v1  ;;  %2938 = vmatpush.msrb.mxu0 %v5851_v61  ;;  %2988 = vmatpush.msrb.mxu1 %v5825_v51  ;;  %v2848_v62 = vand.u32 4294901760, %v2847_v23 }
 0x256   : > { %2794 = vmatpush.msra.mxu2 %v5839_v3  ;;  %2843 = vmatpush.msra.mxu3 %v2842_v25  ;;  %v2859_v28 = vsub.f32 %v5868_v53, %v2858_v31  ;;  %v5930_v48 = vsub.f32 %v2409_v18, %v5894_v58  ;;  %v2870_v50 = vand.u32 4294901760, %v5903_v47  ;;  %v2399_v60 = vmul.f32 %v4334_v8, %v2360_v55 }
 0x257   : > { %v5934_v42 = vand.u32 4294901760, %v2403_v17  ;;  %2941 = vmatpush.msrb.mxu0 %v5868_v53  ;;  %2990 = vmatpush.msrb.mxu1 %v5839_v3  ;;  %v2854_v46 = vand.u32 4294901760, %v2853_v0  ;;  %v2865_v49 = vsub.f32 %v5889_v30, %v2864_v56  ;;  %v5943_v18 = vsub.f32 %v2407_v27, %v5908_v2 }
 0x258   : > { %2796 = vmatpush.msra.mxu2 %v5859_v40  ;;  %2849 = vmatpush.msra.mxu3 %v2848_v62  ;;  %v2876_v54 = vand.u32 4294901760, %v5917_v24  ;;  %v5946_v8 = vand.u32 4294901760, %v2401_v14  ;;  %v2860_v9 = vand.u32 4294901760, %v2859_v28  ;;  %v2871_v20 = vsub.f32 %v5903_v47, %v2870_v50 }
 0x259   : > { %2944 = vmatpush.msrb.mxu0 %v5889_v30  ;;  %2992 = vmatpush.msrb.mxu1 %v5859_v40  ;;  %v5955_v44 = vsub.f32 %v2405_v1, %v5921_v6  ;;  %v2882_v37 = vand.u32 4294901760, %v5930_v48  ;;  %v5958_v52 = vand.u32 4294901760, %v2399_v60  ;;  %v2866_v38 = vand.u32 4294901760, %v2865_v49 }
 0x25a   : > { %2798 = vmatpush.msra.mxu2 %v5881_v26  ;;  %2855 = vmatpush.msra.mxu3 %v2854_v46  ;;  %v2877_v10 = vsub.f32 %v5917_v24, %v2876_v54  ;;  %v5967_v35 = vsub.f32 %v2403_v17, %v5934_v42  ;;  %v2888_v27 = vand.u32 4294901760, %v5943_v18  ;;  %v2872_v7 = vand.u32 4294901760, %v2871_v20  ;;  %v6520_v46 = vld [vmem:[#allocation43_spill] sm:$0xff] }
 0x25b   : > { %2947 = vmatpush.msrb.mxu0 %v5903_v47  ;;  %2994 = vmatpush.msrb.mxu1 %v5881_v26  ;;  %v2883_v29 = vsub.f32 %v5930_v48, %v2882_v37  ;;  %v5977_v15 = vsub.f32 %v2401_v14, %v5946_v8  ;;  %v2894_v39 = vand.u32 4294901760, %v5955_v44  ;;  %v5987_v23 = vsub.f32 %v2399_v60, %v5958_v52 }
 0x25c   : > { %2800 = vmatpush.msra.mxu2 %v5894_v58  ;;  %2861 = vmatpush.msra.mxu3 %v2860_v9  ;;  %v2878_v1 = vand.u32 4294901760, %v2877_v10  ;;  %v2889_v45 = vsub.f32 %v5943_v18, %v2888_v27  ;;  %v2900_v22 = vand.u32 4294901760, %v5967_v35  ;;  %v6522_v10 = vld [vmem:[#allocation45_spill] sm:$0xff]  ;;  %vm3123_vm3 = vcmask 1040384  }
 0x25d   : > { %2950 = vmatpush.msrb.mxu0 %v5917_v24  ;;  %2996 = vmatpush.msrb.mxu1 %v5894_v58  ;;  %v2884_v55 = vand.u32 4294901760, %v2883_v29  ;;  %v2895_v17 = vsub.f32 %v5955_v44, %v2894_v39  ;;  %v2906_v25 = vand.u32 4294901760, %v5977_v15  ;;  %v2912_v62 = vand.u32 4294901760, %v5987_v23 }
 0x25e   : > { %2802 = vmatpush.msra.mxu2 %v5908_v2  ;;  %2867 = vmatpush.msra.mxu3 %v2866_v38  ;;  %v2890_v0 = vand.u32 4294901760, %v2889_v45  ;;  %v2901_v14 = vsub.f32 %v5967_v35, %v2900_v22  ;;  %v6521_v38 = vld [vmem:[#allocation41_spill] sm:$0xff] }
 0x25f   : > { %2953 = vmatpush.msrb.mxu0 %v5930_v48  ;;  %2998 = vmatpush.msrb.mxu1 %v5908_v2  ;;  %v2896_v28 = vand.u32 4294901760, %v2895_v17  ;;  %v2907_v60 = vsub.f32 %v5977_v15, %v2906_v25  ;;  %v2913_v9 = vsub.f32 %v5987_v23, %v2912_v62 }
 0x260   : > { %2804 = vmatpush.msra.mxu2 %v5921_v6  ;;  %2873 = vmatpush.msra.mxu3 %v2872_v7  ;;  %v2902_v49 = vand.u32 4294901760, %v2901_v14 }
 0x261   : > { %2956 = vmatpush.msrb.mxu0 %v5943_v18  ;;  %3000 = vmatpush.msrb.mxu1 %v5921_v6  ;;  %v2908_v20 = vand.u32 4294901760, %v2907_v60 }
 0x262   : > { %2806 = vmatpush.msra.mxu2 %v5934_v42  ;;  %2879 = vmatpush.msra.mxu3 %v2878_v1 }
 0x263   : > { %2959 = vmatpush.msrb.mxu0 %v5955_v44  ;;  %3002 = vmatpush.msrb.mxu1 %v5934_v42 }
 0x264   : > { %2808 = vmatpush.msra.mxu2 %v5946_v8  ;;  %2885 = vmatpush.msra.mxu3 %v2884_v55 }
 0x265   : > { %2962 = vmatpush.msrb.mxu0 %v5967_v35  ;;  %3004 = vmatpush.msrb.mxu1 %v5946_v8  ;;  %v2914_v35 = vand.u32 4294901760, %v2913_v9 }
 0x266   : > { %2810 = vmatpush.msra.mxu2 %v5958_v52  ;;  %2891 = vmatpush.msra.mxu3 %v2890_v0 }
 0x267   : > { %2965 = vmatpush.msrb.mxu0 %v5977_v15  ;;  %3006 = vmatpush.msrb.mxu1 %v5958_v52 }
 0x268   : > { %2816 = vmatmul.f32.vlgmr.msra.gmra.mxu2 %v6520_v46  ;;  %2897 = vmatpush.msra.mxu3 %v2896_v28  ;;  %v2670_v32 = vpop.f32.mrf.mxu3 }
 0x269   : > { %3017 = vmatpush.msrb.mxu2 %v2822_v19  ;;  %2968 = vmatpush.msrb.mxu0 %v5987_v23 }
 0x26a   : > { %2903 = vmatpush.msra.mxu3 %v2902_v49  ;;  %2971 = vmatmul.f32.vlgmr.msrb.gmra.mxu0 %v6521_v38 }
 0x26b   : > { %3021 = vmatpush.msrb.mxu2 %v2828_v34  ;;  %3010 = vmatmul.f32.vlgmr.msrb.gmra.mxu1 %v6522_v10 }
 0x26c   : > { %2909 = vmatpush.msra.mxu3 %v2908_v20 }
 0x26d   : > { %3025 = vmatpush.msrb.mxu2 %v2834_v57 }
 0x26e   : > { %2915 = vmatpush.msra.mxu3 %v2914_v35 }
 0x26f   : > { %3029 = vmatpush.msrb.mxu2 %v2840_v13  ;;  %2917 = vmatmul.f32.vlgmr.msra.gmra.mxu3 %v6523_v11 }
 0x270   : > { %3084 = vmatpush.msrb.mxu3 %v5784_v16 }
 0x271   : > { %3033 = vmatpush.msrb.mxu2 %v2846_v43 }
 0x272   : > { %3086 = vmatpush.msrb.mxu3 %v5692_v4  ;;  %v2476_v4 = vpop.f32.mrf.mxu0 }
 0x273   : > { %3037 = vmatpush.msrb.mxu2 %v2852_v36  ;;  %v3126_v36 = vlaneseq }
 0x274   : > { %3088 = vmatpush.msrb.mxu3 %v5720_v21  ;;  %v2631_v21 = vpop.f32.mrf.mxu2 }
 0x275   : > { %3041 = vmatpush.msrb.mxu2 %v2858_v31  ;;  %vm3128_vm2 = vcmp.lt.s32.totalorder %v3126_v36, 256 }
 0x276   : > { %3090 = vmatpush.msrb.mxu3 %v5752_v59  ;;  %v2577_v59 = vpop.f32.mrf.mxu1 }
 0x277   : > { %3045 = vmatpush.msrb.mxu2 %v2864_v56 }
 0x278   : > { %3092 = vmatpush.msrb.mxu3 %v5782_v33  ;;  %v2435_v33 = vpop.permute.xlu1 %2434 }
 0x279   : > { %3049 = vmatpush.msrb.mxu2 %v2870_v50 }
 0x27a   : > { %3094 = vmatpush.msrb.mxu3 %v5805_v12  ;;  %v2437_v12 = vperm.slane %v2435_v33, 0 }
 0x27b   : > { %3053 = vmatpush.msrb.mxu2 %v2876_v54 }
 0x27c   : > { %3096 = vmatpush.msrb.mxu3 %v5825_v51  ;;  %v2477_v19 = vadd.f32 %v2476_v4, %v2437_v12 }
 0x27d   : > { %3057 = vmatpush.msrb.mxu2 %v2882_v37 }
 0x27e   : > { %3098 = vmatpush.msrb.mxu3 %v5839_v3  ;;  %v2578_v3 = vadd.f32 %v2577_v59, %v2477_v19 }
 0x27f   : > { %3061 = vmatpush.msrb.mxu2 %v2888_v27 }
 0x280   : > { %3100 = vmatpush.msrb.mxu3 %v5859_v40  ;;  %v2739_v16 = vpop.f32.mrf.mxu0  ;;  %v2632_v40 = vadd.f32 %v2631_v21, %v2578_v3 }
 0x281   : > { %3065 = vmatpush.msrb.mxu2 %v2894_v39 }
 0x282   : > { %3102 = vmatpush.msrb.mxu3 %v5881_v26  ;;  %v2671_v26 = vadd.f32 %v2670_v32, %v2632_v40 }
 0x283   : > { %3069 = vmatpush.msrb.mxu2 %v2900_v22 }
 0x284   : > { %3104 = vmatpush.msrb.mxu3 %v5894_v58  ;;  %v2740_v47 = vadd.f32 %v2739_v16, %v2671_v26 }
 0x285   : > { %3073 = vmatpush.msrb.mxu2 %v2906_v25 }
 0x286   : > { %3106 = vmatpush.msrb.mxu3 %v5908_v2 }
 0x287   : > { %3077 = vmatpush.msrb.mxu2 %v2912_v62 }
 0x288   : > { %3079 = vmatmul.f32.vlgmr.msrb.gmra.mxu2 %v6523_v11  ;;  %3108 = vmatpush.msrb.mxu3 %v5921_v6  ;;  %v2776_v41 = vpop.f32.mrf.mxu1 }
 0x289   : > { %v2777_v2 = vadd.f32 %v2776_v41, %v2740_v47 }
 0x28a   : > { %3110 = vmatpush.msrb.mxu3 %v5934_v42 }
 0x28c   : > { %3112 = vmatpush.msrb.mxu3 %v5946_v8 }
 0x28e   : > { %3114 = vmatpush.msrb.mxu3 %v5958_v52 }
 0x28f   : > { %3116 = vmatmul.f32.vlgmr.msrb.gmra.mxu3 %v6523_v11 }
 0x2e7   : > { %v2972_v57 = vpop.f32.mrf.mxu0 }
 0x2e8   : > { %v3011_v13 = vpop.f32.mrf.mxu1 }
 0x2eb   : > { %v2817_v63 = vpop.f32.mrf.mxu2 }
 0x2ec   : > { %v2818_v51 = vadd.f32 %v2817_v63, %v2437_v12 }
 0x2f2   : > { %v2918_v34 = vpop.f32.mrf.mxu3 }
 0x2f3   : > { %v2919_v5 = vadd.f32 %v2918_v34, %v2818_v51 }
 0x2f5   : > { %v2973_v61 = vadd.f32 %v2972_v57, %v2919_v5 }
 0x2f7   : > { %v3012_v43 = vadd.f32 %v3011_v13, %v2973_v61 }
 0x30b   : > { %v3080_v53 = vpop.f32.mrf.mxu2 }
 0x30c   : > { %v3081_v30 = vadd.f32 %v3080_v53, %v3012_v43 }
 0x312   : > { %v3117_v58 = vpop.f32.mrf.mxu3 }
 0x313   : > { %v3118_v31 = vadd.f32 %v3117_v58, %v3081_v30 }
 0x315   : > { %v3122_v24 = vrot.slane %v3118_v31, 7 }
 0x317   : > { %v3124_v56 = vsel %vm3123_vm3, %v2777_v2, %v3122_v24 }
 0x318   : > { %3130 = vst.msk [vmem:[%s290_s11] sm:$0x3] %vm3128_vm2, %v3124_v56 }
 0x319 PF: > { %s19_s27 = sadd.s32 1, %s3436_s27   ;;  %s6524_s25 = smov %s3432_s26 }
 0x31a   : > { %p16_p5 = scmp.ge.s32.totalorder %s19_s27, 4   ;;  %s6525_s26 = smov %s6527_s3 }
 0x31c   :  { %18 = sbr.rel (!%p16_p5) target bundleno = 3 (0x3), region = 74 }

</bundles_post_ra>
